<compile_context>
chip_gen: v7x
topology: tpu7x:2x2x1
jax: 0.10.0
libtpu: 0.0.40
codegen_flags: <defaults>
</compile_context>

<pallas_src>
import functools

import jax
import jax.numpy as jnp
import numpy as np
from jax.experimental import pallas as pl
from jax.experimental.pallas import tpu as pltpu

LEAK = 0.1  # negative_slope of every LeakyReLU in the module


def _leaky(x):
    return jnp.where(x > 0, x, LEAK * x)


def dablock_kernel(x_ref, ktap_ref, code_ref, w1x1_ref, mw1f_ref, mw1c_ref,
                   b1_ref, mw2_ref, b2_ref, out_ref, acc_ref, *, h, w):
    """One grid step = TP lane-packed view pairs (2*TP views).

    x_ref   : (h, w, TP, 128) bf16   two views' channels packed on lanes
    ktap_ref: (9, TP, 128)    bf16   dynamic depthwise taps (from wrapper)
    code_ref: (TP, 32)        bf16   packed degradation codes
    w1x1_ref: (128, 128)      bf16   block-diag packed conv_1x1 weight
    mw1f/mw1c/b1/mw2/b2              block-diag packed CA-MLP params
    out_ref : (h, w, TP, 128) out_dtype
    acc_ref : (h, w, TP, 128) f32    VMEM accumulator for the depthwise conv
    """
    TP, C2 = x_ref.shape[2], x_ref.shape[3]

    # ---- dynamic per-view/per-channel depthwise 3x3 (cross-corr, pad=1) ----
    # Centre tap (dy = dx = 1) covers the full output range: initialise the
    # accumulator from its product (no zero-fill).
    kc = ktap_ref[4].astype(jnp.float32)                       # (TP, C2)
    acc_ref[...] = x_ref[...].astype(jnp.float32) * kc

    # Remaining 8 taps: boundary-clipped slices on the LEADING (h, w) dims,
    # added into the matching output sub-range (tile-aligned, no halo).
    for tap in (0, 1, 2, 3, 5, 6, 7, 8):
        dy, dx = tap // 3, tap % 3
        oy0, oy1 = max(0, 1 - dy), min(h, h + 1 - dy)
        ox0, ox1 = max(0, 1 - dx), min(w, w + 1 - dx)
        iy0, iy1 = oy0 + dy - 1, oy1 + dy - 1
        ix0, ix1 = ox0 + dx - 1, ox1 + dx - 1
        kt = ktap_ref[tap].astype(jnp.float32)                 # (TP, C2) tile
        win = x_ref[iy0:iy1, ix0:ix1, :, :].astype(jnp.float32)
        acc_ref[oy0:oy1, ox0:ox1, :, :] = (
            acc_ref[oy0:oy1, ox0:ox1, :, :] + win * kt)

    fea = _leaky(acc_ref[...])                                 # self.relu

    # ---- conv_1x1: one lane-dense MXU matmul, M = h*w*TP rows, K = N = 128 --
    # (block-diagonal weight keeps the two lane-packed views independent).
    fea2 = fea.reshape(h * w * TP, C2).astype(jnp.bfloat16)
    fda = jnp.dot(fea2, w1x1_ref[...],
                  preferred_element_type=jnp.float32)          # (h*w*TP, C2)
    fda = fda.reshape(h, w, TP, C2)

    # ---- CA layer: global avg-pool + (64+16)->16->64 MLP + sigmoid gate ----
    code_fea = jnp.mean(fda, axis=(0, 1)).astype(jnp.bfloat16)  # (TP, C2)
    a1 = (jnp.dot(code_fea, mw1f_ref[...], preferred_element_type=jnp.float32)
          + jnp.dot(code_ref[...], mw1c_ref[...], preferred_element_type=jnp.float32)
          + b1_ref[...])                                        # (TP, 32)
    a1 = _leaky(a1).astype(jnp.bfloat16)
    att = jax.nn.sigmoid(
        jnp.dot(a1, mw2_ref[...], preferred_element_type=jnp.float32)
        + b2_ref[...])                                          # (TP, C2)

    # ---- residual combine: fea_da + fea_da*att + x --------------------------
    x_res = x_ref[...].astype(jnp.float32)
    out_ref[...] = (fda * (1.0 + att) + x_res).astype(out_ref.dtype)


def dablock_forward(x, code_array, p, *, pack_per_block=16,
                    out_dtype=jnp.float32):
    """x: (b,u,v,c,h,w); code_array: (b,16,u,v).

    pack_per_block (TP) = view-pairs per grid step (2*TP views).  Must be a
    multiple of 8; >= 16 gives native bf16 (16,128) sublane packing.  Budget
    per generation: push TP up on v6e (128 MiB VMEM); cap it on v7x (64 MiB)
    and keep the resulting grid length an even number >= 2 so both
    TensorCores get work via the parallel grid axis.

    out_dtype=jnp.bfloat16 halves the largest HBM stream when the downstream
    consumer runs in bf16.
    """
    b, u, v, c, h, w = x.shape
    assert c == 64, "DABlock requires channels == 64 (64*9 dynamic kernel)."
    assert pack_per_block % 8 == 0
    N = b * u * v
    C2 = 2 * c
    TP = pack_per_block

    views_per_block = 2 * TP
    Npad = ((N + views_per_block - 1) // views_per_block) * views_per_block
    Npack = Npad // 2
    grid_n = Npack // TP

    # ---- generate_kernel hoisted to XLA: one batched matmul over all views --
    code = jnp.transpose(code_array, (0, 2, 3, 1)).reshape(N, 16)   # '(b u v) c'
    if Npad != N:
        code = jnp.pad(code, ((0, Npad - N), (0, 0)))
    g1 = _leaky(code @ p["genW1"])                                  # (Npad, 64)
    ktaps = jnp.einsum("nj,tjc->tnc", g1, p["genW2s"])              # (9, Npad, 64)
    ktaps_packed = ktaps.reshape(9, Npack, C2).astype(jnp.bfloat16)
    code_packed = code.reshape(Npack, 32).astype(jnp.bfloat16)

    # ---- activations: channels-last, two views packed on the lane axis -----
    # (Ideally the surrounding model produces/consumes this (h, w, N, c)
    # layout directly so these transposes don't add extra HBM passes.)
    x_t = jnp.transpose(x.reshape(N, c, h, w), (2, 3, 0, 1))        # (h, w, N, c)
    if Npad != N:
        x_t = jnp.pad(x_t, ((0, 0), (0, 0), (0, Npad - N), (0, 0)))
    x_packed = x_t.reshape(h, w, Npack, C2).astype(jnp.bfloat16)

    # ---- weights: block-diagonal so lane-packed views share one matmul -----
    def diag2(wm):
        a_, b_ = wm.shape
        z = jnp.zeros((2 * a_, 2 * b_), wm.dtype)
        z = z.at[:a_, :b_].set(wm)
        return z.at[a_:, b_:].set(wm)

    w1x1_p = diag2(p["w1x1"]).astype(jnp.bfloat16)        # (128, 128)
    mw1f_p = diag2(p["mW1a"]).astype(jnp.bfloat16)        # (128, 32)
    mw1c_p = diag2(p["mW1b"]).astype(jnp.bfloat16)        # (32, 32)
    mw2_p = diag2(p["mW2"]).astype(jnp.bfloat16)          # (32, 128)
    b1_p = jnp.tile(p["b1"], (1, 2)).astype(jnp.float32)  # (1, 32)
    b2_p = jnp.tile(p["b2"], (1, 2)).astype(jnp.float32)  # (1, 128)

    kernel = functools.partial(dablock_kernel, h=h, w=w)
    out_packed = pl.pallas_call(
        kernel,
        out_shape=jax.ShapeDtypeStruct((h, w, Npack, C2), out_dtype),
        grid_spec=pltpu.PrefetchScalarGridSpec(
            num_scalar_prefetch=0,
            grid=(grid_n,),
            in_specs=[
                pl.BlockSpec((h, w, TP, C2), lambda n: (0, 0, n, 0)),  # x
                pl.BlockSpec((9, TP, C2), lambda n: (0, n, 0)),        # taps
                pl.BlockSpec((TP, 32), lambda n: (n, 0)),              # code
                pl.BlockSpec((C2, C2), lambda n: (0, 0)),              # conv_1x1
                pl.BlockSpec((C2, 32), lambda n: (0, 0)),              # CA W1 (fea)
                pl.BlockSpec((32, 32), lambda n: (0, 0)),              # CA W1 (code)
                pl.BlockSpec((1, 32), lambda n: (0, 0)),               # CA b1
                pl.BlockSpec((32, C2), lambda n: (0, 0)),              # CA W2
                pl.BlockSpec((1, C2), lambda n: (0, 0)),               # CA b2
            ],
            out_specs=pl.BlockSpec((h, w, TP, C2), lambda n: (0, 0, n, 0)),
            scratch_shapes=[pltpu.VMEM((h, w, TP, C2), jnp.float32)],
        ),
        compiler_params=pltpu.CompilerParams(
            dimension_semantics=("parallel",)),
    )(x_packed, ktaps_packed, code_packed, w1x1_p, mw1f_p, mw1c_p,
      b1_p, mw2_p, b2_p)

    out = out_packed.reshape(h, w, Npad, c)[:, :, :N, :]            # (h, w, N, c)
    out = jnp.transpose(out, (2, 3, 0, 1)).reshape(b, u, v, c, h, w)
    return out


def dablock_ref(x, code_array, p):
    """Pure-JAX f32 reference with identical semantics (for validation)."""
    b, u, v, c, h, w = x.shape
    N = b * u * v
    xv = jnp.transpose(x.reshape(N, c, h, w), (0, 2, 3, 1))         # (N,h,w,c)
    code = jnp.transpose(code_array, (0, 2, 3, 1)).reshape(N, 16)

    g1 = _leaky(code @ p["genW1"])                                  # (N,64)
    ker = jnp.einsum("nj,tjc->ntc", g1, p["genW2s"])                # (N,9,c)

    xpad = jnp.pad(xv, ((0, 0), (1, 1), (1, 1), (0, 0)))
    acc = jnp.zeros((N, h, w, c), jnp.float32)
    for tap in range(9):
        dy, dx = tap // 3, tap % 3
        acc = acc + xpad[:, dy:dy + h, dx:dx + w, :] * ker[:, tap, None, None, :]
    fea = _leaky(acc)

    fea_da = jnp.einsum("nhwi,io->nhwo", fea, p["w1x1"])
    code_fea = jnp.mean(fea_da, axis=(1, 2))                        # (N,c)
    a1 = _leaky(code_fea @ p["mW1a"] + code @ p["mW1b"] + p["b1"])
    att = jax.nn.sigmoid(a1 @ p["mW2"] + p["b2"])                   # (N,c)
    out = fea_da + fea_da * att[:, None, None, :] + xv
    return jnp.transpose(out, (0, 3, 1, 2)).reshape(b, u, v, c, h, w)


if __name__ == "__main__":
    # Channels are fixed at 64 by the module (64*9 dynamic-kernel head,
    # CA_Layer(80, 64)); code has 16 channels.  N = b*u*v = 64 views ->
    # grid of 2 parallel blocks of 32 views each (lane-packed as TP=16 pairs),
    # so both v7x TensorCores have work.
    b, u, v, c, h, w = 4, 4, 4, 64, 8, 8

    key = jax.random.PRNGKey(0)
    ks = jax.random.split(key, 10)
    params = {
        "genW1": 0.1 * jax.random.normal(ks[0], (16, 64), jnp.float32),
        "genW2s": 0.1 * jax.random.normal(ks[1], (9, 64, 64), jnp.float32),
        "w1x1": 0.1 * jax.random.normal(ks[2], (64, 64), jnp.float32),
        "mW1a": 0.1 * jax.random.normal(ks[3], (64, 16), jnp.float32),
        "mW1b": 0.1 * jax.random.normal(ks[4], (16, 16), jnp.float32),
        "b1":   0.1 * jax.random.normal(ks[5], (1, 16), jnp.float32),
        "mW2":  0.1 * jax.random.normal(ks[6], (16, 64), jnp.float32),
        "b2":   0.1 * jax.random.normal(ks[7], (1, 64), jnp.float32),
    }
    x = jax.random.normal(ks[8], (b, u, v, c, h, w), jnp.float32)
    code_array = jax.random.normal(ks[9], (b, 16, u, v), jnp.float32)

    out = jax.block_until_ready(dablock_forward(x, code_array, params))
    ref = jax.block_until_ready(dablock_ref(x, code_array, params))

    assert out.shape == (b, u, v, c, h, w)
    scale = float(jnp.max(jnp.abs(ref)))
    max_err = float(jnp.max(jnp.abs(out - ref)))
    # bf16 activation/weight path vs f32 reference -> scale-relative tolerance.
    assert np.isfinite(max_err) and max_err < 4e-2 * max(1.0, scale), \
        f"mismatch: max_err={max_err} (ref scale {scale})"
    print("KERNEL_OK")
</pallas_src>

<mosaic_0001>
module attributes {stable_mosaic.version = 11 : i64} {
  func.func @dablock_kernel(%arg0: i32, %arg1: memref<8x8x16x128xbf16, #tpu.memory_space<vmem>>, %arg2: memref<9x16x128xbf16, #tpu.memory_space<vmem>>, %arg3: memref<16x32xbf16, #tpu.memory_space<vmem>>, %arg4: memref<128x128xbf16, #tpu.memory_space<vmem>>, %arg5: memref<128x32xbf16, #tpu.memory_space<vmem>>, %arg6: memref<32x32xbf16, #tpu.memory_space<vmem>>, %arg7: memref<1x32xf32, #tpu.memory_space<vmem>>, %arg8: memref<32x128xbf16, #tpu.memory_space<vmem>>, %arg9: memref<1x128xf32, #tpu.memory_space<vmem>>, %arg10: memref<8x8x16x128xf32, #tpu.memory_space<vmem>>, %arg11: memref<8x8x16x128xf32, #tpu.memory_space<vmem>>) attributes {dimension_semantics = [#tpu.dimension_semantics<parallel>], iteration_bounds = array<i64: 2>, scalar_prefetch = 0 : i64, scratch_operands = 1 : i64, tpu.core_type = #tpu.core_type<tc>, window_params = [{transform_indices = @transform_0, window_bounds = array<i64: 8, 8, 16, 128>}, {transform_indices = @transform_1, window_bounds = array<i64: 9, 16, 128>}, {transform_indices = @transform_2, window_bounds = array<i64: 16, 32>}, {pipeline_mode = #tpu.pipeline_mode<synchronous>, transform_indices = @transform_3, window_bounds = array<i64: 128, 128>}, {pipeline_mode = #tpu.pipeline_mode<synchronous>, transform_indices = @transform_4, window_bounds = array<i64: 128, 32>}, {pipeline_mode = #tpu.pipeline_mode<synchronous>, transform_indices = @transform_5, window_bounds = array<i64: 32, 32>}, {pipeline_mode = #tpu.pipeline_mode<synchronous>, transform_indices = @transform_6, window_bounds = array<i64: 1, 32>}, {pipeline_mode = #tpu.pipeline_mode<synchronous>, transform_indices = @transform_7, window_bounds = array<i64: 32, 128>}, {pipeline_mode = #tpu.pipeline_mode<synchronous>, transform_indices = @transform_8, window_bounds = array<i64: 1, 128>}, {transform_indices = @transform_9, window_bounds = array<i64: 8, 8, 16, 128>}]} {
    %c4 = arith.constant 4 : index
    %c0 = arith.constant 0 : index
    %c0_0 = arith.constant 0 : index
    %0 = vector.load %arg2[%c4, %c0, %c0_0] : memref<9x16x128xbf16, #tpu.memory_space<vmem>>, vector<1x16x128xbf16>
    %1 = vector.shape_cast %0 : vector<1x16x128xbf16> to vector<16x128xbf16>
    %2 = arith.extf %1 : vector<16x128xbf16> to vector<16x128xf32>
    %c0_1 = arith.constant 0 : index
    %c0_2 = arith.constant 0 : index
    %c0_3 = arith.constant 0 : index
    %c0_4 = arith.constant 0 : index
    %3 = vector.load %arg1[%c0_1, %c0_2, %c0_3, %c0_4] : memref<8x8x16x128xbf16, #tpu.memory_space<vmem>>, vector<8x8x16x128xbf16>
    %4 = arith.extf %3 : vector<8x8x16x128xbf16> to vector<8x8x16x128xf32>
    %5 = vector.shape_cast %2 : vector<16x128xf32> to vector<1x1x16x128xf32>
    %6 = vector.broadcast %5 : vector<1x1x16x128xf32> to vector<8x8x16x128xf32>
    %7 = arith.mulf %4, %6 : vector<8x8x16x128xf32>
    %c0_5 = arith.constant 0 : index
    %c0_6 = arith.constant 0 : index
    %c0_7 = arith.constant 0 : index
    %c0_8 = arith.constant 0 : index
    %8 = vector.load %arg11[%c0_5, %c0_6, %c0_7, %c0_8] : memref<8x8x16x128xf32, #tpu.memory_space<vmem>>, vector<8x8x16x128xf32>
    tpu.vector_store %arg11[%c0_5, %c0_6, %c0_7, %c0_8], %7 {strides = array<i32>} : memref<8x8x16x128xf32, #tpu.memory_space<vmem>>, vector<8x8x16x128xf32>,
    %c0_9 = arith.constant 0 : index
    %c0_10 = arith.constant 0 : index
    %c0_11 = arith.constant 0 : index
    %9 = vector.load %arg2[%c0_9, %c0_10, %c0_11] : memref<9x16x128xbf16, #tpu.memory_space<vmem>>, vector<1x16x128xbf16>
    %10 = vector.shape_cast %9 : vector<1x16x128xbf16> to vector<16x128xbf16>
    %11 = arith.extf %10 : vector<16x128xbf16> to vector<16x128xf32>
    %c0_12 = arith.constant 0 : index
    %c0_13 = arith.constant 0 : index
    %c0_14 = arith.constant 0 : index
    %c0_15 = arith.constant 0 : index
    %12 = vector.load %arg1[%c0_12, %c0_13, %c0_14, %c0_15] : memref<8x8x16x128xbf16, #tpu.memory_space<vmem>>, vector<7x7x16x128xbf16>
    %13 = arith.extf %12 : vector<7x7x16x128xbf16> to vector<7x7x16x128xf32>
    %c1 = arith.constant 1 : index
    %c1_16 = arith.constant 1 : index
    %c0_17 = arith.constant 0 : index
    %c0_18 = arith.constant 0 : index
    %14 = vector.load %arg11[%c1, %c1_16, %c0_17, %c0_18] : memref<8x8x16x128xf32, #tpu.memory_space<vmem>>, vector<7x7x16x128xf32>
    %15 = vector.shape_cast %11 : vector<16x128xf32> to vector<1x1x16x128xf32>
    %16 = vector.broadcast %15 : vector<1x1x16x128xf32> to vector<7x7x16x128xf32>
    %17 = arith.mulf %13, %16 : vector<7x7x16x128xf32>
    %18 = arith.addf %14, %17 : vector<7x7x16x128xf32>
    %c1_19 = arith.constant 1 : index
    %c1_20 = arith.constant 1 : index
    %c0_21 = arith.constant 0 : index
    %c0_22 = arith.constant 0 : index
    %19 = vector.load %arg11[%c1_19, %c1_20, %c0_21, %c0_22] : memref<8x8x16x128xf32, #tpu.memory_space<vmem>>, vector<7x7x16x128xf32>
    tpu.vector_store %arg11[%c1_19, %c1_20, %c0_21, %c0_22], %18 {strides = array<i32>} : memref<8x8x16x128xf32, #tpu.memory_space<vmem>>, vector<7x7x16x128xf32>,
    %c1_23 = arith.constant 1 : index
    %c0_24 = arith.constant 0 : index
    %c0_25 = arith.constant 0 : index
    %20 = vector.load %arg2[%c1_23, %c0_24, %c0_25] : memref<9x16x128xbf16, #tpu.memory_space<vmem>>, vector<1x16x128xbf16>
    %21 = vector.shape_cast %20 : vector<1x16x128xbf16> to vector<16x128xbf16>
    %22 = arith.extf %21 : vector<16x128xbf16> to vector<16x128xf32>
    %c0_26 = arith.constant 0 : index
    %c0_27 = arith.constant 0 : index
    %c0_28 = arith.constant 0 : index
    %c0_29 = arith.constant 0 : index
    %23 = vector.load %arg1[%c0_26, %c0_27, %c0_28, %c0_29] : memref<8x8x16x128xbf16, #tpu.memory_space<vmem>>, vector<7x8x16x128xbf16>
    %24 = arith.extf %23 : vector<7x8x16x128xbf16> to vector<7x8x16x128xf32>
    %c1_30 = arith.constant 1 : index
    %c0_31 = arith.constant 0 : index
    %c0_32 = arith.constant 0 : index
    %c0_33 = arith.constant 0 : index
    %25 = vector.load %arg11[%c1_30, %c0_31, %c0_32, %c0_33] : memref<8x8x16x128xf32, #tpu.memory_space<vmem>>, vector<7x8x16x128xf32>
    %26 = vector.shape_cast %22 : vector<16x128xf32> to vector<1x1x16x128xf32>
    %27 = vector.broadcast %26 : vector<1x1x16x128xf32> to vector<7x8x16x128xf32>
    %28 = arith.mulf %24, %27 : vector<7x8x16x128xf32>
    %29 = arith.addf %25, %28 : vector<7x8x16x128xf32>
    %c1_34 = arith.constant 1 : index
    %c0_35 = arith.constant 0 : index
    %c0_36 = arith.constant 0 : index
    %c0_37 = arith.constant 0 : index
    %30 = vector.load %arg11[%c1_34, %c0_35, %c0_36, %c0_37] : memref<8x8x16x128xf32, #tpu.memory_space<vmem>>, vector<7x8x16x128xf32>
    tpu.vector_store %arg11[%c1_34, %c0_35, %c0_36, %c0_37], %29 {strides = array<i32>} : memref<8x8x16x128xf32, #tpu.memory_space<vmem>>, vector<7x8x16x128xf32>,
    %c2 = arith.constant 2 : index
    %c0_38 = arith.constant 0 : index
    %c0_39 = arith.constant 0 : index
    %31 = vector.load %arg2[%c2, %c0_38, %c0_39] : memref<9x16x128xbf16, #tpu.memory_space<vmem>>, vector<1x16x128xbf16>
    %32 = vector.shape_cast %31 : vector<1x16x128xbf16> to vector<16x128xbf16>
    %33 = arith.extf %32 : vector<16x128xbf16> to vector<16x128xf32>
    %c0_40 = arith.constant 0 : index
    %c1_41 = arith.constant 1 : index
    %c0_42 = arith.constant 0 : index
    %c0_43 = arith.constant 0 : index
    %34 = vector.load %arg1[%c0_40, %c1_41, %c0_42, %c0_43] : memref<8x8x16x128xbf16, #tpu.memory_space<vmem>>, vector<7x7x16x128xbf16>
    %35 = arith.extf %34 : vector<7x7x16x128xbf16> to vector<7x7x16x128xf32>
    %c1_44 = arith.constant 1 : index
    %c0_45 = arith.constant 0 : index
    %c0_46 = arith.constant 0 : index
    %c0_47 = arith.constant 0 : index
    %36 = vector.load %arg11[%c1_44, %c0_45, %c0_46, %c0_47] : memref<8x8x16x128xf32, #tpu.memory_space<vmem>>, vector<7x7x16x128xf32>
    %37 = vector.shape_cast %33 : vector<16x128xf32> to vector<1x1x16x128xf32>
    %38 = vector.broadcast %37 : vector<1x1x16x128xf32> to vector<7x7x16x128xf32>
    %39 = arith.mulf %35, %38 : vector<7x7x16x128xf32>
    %40 = arith.addf %36, %39 : vector<7x7x16x128xf32>
    %c1_48 = arith.constant 1 : index
    %c0_49 = arith.constant 0 : index
    %c0_50 = arith.constant 0 : index
    %c0_51 = arith.constant 0 : index
    %41 = vector.load %arg11[%c1_48, %c0_49, %c0_50, %c0_51] : memref<8x8x16x128xf32, #tpu.memory_space<vmem>>, vector<7x7x16x128xf32>
    tpu.vector_store %arg11[%c1_48, %c0_49, %c0_50, %c0_51], %40 {strides = array<i32>} : memref<8x8x16x128xf32, #tpu.memory_space<vmem>>, vector<7x7x16x128xf32>,
    %c3 = arith.constant 3 : index
    %c0_52 = arith.constant 0 : index
    %c0_53 = arith.constant 0 : index
    %42 = vector.load %arg2[%c3, %c0_52, %c0_53] : memref<9x16x128xbf16, #tpu.memory_space<vmem>>, vector<1x16x128xbf16>
    %43 = vector.shape_cast %42 : vector<1x16x128xbf16> to vector<16x128xbf16>
    %44 = arith.extf %43 : vector<16x128xbf16> to vector<16x128xf32>
    %c0_54 = arith.constant 0 : index
    %c0_55 = arith.constant 0 : index
    %c0_56 = arith.constant 0 : index
    %c0_57 = arith.constant 0 : index
    %45 = vector.load %arg1[%c0_54, %c0_55, %c0_56, %c0_57] : memref<8x8x16x128xbf16, #tpu.memory_space<vmem>>, vector<8x7x16x128xbf16>
    %46 = arith.extf %45 : vector<8x7x16x128xbf16> to vector<8x7x16x128xf32>
    %c0_58 = arith.constant 0 : index
    %c1_59 = arith.constant 1 : index
    %c0_60 = arith.constant 0 : index
    %c0_61 = arith.constant 0 : index
    %47 = vector.load %arg11[%c0_58, %c1_59, %c0_60, %c0_61] : memref<8x8x16x128xf32, #tpu.memory_space<vmem>>, vector<8x7x16x128xf32>
    %48 = vector.shape_cast %44 : vector<16x128xf32> to vector<1x1x16x128xf32>
    %49 = vector.broadcast %48 : vector<1x1x16x128xf32> to vector<8x7x16x128xf32>
    %50 = arith.mulf %46, %49 : vector<8x7x16x128xf32>
    %51 = arith.addf %47, %50 : vector<8x7x16x128xf32>
    %c0_62 = arith.constant 0 : index
    %c1_63 = arith.constant 1 : index
    %c0_64 = arith.constant 0 : index
    %c0_65 = arith.constant 0 : index
    %52 = vector.load %arg11[%c0_62, %c1_63, %c0_64, %c0_65] : memref<8x8x16x128xf32, #tpu.memory_space<vmem>>, vector<8x7x16x128xf32>
    tpu.vector_store %arg11[%c0_62, %c1_63, %c0_64, %c0_65], %51 {strides = array<i32>} : memref<8x8x16x128xf32, #tpu.memory_space<vmem>>, vector<8x7x16x128xf32>,
    %c5 = arith.constant 5 : index
    %c0_66 = arith.constant 0 : index
    %c0_67 = arith.constant 0 : index
    %53 = vector.load %arg2[%c5, %c0_66, %c0_67] : memref<9x16x128xbf16, #tpu.memory_space<vmem>>, vector<1x16x128xbf16>
    %54 = vector.shape_cast %53 : vector<1x16x128xbf16> to vector<16x128xbf16>
    %55 = arith.extf %54 : vector<16x128xbf16> to vector<16x128xf32>
    %c0_68 = arith.constant 0 : index
    %c1_69 = arith.constant 1 : index
    %c0_70 = arith.constant 0 : index
    %c0_71 = arith.constant 0 : index
    %56 = vector.load %arg1[%c0_68, %c1_69, %c0_70, %c0_71] : memref<8x8x16x128xbf16, #tpu.memory_space<vmem>>, vector<8x7x16x128xbf16>
    %57 = arith.extf %56 : vector<8x7x16x128xbf16> to vector<8x7x16x128xf32>
    %c0_72 = arith.constant 0 : index
    %c0_73 = arith.constant 0 : index
    %c0_74 = arith.constant 0 : index
    %c0_75 = arith.constant 0 : index
    %58 = vector.load %arg11[%c0_72, %c0_73, %c0_74, %c0_75] : memref<8x8x16x128xf32, #tpu.memory_space<vmem>>, vector<8x7x16x128xf32>
    %59 = vector.shape_cast %55 : vector<16x128xf32> to vector<1x1x16x128xf32>
    %60 = vector.broadcast %59 : vector<1x1x16x128xf32> to vector<8x7x16x128xf32>
    %61 = arith.mulf %57, %60 : vector<8x7x16x128xf32>
    %62 = arith.addf %58, %61 : vector<8x7x16x128xf32>
    %c0_76 = arith.constant 0 : index
    %c0_77 = arith.constant 0 : index
    %c0_78 = arith.constant 0 : index
    %c0_79 = arith.constant 0 : index
    %63 = vector.load %arg11[%c0_76, %c0_77, %c0_78, %c0_79] : memref<8x8x16x128xf32, #tpu.memory_space<vmem>>, vector<8x7x16x128xf32>
    tpu.vector_store %arg11[%c0_76, %c0_77, %c0_78, %c0_79], %62 {strides = array<i32>} : memref<8x8x16x128xf32, #tpu.memory_space<vmem>>, vector<8x7x16x128xf32>,
    %c6 = arith.constant 6 : index
    %c0_80 = arith.constant 0 : index
    %c0_81 = arith.constant 0 : index
    %64 = vector.load %arg2[%c6, %c0_80, %c0_81] : memref<9x16x128xbf16, #tpu.memory_space<vmem>>, vector<1x16x128xbf16>
    %65 = vector.shape_cast %64 : vector<1x16x128xbf16> to vector<16x128xbf16>
    %66 = arith.extf %65 : vector<16x128xbf16> to vector<16x128xf32>
    %c1_82 = arith.constant 1 : index
    %c0_83 = arith.constant 0 : index
    %c0_84 = arith.constant 0 : index
    %c0_85 = arith.constant 0 : index
    %67 = vector.load %arg1[%c1_82, %c0_83, %c0_84, %c0_85] : memref<8x8x16x128xbf16, #tpu.memory_space<vmem>>, vector<7x7x16x128xbf16>
    %68 = arith.extf %67 : vector<7x7x16x128xbf16> to vector<7x7x16x128xf32>
    %c0_86 = arith.constant 0 : index
    %c1_87 = arith.constant 1 : index
    %c0_88 = arith.constant 0 : index
    %c0_89 = arith.constant 0 : index
    %69 = vector.load %arg11[%c0_86, %c1_87, %c0_88, %c0_89] : memref<8x8x16x128xf32, #tpu.memory_space<vmem>>, vector<7x7x16x128xf32>
    %70 = vector.shape_cast %66 : vector<16x128xf32> to vector<1x1x16x128xf32>
    %71 = vector.broadcast %70 : vector<1x1x16x128xf32> to vector<7x7x16x128xf32>
    %72 = arith.mulf %68, %71 : vector<7x7x16x128xf32>
    %73 = arith.addf %69, %72 : vector<7x7x16x128xf32>
    %c0_90 = arith.constant 0 : index
    %c1_91 = arith.constant 1 : index
    %c0_92 = arith.constant 0 : index
    %c0_93 = arith.constant 0 : index
    %74 = vector.load %arg11[%c0_90, %c1_91, %c0_92, %c0_93] : memref<8x8x16x128xf32, #tpu.memory_space<vmem>>, vector<7x7x16x128xf32>
    tpu.vector_store %arg11[%c0_90, %c1_91, %c0_92, %c0_93], %73 {strides = array<i32>} : memref<8x8x16x128xf32, #tpu.memory_space<vmem>>, vector<7x7x16x128xf32>,
    %c7 = arith.constant 7 : index
    %c0_94 = arith.constant 0 : index
    %c0_95 = arith.constant 0 : index
    %75 = vector.load %arg2[%c7, %c0_94, %c0_95] : memref<9x16x128xbf16, #tpu.memory_space<vmem>>, vector<1x16x128xbf16>
    %76 = vector.shape_cast %75 : vector<1x16x128xbf16> to vector<16x128xbf16>
    %77 = arith.extf %76 : vector<16x128xbf16> to vector<16x128xf32>
    %c1_96 = arith.constant 1 : index
    %c0_97 = arith.constant 0 : index
    %c0_98 = arith.constant 0 : index
    %c0_99 = arith.constant 0 : index
    %78 = vector.load %arg1[%c1_96, %c0_97, %c0_98, %c0_99] : memref<8x8x16x128xbf16, #tpu.memory_space<vmem>>, vector<7x8x16x128xbf16>
    %79 = arith.extf %78 : vector<7x8x16x128xbf16> to vector<7x8x16x128xf32>
    %c0_100 = arith.constant 0 : index
    %c0_101 = arith.constant 0 : index
    %c0_102 = arith.constant 0 : index
    %c0_103 = arith.constant 0 : index
    %80 = vector.load %arg11[%c0_100, %c0_101, %c0_102, %c0_103] : memref<8x8x16x128xf32, #tpu.memory_space<vmem>>, vector<7x8x16x128xf32>
    %81 = vector.shape_cast %77 : vector<16x128xf32> to vector<1x1x16x128xf32>
    %82 = vector.broadcast %81 : vector<1x1x16x128xf32> to vector<7x8x16x128xf32>
    %83 = arith.mulf %79, %82 : vector<7x8x16x128xf32>
    %84 = arith.addf %80, %83 : vector<7x8x16x128xf32>
    %c0_104 = arith.constant 0 : index
    %c0_105 = arith.constant 0 : index
    %c0_106 = arith.constant 0 : index
    %c0_107 = arith.constant 0 : index
    %85 = vector.load %arg11[%c0_104, %c0_105, %c0_106, %c0_107] : memref<8x8x16x128xf32, #tpu.memory_space<vmem>>, vector<7x8x16x128xf32>
    tpu.vector_store %arg11[%c0_104, %c0_105, %c0_106, %c0_107], %84 {strides = array<i32>} : memref<8x8x16x128xf32, #tpu.memory_space<vmem>>, vector<7x8x16x128xf32>,
    %c8 = arith.constant 8 : index
    %c0_108 = arith.constant 0 : index
    %c0_109 = arith.constant 0 : index
    %86 = vector.load %arg2[%c8, %c0_108, %c0_109] : memref<9x16x128xbf16, #tpu.memory_space<vmem>>, vector<1x16x128xbf16>
    %87 = vector.shape_cast %86 : vector<1x16x128xbf16> to vector<16x128xbf16>
    %88 = arith.extf %87 : vector<16x128xbf16> to vector<16x128xf32>
    %c1_110 = arith.constant 1 : index
    %c1_111 = arith.constant 1 : index
    %c0_112 = arith.constant 0 : index
    %c0_113 = arith.constant 0 : index
    %89 = vector.load %arg1[%c1_110, %c1_111, %c0_112, %c0_113] : memref<8x8x16x128xbf16, #tpu.memory_space<vmem>>, vector<7x7x16x128xbf16>
    %90 = arith.extf %89 : vector<7x7x16x128xbf16> to vector<7x7x16x128xf32>
    %c0_114 = arith.constant 0 : index
    %c0_115 = arith.constant 0 : index
    %c0_116 = arith.constant 0 : index
    %c0_117 = arith.constant 0 : index
    %91 = vector.load %arg11[%c0_114, %c0_115, %c0_116, %c0_117] : memref<8x8x16x128xf32, #tpu.memory_space<vmem>>, vector<7x7x16x128xf32>
    %92 = vector.shape_cast %88 : vector<16x128xf32> to vector<1x1x16x128xf32>
    %93 = vector.broadcast %92 : vector<1x1x16x128xf32> to vector<7x7x16x128xf32>
    %94 = arith.mulf %90, %93 : vector<7x7x16x128xf32>
    %95 = arith.addf %91, %94 : vector<7x7x16x128xf32>
    %c0_118 = arith.constant 0 : index
    %c0_119 = arith.constant 0 : index
    %c0_120 = arith.constant 0 : index
    %c0_121 = arith.constant 0 : index
    %96 = vector.load %arg11[%c0_118, %c0_119, %c0_120, %c0_121] : memref<8x8x16x128xf32, #tpu.memory_space<vmem>>, vector<7x7x16x128xf32>
    tpu.vector_store %arg11[%c0_118, %c0_119, %c0_120, %c0_121], %95 {strides = array<i32>} : memref<8x8x16x128xf32, #tpu.memory_space<vmem>>, vector<7x7x16x128xf32>,
    %c0_122 = arith.constant 0 : index
    %c0_123 = arith.constant 0 : index
    %c0_124 = arith.constant 0 : index
    %c0_125 = arith.constant 0 : index
    %97 = vector.load %arg11[%c0_122, %c0_123, %c0_124, %c0_125] : memref<8x8x16x128xf32, #tpu.memory_space<vmem>>, vector<8x8x16x128xf32>
    %cst = arith.constant 0.000000e+00 : f32
    %98 = vector.broadcast %cst : f32 to vector<8x8x16x128xf32>
    %99 = arith.cmpf ogt, %97, %98 : vector<8x8x16x128xf32>
    %cst_126 = arith.constant 1.000000e-01 : f32
    %100 = vector.broadcast %cst_126 : f32 to vector<8x8x16x128xf32>
    %101 = arith.mulf %100, %97 : vector<8x8x16x128xf32>
    %102 = arith.select %99, %97, %101 : vector<8x8x16x128xi1>, vector<8x8x16x128xf32>
    %103 = vector.shape_cast %102 : vector<8x8x16x128xf32> to vector<1024x128xf32>
    %104 = arith.truncf %103 : vector<1024x128xf32> to vector<1024x128xbf16>
    %c0_127 = arith.constant 0 : index
    %c0_128 = arith.constant 0 : index
    %105 = vector.load %arg4[%c0_127, %c0_128] : memref<128x128xbf16, #tpu.memory_space<vmem>>, vector<128x128xbf16>
    %cst_129 = arith.constant dense<0.000000e+00> : vector<1024x128xf32>
    %106 = tpu.matmul %104, %105, %cst_129 {dimension_numbers = #tpu.dot_dimension_numbers<[1], [0], [0], [1], [0, 0, 1, 1], [], []>} : vector<1024x128xbf16>, vector<128x128xbf16>, vector<1024x128xf32> -> vector<1024x128xf32>
    %107 = vector.shape_cast %106 : vector<1024x128xf32> to vector<8x8x16x128xf32>
    %cst_130 = arith.constant dense<0.000000e+00> : vector<16x128xf32>
    %108 = vector.multi_reduction <add>, %107, %cst_130 [0, 1] : vector<8x8x16x128xf32> to vector<16x128xf32>
    %cst_131 = arith.constant 6.400000e+01 : f32
    %109 = vector.broadcast %cst_131 : f32 to vector<16x128xf32>
    %110 = arith.divf %108, %109 : vector<16x128xf32>
    %111 = arith.truncf %110 : vector<16x128xf32> to vector<16x128xbf16>
    %c0_132 = arith.constant 0 : index
    %c0_133 = arith.constant 0 : index
    %112 = vector.load %arg5[%c0_132, %c0_133] : memref<128x32xbf16, #tpu.memory_space<vmem>>, vector<128x32xbf16>
    %cst_134 = arith.constant dense<0.000000e+00> : vector<16x32xf32>
    %113 = tpu.matmul %111, %112, %cst_134 {dimension_numbers = #tpu.dot_dimension_numbers<[1], [0], [0], [1], [0, 0, 1, 1], [], []>} : vector<16x128xbf16>, vector<128x32xbf16>, vector<16x32xf32> -> vector<16x32xf32>
    %c0_135 = arith.constant 0 : index
    %c0_136 = arith.constant 0 : index
    %114 = vector.load %arg3[%c0_135, %c0_136] : memref<16x32xbf16, #tpu.memory_space<vmem>>, vector<16x32xbf16>
    %c0_137 = arith.constant 0 : index
    %c0_138 = arith.constant 0 : index
    %115 = vector.load %arg6[%c0_137, %c0_138] : memref<32x32xbf16, #tpu.memory_space<vmem>>, vector<32x32xbf16>
    %cst_139 = arith.constant dense<0.000000e+00> : vector<16x32xf32>
    %116 = tpu.matmul %114, %115, %cst_139 {dimension_numbers = #tpu.dot_dimension_numbers<[1], [0], [0], [1], [0, 0, 1, 1], [], []>} : vector<16x32xbf16>, vector<32x32xbf16>, vector<16x32xf32> -> vector<16x32xf32>
    %117 = arith.addf %113, %116 : vector<16x32xf32>
    %c0_140 = arith.constant 0 : index
    %c0_141 = arith.constant 0 : index
    %118 = vector.load %arg7[%c0_140, %c0_141] : memref<1x32xf32, #tpu.memory_space<vmem>>, vector<1x32xf32>
    %119 = vector.broadcast %118 : vector<1x32xf32> to vector<16x32xf32>
    %120 = arith.addf %117, %119 : vector<16x32xf32>
    %cst_142 = arith.constant 0.000000e+00 : f32
    %121 = vector.broadcast %cst_142 : f32 to vector<16x32xf32>
    %122 = arith.cmpf ogt, %120, %121 : vector<16x32xf32>
    %cst_143 = arith.constant 1.000000e-01 : f32
    %123 = vector.broadcast %cst_143 : f32 to vector<16x32xf32>
    %124 = arith.mulf %123, %120 : vector<16x32xf32>
    %125 = arith.select %122, %120, %124 : vector<16x32xi1>, vector<16x32xf32>
    %126 = arith.truncf %125 : vector<16x32xf32> to vector<16x32xbf16>
    %c0_144 = arith.constant 0 : index
    %c0_145 = arith.constant 0 : index
    %127 = vector.load %arg8[%c0_144, %c0_145] : memref<32x128xbf16, #tpu.memory_space<vmem>>, vector<32x128xbf16>
    %cst_146 = arith.constant dense<0.000000e+00> : vector<16x128xf32>
    %128 = tpu.matmul %126, %127, %cst_146 {dimension_numbers = #tpu.dot_dimension_numbers<[1], [0], [0], [1], [0, 0, 1, 1], [], []>} : vector<16x32xbf16>, vector<32x128xbf16>, vector<16x128xf32> -> vector<16x128xf32>
    %c0_147 = arith.constant 0 : index
    %c0_148 = arith.constant 0 : index
    %129 = vector.load %arg9[%c0_147, %c0_148] : memref<1x128xf32, #tpu.memory_space<vmem>>, vector<1x128xf32>
    %130 = vector.broadcast %129 : vector<1x128xf32> to vector<16x128xf32>
    %131 = arith.addf %128, %130 : vector<16x128xf32>
    %132 = arith.negf %131 : vector<16x128xf32>
    %133 = math.exp %132 : vector<16x128xf32>
    %cst_149 = arith.constant 1.000000e+00 : f32
    %134 = vector.broadcast %cst_149 : f32 to vector<16x128xf32>
    %135 = arith.addf %134, %133 : vector<16x128xf32>
    %136 = arith.divf %134, %135 : vector<16x128xf32>
    %c0_150 = arith.constant 0 : index
    %c0_151 = arith.constant 0 : index
    %c0_152 = arith.constant 0 : index
    %c0_153 = arith.constant 0 : index
    %137 = vector.load %arg1[%c0_150, %c0_151, %c0_152, %c0_153] : memref<8x8x16x128xbf16, #tpu.memory_space<vmem>>, vector<8x8x16x128xbf16>
    %138 = arith.extf %137 : vector<8x8x16x128xbf16> to vector<8x8x16x128xf32>
    %cst_154 = arith.constant 1.000000e+00 : f32
    %139 = vector.broadcast %cst_154 : f32 to vector<16x128xf32>
    %140 = arith.addf %139, %136 : vector<16x128xf32>
    %141 = vector.shape_cast %140 : vector<16x128xf32> to vector<1x1x16x128xf32>
    %142 = vector.broadcast %141 : vector<1x1x16x128xf32> to vector<8x8x16x128xf32>
    %143 = arith.mulf %107, %142 : vector<8x8x16x128xf32>
    %144 = arith.addf %143, %138 : vector<8x8x16x128xf32>
    %c0_155 = arith.constant 0 : index
    %c0_156 = arith.constant 0 : index
    %c0_157 = arith.constant 0 : index
    %c0_158 = arith.constant 0 : index
    %145 = vector.load %arg10[%c0_155, %c0_156, %c0_157, %c0_158] : memref<8x8x16x128xf32, #tpu.memory_space<vmem>>, vector<8x8x16x128xf32>
    tpu.vector_store %arg10[%c0_155, %c0_156, %c0_157, %c0_158], %144 {strides = array<i32>} : memref<8x8x16x128xf32, #tpu.memory_space<vmem>>, vector<8x8x16x128xf32>,
    return
  }
  func.func @transform_0(%arg0: i32) -> (i32, i32, i32, i32) {
    %c0_i32 = arith.constant 0 : i32
    %c0_i32_0 = arith.constant 0 : i32
    %c0_i32_1 = arith.constant 0 : i32
    %c0_i32_2 = arith.constant 0 : i32
    return %c0_i32, %c0_i32_0, %arg0, %c0_i32_1 : i32, i32, i32, i32
  }
  func.func @transform_1(%arg0: i32) -> (i32, i32, i32) {
    %c0_i32 = arith.constant 0 : i32
    %c0_i32_0 = arith.constant 0 : i32
    %c0_i32_1 = arith.constant 0 : i32
    return %c0_i32, %arg0, %c0_i32_0 : i32, i32, i32
  }
  func.func @transform_2(%arg0: i32) -> (i32, i32) {
    %c0_i32 = arith.constant 0 : i32
    %c0_i32_0 = arith.constant 0 : i32
    return %arg0, %c0_i32 : i32, i32
  }
  func.func @transform_3(%arg0: i32) -> (i32, i32) {
    %c0_i32 = arith.constant 0 : i32
    %c0_i32_0 = arith.constant 0 : i32
    %c0_i32_1 = arith.constant 0 : i32
    return %c0_i32, %c0_i32_0 : i32, i32
  }
  func.func @transform_4(%arg0: i32) -> (i32, i32) {
    %c0_i32 = arith.constant 0 : i32
    %c0_i32_0 = arith.constant 0 : i32
    %c0_i32_1 = arith.constant 0 : i32
    return %c0_i32, %c0_i32_0 : i32, i32
  }
  func.func @transform_5(%arg0: i32) -> (i32, i32) {
    %c0_i32 = arith.constant 0 : i32
    %c0_i32_0 = arith.constant 0 : i32
    %c0_i32_1 = arith.constant 0 : i32
    return %c0_i32, %c0_i32_0 : i32, i32
  }
  func.func @transform_6(%arg0: i32) -> (i32, i32) {
    %c0_i32 = arith.constant 0 : i32
    %c0_i32_0 = arith.constant 0 : i32
    %c0_i32_1 = arith.constant 0 : i32
    return %c0_i32, %c0_i32_0 : i32, i32
  }
  func.func @transform_7(%arg0: i32) -> (i32, i32) {
    %c0_i32 = arith.constant 0 : i32
    %c0_i32_0 = arith.constant 0 : i32
    %c0_i32_1 = arith.constant 0 : i32
    return %c0_i32, %c0_i32_0 : i32, i32
  }
  func.func @transform_8(%arg0: i32) -> (i32, i32) {
    %c0_i32 = arith.constant 0 : i32
    %c0_i32_0 = arith.constant 0 : i32
    %c0_i32_1 = arith.constant 0 : i32
    return %c0_i32, %c0_i32_0 : i32, i32
  }
  func.func @transform_9(%arg0: i32) -> (i32, i32, i32, i32) {
    %c0_i32 = arith.constant 0 : i32
    %c0_i32_0 = arith.constant 0 : i32
    %c0_i32_1 = arith.constant 0 : i32
    %c0_i32_2 = arith.constant 0 : i32
    return %c0_i32, %c0_i32_0, %arg0, %c0_i32_1 : i32, i32, i32, i32
  }
}

</mosaic_0001>

<bundles_post_ra>
// kernel: tpu_custom_call.1
= control target key start
LH: loop header
LB: loop body
LE: loop exit
PB: predicated region body
PF: predicated region fallthrough
CT: control target
= control target key end

     0   :  { %s17332_s0 = inlined_call_operand.hbm [shape: bf16[8,8,32,128], index: 0, kind: input, shape index: {}]   ;;  %s17333_s1 = inlined_call_operand.hbm [shape: bf16[9,32,128], index: 1, kind: input, shape index: {}]   ;;  %s17334_s2 = inlined_call_operand.vmem [shape: bf16[32,32], index: 2, kind: input, shape index: {}]   ;;  %s17335_s3 = inlined_call_operand.vmem [shape: bf16[128,128], index: 3, kind: input, shape index: {}]   ;;  %s17336_s4 = inlined_call_operand.vmem [shape: bf16[128,32], index: 4, kind: input, shape index: {}]   ;;  %s17337_s5 = inlined_call_operand.vmem [shape: bf16[32,32], index: 5, kind: input, shape index: {}]   ;;  %s17338_s6 = inlined_call_operand.vmem [shape: f32[1,32], index: 6, kind: input, shape index: {}]   ;;  %s17339_s7 = inlined_call_operand.hbm [shape: bf16[32,128], index: 7, kind: input, shape index: {}]   ;;  %s17340_s8 = inlined_call_operand.vmem [shape: f32[1,128], index: 8, kind: input, shape index: {}]   ;;  %s17341_s9 = inlined_call_operand.hbm [shape: f32[8,8,32,128], index: 9, kind: output, shape index: {}]  }
   0x1   :  { %17564 = sst [smem:[#allocation192_spill]] %s17332_s0 }
   0x2   :  { %17565 = sst [smem:[#allocation193_spill]] %s17339_s7 }
   0x3   :  { %14 = vsyncpa [#allocation4], 0 }
   0x4   :  { %16 = vsyncpa [#allocation4 + $0x1], 0 }
   0x5   :  { %17 = vsyncpa [#allocation7], 0 }
   0x6   :  { %19 = vsyncpa [#allocation7 + $0x1], 0 }
   0x7   :  { %20 = vsyncpa [#allocation5], 0 }
   0x8   :  { %22 = vsyncpa [#allocation5 + $0x1], 0  ;;  %s13905_s30 = smov 0   ;;  %s13907_s10 = smov 0  }
   0x9   :  { %s13909_s11 = smov 0   ;;  %s13911_s12 = smov 0  }
   0xa LB: > { %17566 = sst [smem:[#allocation22_spill]] %s13824_s11  ;;  %s13926_s13 = sadd.s32 4294967295, %s13828_s12   ;;  %s13828_s12 = sphi %s13911_s12, %s18285_s12   ;;  %s13824_s11 = sphi %s13909_s11, %s18287_s11   ;;  %s13820_s10 = sphi %s13907_s10, %s18289_s10   ;;  %s13816_s30 = sphi %s13905_s30, %s18288_s30  }
   0xb   : > { %s8468_s14 = sadd.s32 4294967294, %s13828_s12   ;;  %s13930_s15 = sadd.s32 1, %s13828_s12  }
   0xc   : > { %17567 = sst [smem:[#allocation23_spill]] %s13930_s15  ;;  %s35_s16 = sadd.s32 1, %s13824_s11 }
   0xd   : > { %s32_s17 = ssub.s32 %s13828_s12, %s13930_s15  ;;  %p42_p0 = scmp.ne.s32.totalorder %s13824_s11, %s13820_s10 }
   0xe   : > { %p33_p1 = scmp.eq.s32.totalorder %s32_s17, 0  ;;  %p43_p2 = scmp.eq.s32.totalorder %s13828_s12, 0 }
   0xf   : > { %p48_p3 = scmp.ne.s32.totalorder %s13820_s10, %s13816_s30  ;;  %p17342_p4 = scmp.eq.s32.totalorder %s13926_s13, 0 }
  0x10   : > { %s13942_s18 = scalar_select %p33_p1, %s13824_s11, %s35_s16  }
  0x11   : > { %p13944_p5 = por %p43_p2, %p42_p0  ;;  %p13950_p6 = por %p17342_p4, %p48_p3 }
  0x12   : > { %17568 = sst [smem:[#allocation24_spill]] %s13942_s18  ;;  %p250_p7 = scmp.eq.s32.totalorder %s13926_s13, 1 }
  0x13   : > { %s17569_s19 = scalar_select %p13944_p5, 1, 0 }
  0x14   : > { %s17570_s20 = scalar_select %p13950_p6, 1, 0 }
  0x15   : > { %p256_p8 = scmp.eq.s32.totalorder %s8468_s14, 1  ;;  %p8469_p9 = scmp.ge.s32.totalorder %s13828_s12, 1 }
  0x16   : > { %p263_p10 = scmp.lt.s32.totalorder %s13828_s12, 3  ;;  %p13957_p11 = por %p250_p7, %p42_p0 }
  0x17   : > { %p13961_p12 = por %p256_p8, %p48_p3  ;;  %s13830_s24 = smov [#allocation8]  }
  0x18   : > { %s17571_s21 = scalar_select %p13957_p11, 1, 0 }
  0x19   : > { %s17572_s22 = scalar_select %p13961_p12, 1, 0 }
  0x1a   : > { %p13965_p13 = pnand %p8469_p9, %p263_p10  ;;  %s287_s25 = sshll.u32 %s13830_s24, 4  ;;  %s288_s25 = int_to_ptr.vmem [resolvable:$true] %s287_s25 }
  0x1b   : > { %s17575_s7 = sld [smem:[#allocation193_spill]] }
  0x1c   : > { %s17573_s23 = scalar_select %p13965_p13, 1, 0 }
  0x1d   : > { %p12150_p1 = pneg %p13965_p13 }
  0x1f   : > { %p13973_p2 = pnand %p12150_p1, %p17342_p4 }
  0x21   : > { %s12246_s29 = scalar_lea.hbm %s17575_s7, 256  ;;  %p12248_p3 = pneg %p13973_p2 }
  0x22   : > { %p12247_p0 = scmp.ne.s32.totalorder %s17575_s7, %s12246_s29  ;;  %p12253_p9 = scmp.lt.u32.totalorder %s12246_s29, %s17575_s7 }
  0x24   : > { %p12249_p7 = pnand %p12248_p3, %p12247_p0 }
  0x26   : > { %p12250_p8 = pneg %p12249_p7 }
  0x28   : > { %p12255_p10 = pnand %p12253_p9, %p12250_p8 }
  0x2a   : > { %12258 = shalt.err (!%p12255_p10)
}
  0x2b   : > { %s12259_s18 = scalar_lea.vmem %s288_s25, 256  ;;  %p12267_p11 = scmp.lt.s32.totalorder %s288_s25, %s288_s25 }
  0x2c   : > { %p12260_p1 = scmp.ne.s32.totalorder %s288_s25, %s12259_s18  ;;  %p12268_p6 = scmp.lt.s32.totalorder %s12259_s18, %s12259_s18 }
  0x2e   : > { %p12262_p4 = pnand %p12260_p1, %p12248_p3  ;;  %p12269_p13 = por %p12268_p6, %p12267_p11 }
  0x30   : > { %p12263_p12 = pneg %p12262_p4 }
  0x32   : > { %p12270_p5 = pnand %p12269_p13, %p12263_p12 }
  0x34   : > { %12273 = shalt.err (!%p12270_p5)
}
  0x35   : > { %s13831_s27 = smov 64   ;;  %s13832_s28 = smov 4  }
  0x36   : > { %12153 = dma.hbm_to_vmem [thread:$0]  (!%p13973_p2), %s17575_s7, 256, %s288_s25, [#allocation7], %s13831_s27, %s13831_s27, %s13832_s28  }
  0x37   : > { %p8471_p0 = scmp.ge.s32.totalorder %s13828_s12, 2 }
  0x39   : > { %300 = sbr.rel (%p8471_p0) target bundleno = 92 (0x5c), region = 40 }
  0x40   : > { %s13997_s18 = sand.u32 1, %s13824_s11   ;;  %s9053_s26 = sshll.u32 %s13828_s12, 7 }
  0x41   : > { %s8472_s29 = sshll.u32 %s13997_s18, 9  ;;  %s17576_s0 = sld [smem:[#allocation192_spill]] }
  0x42   : > { %p17577_p4 = scmp.ne.s32.totalorder %s17569_s19, 0  ;;  %s308_s28 = scalar_lea.vmem [#allocation3], %s8472_s29 }
  0x43   : > { %s327_s14 = sshll.u32 %s308_s28, 4  ;;  %s13833_s7 = smov 256   ;;  %s328_s14 = int_to_ptr.vmem [resolvable:$true] %s327_s14 }
  0x44   : > { %s12122_s27 = scalar_select %p17577_p4, [#allocation0], [#allocation16] }
  0x45   : > { %12123 = sst [smem:[#allocation11]] (%p17577_p4), %s13833_s7  ;;  %s13834_s11 = smov 128  }
  0x46   : > { %s319_s16 = sld [smem:[%s12122_s27]]   ;;  %s13835_s15 = smov 2  }
  0x47   : > { %s314_s24 = scalar_lea.hbm %s17576_s0, %s9053_s26  ;;  %12124 = sst [smem:[#allocation11 + $0x1]] (%p17577_p4), %s13834_s11 }
  0x48   : > { %12125 = sst [smem:[#allocation11 + $0x2]] (%p17577_p4), %s13835_s15  ;;  %s13836_s17 = smov 64  }
  0x49   : > { %12126 = sst [smem:[#allocation11 + $0x3]] (%p17577_p4), %s13836_s17  ;;  %s13837_s25 = smov 4  }
  0x4a   : > { %12127 = sst [smem:[#allocation11 + $0x4]] (%p17577_p4), %s13836_s17  ;;  %s305_s28 = scalar_lea.sflag [#allocation4], %s13997_s18 }
  0x4b   : > { %12128 = sst [smem:[#allocation11 + $0x5]] (%p17577_p4), %s13837_s25  ;;  %s13838_s0 = smov [#allocation10]  }
  0x4c   : > { %s8475_s29 = sshll.u32 %s319_s16, 26 }
  0x4d   : > { %s8476_s27 = sadd.s32 134217728, %s8475_s29 }
  0x4e   : > { %12129 = dma.general (%p17577_p4), %s314_s24, 8192, %s328_s14, %s305_s28, %s13838_s0, [#allocation11], %s8476_s27, 0  }
  0x4f   : > { %s350_s7 = sand.u32 1, %s13828_s12   ;;  %s12118_s11 = smul.u32 72, %s13997_s18 }
  0x50   : > { %s12130_s15 = scalar_select %p17577_p4, [#allocation0], [#allocation17] }
  0x51   : > { %s360_s29 = scalar_lea.hbm %s17333_s1, %s9053_s26  ;;  %s13839_s25 = smov 256  }
  0x52   : > { %12131 = sst [smem:[#allocation13]] (%p17577_p4), %s13839_s25  ;;  %s354_s24 = scalar_lea.vmem [#allocation6], %s12118_s11 }
  0x53   : > { %s365_s0 = sld [smem:[%s12130_s15]]   ;;  %s373_s14 = sshll.u32 %s354_s24, 4  ;;  %s374_s14 = int_to_ptr.vmem [resolvable:$true] %s373_s14 }
  0x54   : > { %s13840_s27 = smov 128   ;;  %s13841_s28 = smov 2  }
  0x55   : > { %12132 = sst [smem:[#allocation13 + $0x1]] (%p17577_p4), %s13840_s27  ;;  %s13842_s18 = smov 64  }
  0x56   : > { %12133 = sst [smem:[#allocation13 + $0x2]] (%p17577_p4), %s13841_s28  ;;  %s13843_s16 = smov 4  }
  0x57   : > { %12134 = sst [smem:[#allocation13 + $0x3]] (%p17577_p4), %s13842_s18  ;;  %s351_s11 = scalar_lea.sflag [#allocation7], %s350_s7 }
  0x58   : > { %12135 = sst [smem:[#allocation13 + $0x4]] (%p17577_p4), %s13842_s18  ;;  %s13844_s17 = smov [#allocation12]  }
  0x59   : > { %s8479_s26 = sshll.u32 %s365_s0, 26  ;;  %12136 = sst [smem:[#allocation13 + $0x5]] (%p17577_p4), %s13843_s16 }
  0x5a   : > { %s8480_s15 = sadd.s32 134217728, %s8479_s26 }
  0x5b   : > { %12137 = dma.general (%p17577_p4), %s360_s29, 1152, %s374_s14, %s351_s11, %s13844_s17, [#allocation13], %s8480_s15, 0  }
  0x5c PF: > { %p17578_p5 = scmp.ne.s32.totalorder %s17573_s23, 0 }
  0x5e   : > { %407 = sbr.rel (%p17578_p5) target bundleno = 1416 (0x588), region = 56 }
  0x65   : > { %s14045_s25 = sand.u32 1, %s13820_s10   ;;  %p17579_p6 = scmp.ne.s32.totalorder %s17570_s20, 0 }
  0x66   : > { %s8482_s24 = sshll.u32 %s14045_s25, 9  ;;  %s410_s0 = scalar_lea.sflag [#allocation4], %s14045_s25 }
  0x67   : > { %s14049_s27 = scalar_lea.vmem [#allocation3], %s8482_s24 }
  0x68   : > { %12291 = dma.done.wait (%p17579_p6), %s410_s0, 8192  }
  0x69   : > { %12293 = vsyncadd (%p17579_p6), %s410_s0, 4294959104  ;;  %s418_s19 = sand.u32 1, %s13926_s13   ;;  %s12119_s23 = smul.u32 72, %s14045_s25 }
  0x6a   : > { %s419_s7 = scalar_lea.sflag [#allocation7], %s418_s19 }
  0x6b   : > { %s14057_s29 = scalar_lea.vmem [#allocation6], %s12119_s23 }
  0x6c   : > { %12295 = dma.done.wait (%p17579_p6), %s419_s7, 1152  }
  0x6d   : > { %12297 = vsyncadd (%p17579_p6), %s419_s7, 4294966144  ;;  %p17580_p11 = scmp.eq.s32.totalorder %s13926_s13, 0 }
  0x6f   : > { %12299 = dma.done.wait (%p17580_p11), [#allocation7], 256   ;;  %p17581_p12 = pmov %p17580_p11 }
  0x70   : > { %v12217_v0 = vld [vmem:[%s17335_s3] sm:$0xff]   ;;  %v12218_v1 = vld [vmem:[%s17335_s3 + $0x8] sm:$0xff]   ;;  %v12219_v2 = vld [vmem:[%s17335_s3 + $0x10] sm:$0xff]   ;;  %v13845_v21 = vmov 1935823168   ;;  %v12316_v24 = vlaneseq  ;;  %s8485_s16 = sshll.u32 %s13926_s13, 1 }
  0x71   : > { %12301 = vsyncadd (%p17581_p12), [#allocation7], 4294967040  ;;  %11922 = vmatprep.subr.bf16.mxu0 %v12217_v0  ;;  %12102 = vmatprep.subr.bf16.mxu1 %v12217_v0  ;;  %v12220_v3 = vld [vmem:[%s17335_s3 + $0x18] sm:$0xff]   ;;  %v14080_v4 = vld [vmem:[%s14057_s29 + $0x20] sm:$0xff]   ;;  %v12314_v22 = vunpack.c.l.s4 %v13845_v21  ;;  %p474_p13 = scmp.lt.s32.totalorder %s8485_s16, 3 }
  0x72   : > { %11923 = vmatpush3.bf16.msra.mxu0 %v12217_v0  ;;  %12110 = vmatpush3.bf16.msra.mxu1 %v12217_v0  ;;  %v14083_v5 = vld [vmem:[%s14049_s27] sm:$0xff]   ;;  %v14086_v6 = vld [vmem:[%s14057_s29 + $0x28] sm:$0xff]   ;;  %v14117_v15 = vld [vmem:[%s14057_s29 + $0x30] sm:$0xff]   ;;  %v12317_v25 = vshrl.u32 %v12316_v24, 7 }
  0x73   : > { %11924 = vmatprep.subr.bf16.mxu0 %v12218_v1  ;;  %12103 = vmatprep.subr.bf16.mxu1 %v12218_v1  ;;  %v14089_v7 = vld [vmem:[%s14049_s27 + $0x8] sm:$0xff]   ;;  %v14092_v8 = vld [vmem:[%s14057_s29 + $0x38] sm:$0xff]   ;;  %12306 = vmul.bf16.f32.vacc0 %v14083_v5, %v14080_v4  ;;  %v14114_v14 = vld [vmem:[%s14049_s27 + $0x10] sm:$0xff]   ;;  %v12315_v23 = vunpack.c.0.s8 %v12314_v22  ;;  %s18291_s16 = smov (!%p474_p13, %s8485_s16), 3 }
  0x74   : > { %v14095_v9 = vld [vmem:[%s14049_s27 + $0x40] sm:$0xff]   ;;  %v14101_v11 = vld [vmem:[%s14049_s27 + $0x48] sm:$0xff]   ;;  %12307 = vmac.bf16.f32.vacc0 %v14089_v7, %v14086_v6  ;;  %v12223_v29 = vld [vmem:[%s17335_s3 + $0x30] sm:$0xff]   ;;  %12326 = vmul.bf16.f32.vacc1 %v14089_v7, %v14080_v4  ;;  %12348 = vmul.bf16.f32.vacc2 %v14114_v14, %v14080_v4  ;;  %s8486_s15 = sshll.u32 %s18291_s16, 2 }
  0x75   : > { %v14098_v10 = vld [vmem:[%s14057_s29 + $0x40] sm:$0xff]   ;;  %v14107_v13 = vld [vmem:[%s14057_s29 + $0x18] sm:$0xff]   ;;  %12308 = vmac.bf16.f32.vacc0 %v14095_v9, %v14092_v8  ;;  %v14126_v26 = vsub.s32 %v12315_v23, %v12317_v25  ;;  %v14134_v30 = vld [vmem:[%s14049_s27 + $0x50] sm:$0xff]   ;;  %s477_s24 = scalar_lea.vmem %s17334_s2, %s8486_s15 }
  0x76   : > { %11925 = vmatpush3.bf16.msra.mxu0 %v12218_v1  ;;  %12111 = vmatpush3.bf16.msra.mxu1 %v12218_v1  ;;  %v12221_v12 = vld [vmem:[%s17335_s3 + $0x20] sm:$0xff]   ;;  %v12222_v16 = vld [vmem:[%s17335_s3 + $0x28] sm:$0xff]   ;;  %12309 = vmac.bf16.f32.vacc0 %v14101_v11, %v14098_v10  ;;  %12327 = vmac.bf16.f32.vacc1 %v14107_v13, %v14083_v5  ;;  %v14141_v35 = vld [vmem:[%s14049_s27 + $0x18] sm:$0xff]   ;;  %12349 = vmac.bf16.f32.vacc2 %v14089_v7, %v14107_v13 }
  0x77   : > { %11926 = vmatprep.subr.bf16.mxu0 %v12219_v2  ;;  %12104 = vmatprep.subr.bf16.mxu1 %v12219_v2  ;;  %v12224_v36 = vld [vmem:[%s17335_s3 + $0x38] sm:$0xff]   ;;  %12328 = vmac.bf16.f32.vacc1 %v14114_v14, %v14086_v6  ;;  %12350 = vmac.bf16.f32.vacc2 %v14141_v35, %v14086_v6  ;;  %v14166_v45 = vld [vmem:[%s14049_s27 + $0x20] sm:$0xff]   ;;  %12370 = vmul.bf16.f32.vacc3 %v14141_v35, %v14080_v4  ;;  %v14188_v60 = vld [vmem:[%s14049_s27 + $0x28] sm:$0xff]  }
  0x78   : > { %v12310_v17 = vmovacc.add.low.vacc0  ;;  %v14149_v38 = vld [vmem:[%s14049_s27 + $0x58] sm:$0xff]   ;;  %12329 = vmac.bf16.f32.vacc1 %v14095_v9, %v14117_v15  ;;  %12351 = vmac.bf16.f32.vacc2 %v14101_v11, %v14117_v15  ;;  %12371 = vmac.bf16.f32.vacc3 %v14114_v14, %v14107_v13  ;;  %v14177_v51 = vld [vmem:[%s14049_s27 + $0x60] sm:$0xff]   ;;  %v14208_v21 = vld [vmem:[%s14049_s27 + $0x30] sm:$0xff]  }
  0x79   : > { %v12311_v18 = vmovacc.add.high.vacc0  ;;  %12330 = vmac.bf16.f32.vacc1 %v14101_v11, %v14092_v8  ;;  %12352 = vmac.bf16.f32.vacc2 %v14134_v30, %v14092_v8  ;;  %12372 = vmac.bf16.f32.vacc3 %v14166_v45, %v14086_v6 }
  0x7a   : > { %11927 = vmatpush3.bf16.msra.mxu0 %v12219_v2  ;;  %12112 = vmatpush3.bf16.msra.mxu1 %v12219_v2  ;;  %12331 = vmac.bf16.f32.vacc1 %v14134_v30, %v14098_v10  ;;  %12353 = vmac.bf16.f32.vacc2 %v14149_v38, %v14098_v10  ;;  %12373 = vmac.bf16.f32.vacc3 %v14134_v30, %v14117_v15 }
  0x7b   : > { %11928 = vmatprep.subr.bf16.mxu0 %v12220_v3  ;;  %12105 = vmatprep.subr.bf16.mxu1 %v12220_v3  ;;  %v12312_v19 = vcombine.low %v12310_v17, %v12311_v18  ;;  %v12313_v20 = vcombine.high %v12310_v17, %v12311_v18  ;;  %12374 = vmac.bf16.f32.vacc3 %v14149_v38, %v14092_v8  ;;  %v14197_v17 = vld [vmem:[%s14049_s27 + $0x68] sm:$0xff]  }
  0x7c   : > { %v12332_v39 = vmovacc.add.low.vacc1  ;;  %v12354_v52 = vmovacc.add.low.vacc2  ;;  %12375 = vmac.bf16.f32.vacc3 %v14177_v51, %v14098_v10  ;;  %12392 = vmul.bf16.f32.vacc0 %v14166_v45, %v14080_v4 }
  0x7d   : > { %v12319_v27 = vrot.slane %v12312_v19, %v14126_v26  ;;  %v12325_v28 = vrot.slane %v12313_v20, %v14126_v26  ;;  %v12333_v40 = vmovacc.add.high.vacc1  ;;  %v12355_v53 = vmovacc.add.high.vacc2 }
  0x7e   : > { %11929 = vmatpush3.bf16.msra.mxu0 %v12220_v3  ;;  %12113 = vmatpush3.bf16.msra.mxu1 %v12220_v3  ;;  %v12376_v0 = vmovacc.add.low.vacc3  ;;  %12393 = vmac.bf16.f32.vacc0 %v14141_v35, %v14107_v13 }
  0x7f   : > { %11930 = vmatprep.subr.bf16.mxu0 %v12221_v12  ;;  %12106 = vmatprep.subr.bf16.mxu1 %v12221_v12  ;;  %vm6211_vm0 = vcmp.gt.f32.partialorder %v12319_v27, 0.0  ;;  %vm6212_vm1 = vcmp.gt.f32.partialorder %v12325_v28, 0.0  ;;  %v6339_v31 = vmul.f32 0.1, %v12319_v27  ;;  %v6340_v32 = vmul.f32 0.1, %v12325_v28 }
  0x80   : > { %v12334_v41 = vcombine.low %v12332_v39, %v12333_v40  ;;  %v12335_v42 = vcombine.high %v12332_v39, %v12333_v40  ;;  %v12356_v54 = vcombine.low %v12354_v52, %v12355_v53  ;;  %v12357_v55 = vcombine.high %v12354_v52, %v12355_v53 }
  0x81   : > { %v6467_v33 = vsel %vm6211_vm0, %v12319_v27, %v6339_v31  ;;  %v6468_v34 = vsel %vm6212_vm1, %v12325_v28, %v6340_v32  ;;  %v12377_v1 = vmovacc.add.high.vacc3  ;;  %12394 = vmac.bf16.f32.vacc0 %v14188_v60, %v14086_v6  ;;  %v14221_v32 = vld [vmem:[%s14049_s27 + $0x70] sm:$0xff]  }
  0x82   : > { %11931 = vmatpush3.bf16.msra.mxu0 %v12221_v12  ;;  %12114 = vmatpush3.bf16.msra.mxu1 %v12221_v12  ;;  %v6595_v37 = vpack.c.bf16 %v6468_v34, %v6467_v33  ;;  %v12341_v43 = vrot.slane %v12334_v41, %v14126_v26  ;;  %v12347_v44 = vrot.slane %v12335_v42, %v14126_v26  ;;  %v14233_v41 = vld [vmem:[%s14049_s27 + $0x78] sm:$0xff]  }
  0x83   : > { %11932 = vmatprep.subr.bf16.mxu0 %v12222_v16  ;;  %12107 = vmatprep.subr.bf16.mxu1 %v12222_v16  ;;  %v12363_v56 = vrot.slane %v12356_v54, %v14126_v26  ;;  %v12369_v57 = vrot.slane %v12357_v55, %v14126_v26  ;;  %v12378_v2 = vcombine.low %v12376_v0, %v12377_v1  ;;  %v14250_v55 = vld [vmem:[%s14057_s29 + $0x8] sm:$0xff]  }
  0x84   : > { %11938 = vmatprep.mubr.bf16.mxu0 %v6595_v37  ;;  %vm6213_vm2 = vcmp.gt.f32.partialorder %v12341_v43, 0.0  ;;  %vm6214_vm3 = vcmp.gt.f32.partialorder %v12347_v44, 0.0  ;;  %v6341_v46 = vmul.f32 0.1, %v12341_v43  ;;  %v6342_v47 = vmul.f32 0.1, %v12347_v44 }
  0x85   : > { %vm6215_vm4 = vcmp.gt.f32.partialorder %v12363_v56, 0.0  ;;  %vm6216_vm5 = vcmp.gt.f32.partialorder %v12369_v57, 0.0  ;;  %v6343_v58 = vmul.f32 0.1, %v12363_v56  ;;  %v6344_v59 = vmul.f32 0.1, %v12369_v57 }
  0x86   : > { %11933 = vmatpush3.bf16.msra.mxu0 %v12222_v16  ;;  %12115 = vmatpush3.bf16.msra.mxu1 %v12222_v16  ;;  %v6469_v48 = vsel %vm6213_vm2, %v12341_v43, %v6341_v46  ;;  %v6470_v49 = vsel %vm6214_vm3, %v12347_v44, %v6342_v47  ;;  %v12379_v3 = vcombine.high %v12376_v0, %v12377_v1 }
  0x87   : > { %11934 = vmatprep.subr.bf16.mxu0 %v12223_v29  ;;  %12108 = vmatprep.subr.bf16.mxu1 %v12223_v29  ;;  %v6596_v50 = vpack.c.bf16 %v6470_v49, %v6469_v48  ;;  %v6471_v61 = vsel %vm6215_vm4, %v12363_v56, %v6343_v58  ;;  %v6472_v62 = vsel %vm6216_vm5, %v12369_v57, %v6344_v59 }
  0x88   : > { %v6597_v63 = vpack.c.bf16 %v6472_v62, %v6471_v61  ;;  %v12385_v12 = vrot.slane %v12378_v2, %v14126_v26  ;;  %v12391_v16 = vrot.slane %v12379_v3, %v14126_v26  ;;  %12395 = vmac.bf16.f32.vacc0 %v14149_v38, %v14117_v15 }
  0x89   : > { %12396 = vmac.bf16.f32.vacc0 %v14177_v51, %v14092_v8  ;;  %12414 = vmul.bf16.f32.vacc3 %v14188_v60, %v14080_v4  ;;  %12436 = vmul.bf16.f32.vacc1 %v14208_v21, %v14080_v4 }
  0x8a   : > { %11935 = vmatpush3.bf16.msra.mxu0 %v12223_v29  ;;  %12116 = vmatpush3.bf16.msra.mxu1 %v12223_v29  ;;  %vm6217_vm6 = vcmp.gt.f32.partialorder %v12385_v12, 0.0  ;;  %v6345_v18 = vmul.f32 0.1, %v12385_v12  ;;  %vm6218_vm7 = vcmp.gt.f32.partialorder %v12391_v16, 0.0  ;;  %v6346_v19 = vmul.f32 0.1, %v12391_v16 }
  0x8b   : > { %11936 = vmatprep.subr.bf16.mxu0 %v12224_v36  ;;  %12109 = vmatprep.subr.bf16.mxu1 %v12224_v36  ;;  %12415 = vmac.bf16.f32.vacc3 %v14166_v45, %v14107_v13  ;;  %12397 = vmac.bf16.f32.vacc0 %v14197_v17, %v14098_v10  ;;  %12437 = vmac.bf16.f32.vacc1 %v14188_v60, %v14107_v13 }
  0x8c   : > { %v6473_v20 = vsel %vm6217_vm6, %v12385_v12, %v6345_v18  ;;  %v6474_v22 = vsel %vm6218_vm7, %v12391_v16, %v6346_v19  ;;  %12416 = vmac.bf16.f32.vacc3 %v14208_v21, %v14086_v6 }
  0x8d   : > { %v6598_v23 = vpack.c.bf16 %v6474_v22, %v6473_v20  ;;  %v12398_v24 = vmovacc.add.low.vacc0  ;;  %12417 = vmac.bf16.f32.vacc3 %v14177_v51, %v14117_v15 }
  0x8e   : > { %11937 = vmatpush3.bf16.msra.mxu0 %v12224_v36  ;;  %12117 = vmatpush3.bf16.msra.mxu1 %v12224_v36  ;;  %v12399_v25 = vmovacc.add.high.vacc0  ;;  %v14226_v36 = vld [vmem:[%s14049_s27 + $0x38] sm:$0xff]   ;;  %12418 = vmac.bf16.f32.vacc3 %v14197_v17, %v14092_v8 }
  0x8f   : > { %12419 = vmac.bf16.f32.vacc3 %v14221_v32, %v14098_v10  ;;  %12438 = vmac.bf16.f32.vacc1 %v14226_v36, %v14086_v6  ;;  %12458 = vmul.bf16.f32.vacc2 %v14226_v36, %v14080_v4 }
  0x90   : > { %v12400_v27 = vcombine.low %v12398_v24, %v12399_v25  ;;  %v12401_v28 = vcombine.high %v12398_v24, %v12399_v25  ;;  %12439 = vmac.bf16.f32.vacc1 %v14197_v17, %v14117_v15  ;;  %12459 = vmac.bf16.f32.vacc2 %v14208_v21, %v14107_v13  ;;  %v14274_v24 = vld [vmem:[%s14049_s27 + $0x80] sm:$0xff]  }
  0x91   : > { %11939 = vmatmul.mubr.bf16.vlgmr.msra.gmra.mrb[0].mxu0 %v6596_v50  ;;  %v12420_v42 = vmovacc.add.low.vacc3  ;;  %12440 = vmac.bf16.f32.vacc1 %v14221_v32, %v14092_v8  ;;  %12460 = vmac.bf16.f32.vacc2 %v14221_v32, %v14117_v15  ;;  %12478 = vmul.bf16.f32.vacc0 %v14095_v9, %v14080_v4 }
  0x92   : > { %11942 = vmatprep.mubr.bf16.mxu0 %v6597_v63  ;;  %v12407_v29 = vrot.slane %v12400_v27, %v14126_v26  ;;  %v12413_v31 = vrot.slane %v12401_v28, %v14126_v26  ;;  %v12421_v43 = vmovacc.add.high.vacc3  ;;  %12441 = vmac.bf16.f32.vacc1 %v14233_v41, %v14098_v10  ;;  %v14261_v63 = vld [vmem:[%s14057_s29 + $0x10] sm:$0xff]   ;;  %v14277_v28 = vld [vmem:[%s14049_s27 + $0x88] sm:$0xff]  }
  0x93   : > { %12461 = vmac.bf16.f32.vacc2 %v14233_v41, %v14092_v8  ;;  %12479 = vmac.bf16.f32.vacc0 %v14250_v55, %v14083_v5 }
  0x94   : > { %vm6219_vm8 = vcmp.gt.f32.partialorder %v12407_v29, 0.0  ;;  %vm6220_vm9 = vcmp.gt.f32.partialorder %v12413_v31, 0.0  ;;  %v6347_v33 = vmul.f32 0.1, %v12407_v29  ;;  %v6348_v34 = vmul.f32 0.1, %v12413_v31 }
  0x95   : > { %v12422_v44 = vcombine.low %v12420_v42, %v12421_v43  ;;  %v12423_v46 = vcombine.high %v12420_v42, %v12421_v43  ;;  %v12442_v56 = vmovacc.add.low.vacc1  ;;  %v12462_v3 = vmovacc.add.low.vacc2 }
  0x96   : > { %v6475_v37 = vsel %vm6219_vm8, %v12407_v29, %v6347_v33  ;;  %v6476_v39 = vsel %vm6220_vm9, %v12413_v31, %v6348_v34  ;;  %v12443_v57 = vmovacc.add.high.vacc1  ;;  %v12463_v12 = vmovacc.add.high.vacc2  ;;  %v14282_v33 = vld [vmem:[%s14057_s29] sm:$0xff]   ;;  %s8309_s29 = scalar_lea.sflag [#allocation5], %s14045_s25 }
  0x97   : > { %v6599_v40 = vpack.c.bf16 %v6476_v39, %v6475_v37  ;;  %v12429_v47 = vrot.slane %v12422_v44, %v14126_v26  ;;  %v12435_v48 = vrot.slane %v12423_v46, %v14126_v26  ;;  %12480 = vmac.bf16.f32.vacc0 %v14089_v7, %v14261_v63 }
  0x98   : > { %v12444_v58 = vcombine.low %v12442_v56, %v12443_v57  ;;  %v12445_v59 = vcombine.high %v12442_v56, %v12443_v57  ;;  %v12464_v16 = vcombine.low %v12462_v3, %v12463_v12  ;;  %v12465_v18 = vcombine.high %v12462_v3, %v12463_v12 }
  0x99   : > { %11943 = vmatmul.mubr.bf16.gmra.mrb[4].mxu0 %v6598_v23  ;;  %vm6221_vm10 = vcmp.gt.f32.partialorder %v12429_v47, 0.0  ;;  %vm6222_vm11 = vcmp.gt.f32.partialorder %v12435_v48, 0.0  ;;  %v6349_v49 = vmul.f32 0.1, %v12429_v47  ;;  %v6350_v50 = vmul.f32 0.1, %v12435_v48 }
  0x9a   : > { %11946 = vmatprep.mubr.bf16.mxu0 %v6599_v40  ;;  %v12451_v61 = vrot.slane %v12444_v58, %v14126_v26  ;;  %v12457_v62 = vrot.slane %v12445_v59, %v14126_v26  ;;  %v12471_v19 = vrot.slane %v12464_v16, %v14126_v26  ;;  %v12477_v20 = vrot.slane %v12465_v18, %v14126_v26 }
  0x9b   : > { %v6477_v52 = vsel %vm6221_vm10, %v12429_v47, %v6349_v49  ;;  %v6478_v53 = vsel %vm6222_vm11, %v12435_v48, %v6350_v50  ;;  %12481 = vmac.bf16.f32.vacc0 %v14101_v11, %v14086_v6  ;;  %12500 = vmul.bf16.f32.vacc2 %v14101_v11, %v14080_v4  ;;  %v14297_v47 = vld [vmem:[%s14049_s27 + $0x90] sm:$0xff]  }
  0x9c   : > { %v6600_v54 = vpack.c.bf16 %v6478_v53, %v6477_v52  ;;  %vm6223_vm12 = vcmp.gt.f32.partialorder %v12451_v61, 0.0  ;;  %v6351_v0 = vmul.f32 0.1, %v12451_v61  ;;  %vm6224_vm13 = vcmp.gt.f32.partialorder %v12457_v62, 0.0 }
  0x9d   : > { %v6352_v1 = vmul.f32 0.1, %v12457_v62  ;;  %vm6225_vm14 = vcmp.gt.f32.partialorder %v12471_v19, 0.0  ;;  %v6353_v23 = vmul.f32 0.1, %v12471_v19  ;;  %vm6226_vm15 = vcmp.gt.f32.partialorder %v12477_v20, 0.0 }
  0x9e   : > { %v6479_v2 = vsel %vm6223_vm12, %v12451_v61, %v6351_v0  ;;  %v6354_v27 = vmul.f32 0.1, %v12477_v20  ;;  %12482 = vmac.bf16.f32.vacc0 %v14274_v24, %v14092_v8  ;;  %12501 = vmac.bf16.f32.vacc2 %v14282_v33, %v14083_v5  ;;  %v14316_v5 = vld [vmem:[%s14049_s27 + $0x98] sm:$0xff]  }
  0x9f   : > { %v6480_v22 = vsel %vm6224_vm13, %v12457_v62, %v6352_v1  ;;  %v6481_v29 = vsel %vm6225_vm14, %v12471_v19, %v6353_v23  ;;  %12483 = vmac.bf16.f32.vacc0 %v14277_v28, %v14098_v10  ;;  %12502 = vmac.bf16.f32.vacc2 %v14089_v7, %v14250_v55 }
  0xa0   : > { %v6601_v25 = vpack.c.bf16 %v6480_v22, %v6479_v2  ;;  %v6482_v31 = vsel %vm6226_vm15, %v12477_v20, %v6354_v27  ;;  %12503 = vmac.bf16.f32.vacc2 %v14114_v14, %v14261_v63  ;;  %12525 = vmul.bf16.f32.vacc1 %v14134_v30, %v14080_v4  ;;  %v11350_v22 = vld [vmem:[%s14049_s27 + $0x18] sm:$0xff]  }
  0xa1   : > { %11947 = vmatmul.mubr.bf16.gmra.mrb[8].mxu0 %v6600_v54  ;;  %v6602_v34 = vpack.c.bf16 %v6482_v31, %v6481_v29  ;;  %v12484_v37 = vmovacc.add.low.vacc0  ;;  %12504 = vmac.bf16.f32.vacc2 %v14095_v9, %v14107_v13  ;;  %12526 = vmac.bf16.f32.vacc1 %v14089_v7, %v14282_v33 }
  0xa2   : > { %11950 = vmatprep.mubr.bf16.mxu0 %v6601_v25  ;;  %v12485_v39 = vmovacc.add.high.vacc0  ;;  %12505 = vmac.bf16.f32.vacc2 %v14134_v30, %v14086_v6  ;;  %12527 = vmac.bf16.f32.vacc1 %v14114_v14, %v14250_v55  ;;  %v11349_v14 = vld [vmem:[%s14049_s27 + $0x10] sm:$0xff]   ;;  %12550 = vmul.bf16.f32.vacc3 %v14149_v38, %v14080_v4 }
  0xa3   : > { %12506 = vmac.bf16.f32.vacc2 %v14274_v24, %v14117_v15  ;;  %12528 = vmac.bf16.f32.vacc1 %v14141_v35, %v14261_v63  ;;  %12551 = vmac.bf16.f32.vacc3 %v11349_v14, %v14282_v33 }
  0xa4   : > { %v12486_v40 = vcombine.low %v12484_v37, %v12485_v39  ;;  %v12487_v42 = vcombine.high %v12484_v37, %v12485_v39  ;;  %12507 = vmac.bf16.f32.vacc2 %v14277_v28, %v14092_v8  ;;  %12529 = vmac.bf16.f32.vacc1 %v14101_v11, %v14107_v13 }
  0xa5   : > { %12508 = vmac.bf16.f32.vacc2 %v14297_v47, %v14098_v10  ;;  %12530 = vmac.bf16.f32.vacc1 %v14149_v38, %v14086_v6  ;;  %12552 = vmac.bf16.f32.vacc3 %v14141_v35, %v14250_v55  ;;  %v14345_v38 = vld [vmem:[%s14049_s27 + $0xa0] sm:$0xff]   ;;  %v14355_v35 = vld [vmem:[%s14049_s27 + $0x58] sm:$0xff]   ;;  %12575 = vmul.bf16.f32.vacc0 %v14177_v51, %v14080_v4 }
  0xa6   : > { %v12493_v43 = vrot.slane %v12486_v40, %v14126_v26  ;;  %v12499_v44 = vrot.slane %v12487_v42, %v14126_v26  ;;  %12531 = vmac.bf16.f32.vacc1 %v14277_v28, %v14117_v15  ;;  %12553 = vmac.bf16.f32.vacc3 %v14166_v45, %v14261_v63  ;;  %v11351_v40 = vld [vmem:[%s14049_s27 + $0x20] sm:$0xff]  }
  0xa7   : > { %v12509_v9 = vmovacc.add.low.vacc2  ;;  %12532 = vmac.bf16.f32.vacc1 %v14297_v47, %v14092_v8  ;;  %12554 = vmac.bf16.f32.vacc3 %v14134_v30, %v14107_v13  ;;  %12576 = vmac.bf16.f32.vacc0 %v11350_v22, %v14282_v33  ;;  %v14365_v30 = vld [vmem:[%s14049_s27 + $0xa8] sm:$0xff]  }
  0xa8   : > { %vm6227_vm0 = vcmp.gt.f32.partialorder %v12493_v43, 0.0  ;;  %v6355_v46 = vmul.f32 0.1, %v12493_v43  ;;  %vm6228_vm1 = vcmp.gt.f32.partialorder %v12499_v44, 0.0  ;;  %v6356_v48 = vmul.f32 0.1, %v12499_v44 }
  0xa9   : > { %11951 = vmatmul.mubr.bf16.gmra.mrb[12].mxu0 %v6602_v34  ;;  %v12510_v53 = vmovacc.add.high.vacc2  ;;  %12533 = vmac.bf16.f32.vacc1 %v14316_v5, %v14098_v10  ;;  %12555 = vmac.bf16.f32.vacc3 %v14177_v51, %v14086_v6  ;;  %12577 = vmac.bf16.f32.vacc0 %v14166_v45, %v14250_v55  ;;  %v14391_v45 = vld [vmem:[%s14049_s27 + $0xb0] sm:$0xff]  }
  0xaa   : > { %v6483_v49 = vsel %vm6227_vm0, %v12493_v43, %v6355_v46  ;;  %v6484_v50 = vsel %vm6228_vm1, %v12499_v44, %v6356_v48  ;;  %12556 = vmac.bf16.f32.vacc3 %v14297_v47, %v14117_v15  ;;  %12578 = vmac.bf16.f32.vacc0 %v14188_v60, %v14261_v63  ;;  %v14381_v48 = vld [vmem:[%s14049_s27 + $0x60] sm:$0xff]  }
  0xab   : > { %v6603_v52 = vpack.c.bf16 %v6484_v50, %v6483_v49  ;;  %v12511_v7 = vcombine.low %v12509_v9, %v12510_v53  ;;  %v12512_v54 = vcombine.high %v12509_v9, %v12510_v53  ;;  %v12534_v11 = vmovacc.add.low.vacc1 }
  0xac   : > { %v12535_v1 = vmovacc.add.high.vacc1  ;;  %12557 = vmac.bf16.f32.vacc3 %v14316_v5, %v14092_v8  ;;  %12579 = vmac.bf16.f32.vacc0 %v14355_v35, %v14107_v13  ;;  %12600 = vmul.bf16.f32.vacc2 %v14197_v17, %v14080_v4 }
  0xad   : > { %11954 = vmatprep.mubr.bf16.mxu0 %v6603_v52  ;;  %v12518_v56 = vrot.slane %v12511_v7, %v14126_v26  ;;  %v12524_v57 = vrot.slane %v12512_v54, %v14126_v26  ;;  %12558 = vmac.bf16.f32.vacc3 %v14345_v38, %v14098_v10  ;;  %12580 = vmac.bf16.f32.vacc0 %v14197_v17, %v14086_v6 }
  0xae   : > { %v12536_v2 = vcombine.low %v12534_v11, %v12535_v1  ;;  %v12537_v3 = vcombine.high %v12534_v11, %v12535_v1  ;;  %12581 = vmac.bf16.f32.vacc0 %v14316_v5, %v14117_v15  ;;  %12601 = vmac.bf16.f32.vacc2 %v11351_v40, %v14282_v33 }
  0xaf   : > { %vm6229_vm2 = vcmp.gt.f32.partialorder %v12518_v56, 0.0  ;;  %v6357_v58 = vmul.f32 0.1, %v12518_v56  ;;  %vm6230_vm3 = vcmp.gt.f32.partialorder %v12524_v57, 0.0  ;;  %v6358_v59 = vmul.f32 0.1, %v12524_v57 }
  0xb0   : > { %v12543_v12 = vrot.slane %v12536_v2, %v14126_v26  ;;  %v12549_v16 = vrot.slane %v12537_v3, %v14126_v26  ;;  %v12559_v27 = vmovacc.add.low.vacc3  ;;  %12582 = vmac.bf16.f32.vacc0 %v14345_v38, %v14092_v8  ;;  %v14422_v2 = vld [vmem:[%s14049_s27 + $0xb8] sm:$0xff]  }
  0xb1   : > { %v6485_v61 = vsel %vm6229_vm2, %v12518_v56, %v6357_v58  ;;  %v6486_v62 = vsel %vm6230_vm3, %v12524_v57, %v6358_v59  ;;  %v12560_v29 = vmovacc.add.high.vacc3  ;;  %12602 = vmac.bf16.f32.vacc2 %v14188_v60, %v14250_v55  ;;  %v11352_v60 = vld [vmem:[%s14049_s27 + $0x28] sm:$0xff]   ;;  %v11402_v56 = vld [vmem:[%s14049_s27 + $0x30] sm:$0xff]   ;;  %v14426_v3 = vld [vmem:[%s14049_s27 + $0x78] sm:$0xff]  }
  0xb2   : > { %v6604_v0 = vpack.c.bf16 %v6486_v62, %v6485_v61  ;;  %vm6231_vm4 = vcmp.gt.f32.partialorder %v12543_v12, 0.0  ;;  %v6359_v18 = vmul.f32 0.1, %v12543_v12  ;;  %vm6232_vm5 = vcmp.gt.f32.partialorder %v12549_v16, 0.0  ;;  %v14408_v59 = vld [vmem:[%s14049_s27 + $0x68] sm:$0xff]  }
  0xb3   : > { %v6360_v19 = vmul.f32 0.1, %v12549_v16  ;;  %v12561_v31 = vcombine.low %v12559_v27, %v12560_v29  ;;  %v12562_v34 = vcombine.high %v12559_v27, %v12560_v29  ;;  %12583 = vmac.bf16.f32.vacc0 %v14365_v30, %v14098_v10 }
  0xb4   : > { %11955 = vmatmul.mubr.bf16.gmra.mrb[16].mxu0 %v6604_v0  ;;  %v6487_v20 = vsel %vm6231_vm4, %v12543_v12, %v6359_v18  ;;  %12603 = vmac.bf16.f32.vacc2 %v14208_v21, %v14261_v63  ;;  %12625 = vmul.bf16.f32.vacc1 %v14221_v32, %v14080_v4  ;;  %v11403_v18 = vld [vmem:[%s14049_s27 + $0x38] sm:$0xff]   ;;  %12650 = vmul.bf16.f32.vacc3 %v14426_v3, %v14080_v4 }
  0xb5   : > { %v6488_v23 = vsel %vm6232_vm5, %v12549_v16, %v6360_v19  ;;  %v12568_v37 = vrot.slane %v12561_v31, %v14126_v26  ;;  %v12574_v39 = vrot.slane %v12562_v34, %v14126_v26  ;;  %v12584_v49 = vmovacc.add.low.vacc0  ;;  %v11404_v31 = vld [vmem:[%s14049_s27 + $0x40] sm:$0xff]   ;;  %v11460_v34 = vld [vmem:[%s14049_s27 + $0x48] sm:$0xff]  }
  0xb6   : > { %v6605_v25 = vpack.c.bf16 %v6488_v23, %v6487_v20  ;;  %v12585_v50 = vmovacc.add.high.vacc0  ;;  %12604 = vmac.bf16.f32.vacc2 %v14381_v48, %v14107_v13  ;;  %12626 = vmac.bf16.f32.vacc1 %v11352_v60, %v14282_v33  ;;  %v14434_v20 = vld [vmem:[%s14049_s27 + $0x70] sm:$0xff]  }
  0xb7   : > { %vm6233_vm6 = vcmp.gt.f32.partialorder %v12568_v37, 0.0  ;;  %v6361_v51 = vmul.f32 0.1, %v12568_v37  ;;  %vm6234_vm7 = vcmp.gt.f32.partialorder %v12574_v39, 0.0  ;;  %v6362_v42 = vmul.f32 0.1, %v12574_v39 }
  0xb8   : > { %11958 = vmatprep.mubr.bf16.mxu0 %v6605_v25  ;;  %v12586_v52 = vcombine.low %v12584_v49, %v12585_v50  ;;  %v12587_v17 = vcombine.high %v12584_v49, %v12585_v50  ;;  %12605 = vmac.bf16.f32.vacc2 %v14221_v32, %v14086_v6  ;;  %12627 = vmac.bf16.f32.vacc1 %v11402_v56, %v14250_v55 }
  0xb9   : > { %v6489_v43 = vsel %vm6233_vm6, %v12568_v37, %v6361_v51  ;;  %v6490_v44 = vsel %vm6234_vm7, %v12574_v39, %v6362_v42  ;;  %12606 = vmac.bf16.f32.vacc2 %v14345_v38, %v14117_v15  ;;  %12628 = vmac.bf16.f32.vacc1 %v14226_v36, %v14261_v63 }
  0xba   : > { %v6606_v46 = vpack.c.bf16 %v6490_v44, %v6489_v43  ;;  %v12593_v9 = vrot.slane %v12586_v52, %v14126_v26  ;;  %v12599_v53 = vrot.slane %v12587_v17, %v14126_v26  ;;  %12607 = vmac.bf16.f32.vacc2 %v14365_v30, %v14092_v8  ;;  %v14461_v17 = vld [vmem:[%s14049_s27 + $0xc0] sm:$0xff]  }
  0xbb   : > { %12608 = vmac.bf16.f32.vacc2 %v14391_v45, %v14098_v10  ;;  %12629 = vmac.bf16.f32.vacc1 %v14408_v59, %v14107_v13  ;;  %12651 = vmac.bf16.f32.vacc3 %v11402_v56, %v14282_v33  ;;  %12672 = vmul.bf16.f32.vacc0 %v14274_v24, %v14080_v4 }
  0xbc   : > { %11959 = vmatmul.mubr.bf16.gmra.mrb[20].mxu0 %v6606_v46  ;;  %vm6235_vm8 = vcmp.gt.f32.partialorder %v12593_v9, 0.0  ;;  %vm6236_vm9 = vcmp.gt.f32.partialorder %v12599_v53, 0.0  ;;  %v6363_v7 = vmul.f32 0.1, %v12593_v9  ;;  %v6364_v54 = vmul.f32 0.1, %v12599_v53 }
  0xbd   : > { %v12609_v21 = vmovacc.add.low.vacc2  ;;  %12630 = vmac.bf16.f32.vacc1 %v14233_v41, %v14086_v6  ;;  %12652 = vmac.bf16.f32.vacc3 %v11403_v18, %v14250_v55  ;;  %12673 = vmac.bf16.f32.vacc0 %v11404_v31, %v14250_v55  ;;  %v14494_v18 = vld [vmem:[%s14049_s27 + $0x90] sm:$0xff]  }
  0xbe   : > { %v6491_v57 = vsel %vm6235_vm8, %v12593_v9, %v6363_v7  ;;  %v6492_v14 = vsel %vm6236_vm9, %v12599_v53, %v6364_v54  ;;  %v12610_v61 = vmovacc.add.high.vacc2  ;;  %12631 = vmac.bf16.f32.vacc1 %v14365_v30, %v14117_v15  ;;  %v14464_v9 = vld [vmem:[%s14049_s27 + $0xc8] sm:$0xff]  }
  0xbf   : > { %v6607_v58 = vpack.c.bf16 %v6492_v14, %v6491_v57  ;;  %12632 = vmac.bf16.f32.vacc1 %v14391_v45, %v14092_v8  ;;  %12653 = vmac.bf16.f32.vacc3 %v14434_v20, %v14107_v13  ;;  %v14470_v54 = vld [vmem:[%s14049_s27 + $0x88] sm:$0xff]   ;;  %12674 = vmac.bf16.f32.vacc0 %v11460_v34, %v14261_v63  ;;  %v11461_v14 = vld [vmem:[%s14049_s27 + $0x50] sm:$0xff]  }
  0xc0   : > { %v12611_v62 = vcombine.low %v12609_v21, %v12610_v61  ;;  %v12612_v0 = vcombine.high %v12609_v21, %v12610_v61  ;;  %12633 = vmac.bf16.f32.vacc1 %v14422_v2, %v14098_v10  ;;  %12654 = vmac.bf16.f32.vacc3 %v14391_v45, %v14117_v15 }
  0xc1   : > { %11962 = vmatprep.mubr.bf16.mxu0 %v6607_v58  ;;  %12655 = vmac.bf16.f32.vacc3 %v14422_v2, %v14092_v8  ;;  %12675 = vmac.bf16.f32.vacc0 %v14277_v28, %v14086_v6  ;;  %v14477_v58 = vld [vmem:[%s14049_s27 + $0x80] sm:$0xff]   ;;  %12719 = vmul.bf16.f32.vacc2 %v14494_v18, %v14080_v4 }
  0xc2   : > { %v12618_v11 = vrot.slane %v12611_v62, %v14126_v26  ;;  %v12624_v1 = vrot.slane %v12612_v0, %v14126_v26  ;;  %v12634_v36 = vmovacc.add.low.vacc1  ;;  %12676 = vmac.bf16.f32.vacc0 %v14461_v17, %v14092_v8 }
  0xc3   : > { %v12635_v41 = vmovacc.add.high.vacc1  ;;  %v12656_v43 = vmovacc.add.low.vacc3  ;;  %12677 = vmac.bf16.f32.vacc0 %v14464_v9, %v14098_v10  ;;  %12720 = vmac.bf16.f32.vacc2 %v11460_v34, %v14282_v33 }
  0xc4   : > { %vm6237_vm10 = vcmp.gt.f32.partialorder %v12618_v11, 0.0  ;;  %v6365_v32 = vmul.f32 0.1, %v12618_v11  ;;  %vm6238_vm11 = vcmp.gt.f32.partialorder %v12624_v1, 0.0  ;;  %v6366_v12 = vmul.f32 0.1, %v12624_v1 }
  0xc5   : > { %v12636_v23 = vcombine.low %v12634_v36, %v12635_v41  ;;  %v12637_v25 = vcombine.high %v12634_v36, %v12635_v41  ;;  %v12657_v44 = vmovacc.add.high.vacc3  ;;  %v12678_v24 = vmovacc.add.low.vacc0 }
  0xc6   : > { %v6493_v16 = vsel %vm6237_vm10, %v12618_v11, %v6365_v32  ;;  %v6494_v19 = vsel %vm6238_vm11, %v12624_v1, %v6366_v12  ;;  %v12679_v21 = vmovacc.add.high.vacc0  ;;  %v14491_v32 = vld [vmem:[%s14049_s27 + $0xd0] sm:$0xff]   ;;  %12721 = vmac.bf16.f32.vacc2 %v11461_v14, %v14250_v55 }
  0xc7   : > { %v6608_v22 = vpack.c.bf16 %v6494_v19, %v6493_v16  ;;  %v12643_v27 = vrot.slane %v12636_v23, %v14126_v26  ;;  %v12649_v29 = vrot.slane %v12637_v25, %v14126_v26  ;;  %v12658_v46 = vcombine.low %v12656_v43, %v12657_v44 }
  0xc8   : > { %v12659_v49 = vcombine.high %v12656_v43, %v12657_v44  ;;  %12694 = vmul.bf16.f32.vacc3 %v14470_v54, %v14080_v4  ;;  %v12680_v61 = vcombine.low %v12678_v24, %v12679_v21  ;;  %v12681_v28 = vcombine.high %v12678_v24, %v12679_v21 }
  0xc9   : > { %11963 = vmatmul.mubr.bf16.gmra.mrb[24].mxu0 %v6608_v22  ;;  %vm6239_vm12 = vcmp.gt.f32.partialorder %v12643_v27, 0.0  ;;  %vm6240_vm13 = vcmp.gt.f32.partialorder %v12649_v29, 0.0  ;;  %v6367_v37 = vmul.f32 0.1, %v12643_v27  ;;  %v6368_v39 = vmul.f32 0.1, %v12649_v29 }
  0xca   : > { %v12665_v50 = vrot.slane %v12658_v46, %v14126_v26  ;;  %v12671_v52 = vrot.slane %v12659_v49, %v14126_v26  ;;  %12695 = vmac.bf16.f32.vacc3 %v11404_v31, %v14282_v33  ;;  %v12687_v62 = vrot.slane %v12680_v61, %v14126_v26 }
  0xcb   : > { %v6495_v51 = vsel %vm6239_vm12, %v12643_v27, %v6367_v37  ;;  %v6496_v40 = vsel %vm6240_vm13, %v12649_v29, %v6368_v39  ;;  %v12693_v0 = vrot.slane %v12681_v28, %v14126_v26  ;;  %12696 = vmac.bf16.f32.vacc3 %v11460_v34, %v14250_v55  ;;  %v14513_v27 = vld [vmem:[%s14049_s27 + $0xd8] sm:$0xff]   ;;  %v14558_v28 = vld [vmem:[%s14049_s27 + $0xe8] sm:$0xff]  }
  0xcc   : > { %v6609_v42 = vpack.c.bf16 %v6496_v40, %v6495_v51  ;;  %vm6241_vm14 = vcmp.gt.f32.partialorder %v12665_v50, 0.0  ;;  %vm6242_vm15 = vcmp.gt.f32.partialorder %v12671_v52, 0.0  ;;  %v6369_v53 = vmul.f32 0.1, %v12665_v50  ;;  %v11303_v29 = vld [vmem:[%s14049_s27 + $0x98] sm:$0xff]   ;;  %v14531_v40 = vld [vmem:[%s14049_s27 + $0xe0] sm:$0xff]  }
  0xcd   : > { %v6370_v7 = vmul.f32 0.1, %v12671_v52  ;;  %vm6243_vm0 = vcmp.gt.f32.partialorder %v12687_v62, 0.0  ;;  %vm6244_vm1 = vcmp.gt.f32.partialorder %v12693_v0, 0.0  ;;  %v6371_v11 = vmul.f32 0.1, %v12687_v62 }
  0xce   : > { %11966 = vmatprep.mubr.bf16.mxu0 %v6609_v42  ;;  %v6497_v60 = vsel %vm6241_vm14, %v12665_v50, %v6369_v53  ;;  %v6372_v1 = vmul.f32 0.1, %v12693_v0  ;;  %12697 = vmac.bf16.f32.vacc3 %v11461_v14, %v14261_v63  ;;  %12722 = vmac.bf16.f32.vacc2 %v14355_v35, %v14261_v63  ;;  %v11304_v50 = vld [vmem:[%s14049_s27 + $0xa0] sm:$0xff]  }
  0xcf   : > { %v6498_v56 = vsel %vm6242_vm15, %v12671_v52, %v6370_v7  ;;  %v6499_v12 = vsel %vm6243_vm0, %v12687_v62, %v6371_v11  ;;  %12698 = vmac.bf16.f32.vacc3 %v14477_v58, %v14107_v13  ;;  %12723 = vmac.bf16.f32.vacc2 %v14107_v13, %v14470_v54 }
  0xd0   : > { %v6610_v57 = vpack.c.bf16 %v6498_v56, %v6497_v60  ;;  %v6500_v16 = vsel %vm6244_vm1, %v12693_v0, %v6372_v1  ;;  %12699 = vmac.bf16.f32.vacc3 %v14297_v47, %v14086_v6  ;;  %12724 = vmac.bf16.f32.vacc2 %v14316_v5, %v14086_v6 }
  0xd1   : > { %v6611_v19 = vpack.c.bf16 %v6500_v16, %v6499_v12  ;;  %12700 = vmac.bf16.f32.vacc3 %v14461_v17, %v14117_v15  ;;  %12725 = vmac.bf16.f32.vacc2 %v14464_v9, %v14117_v15  ;;  %12744 = vmul.bf16.f32.vacc0 %v11303_v29, %v14080_v4 }
  0xd2   : > { %11967 = vmatmul.mubr.bf16.gmra.mrb[28].mxu0 %v6610_v57  ;;  %12701 = vmac.bf16.f32.vacc3 %v14464_v9, %v14092_v8  ;;  %12745 = vmac.bf16.f32.vacc0 %v11461_v14, %v14282_v33  ;;  %12726 = vmac.bf16.f32.vacc2 %v14491_v32, %v14092_v8  ;;  %12769 = vmul.bf16.f32.vacc1 %v11304_v50, %v14080_v4 }
  0xd3   : > { %11970 = vmatprep.mubr.bf16.mxu0 %v6611_v19  ;;  %12702 = vmac.bf16.f32.vacc3 %v14491_v32, %v14098_v10  ;;  %12746 = vmac.bf16.f32.vacc0 %v14355_v35, %v14250_v55  ;;  %12727 = vmac.bf16.f32.vacc2 %v14513_v27, %v14098_v10  ;;  %12770 = vmac.bf16.f32.vacc1 %v14355_v35, %v14282_v33  ;;  %v11305_v35 = vld [vmem:[%s14049_s27 + $0xa8] sm:$0xff]  }
  0xd4   : > { %12747 = vmac.bf16.f32.vacc0 %v14381_v48, %v14261_v63  ;;  %12771 = vmac.bf16.f32.vacc1 %v14381_v48, %v14250_v55 }
  0xd5   : > { %v12703_v22 = vmovacc.add.low.vacc3  ;;  %v12728_v5 = vmovacc.add.low.vacc2  ;;  %12748 = vmac.bf16.f32.vacc0 %v14107_v13, %v14494_v18  ;;  %12772 = vmac.bf16.f32.vacc1 %v14408_v59, %v14261_v63 }
  0xd6   : > { %v12704_v36 = vmovacc.add.high.vacc3  ;;  %v12729_v42 = vmovacc.add.high.vacc2  ;;  %12749 = vmac.bf16.f32.vacc0 %v14345_v38, %v14086_v6  ;;  %12773 = vmac.bf16.f32.vacc1 %v14107_v13, %v11303_v29 }
  0xd7   : > { %12750 = vmac.bf16.f32.vacc0 %v14491_v32, %v14117_v15  ;;  %12774 = vmac.bf16.f32.vacc1 %v14365_v30, %v14086_v6 }
  0xd8   : > { %v12705_v41 = vcombine.low %v12703_v22, %v12704_v36  ;;  %v12706_v23 = vcombine.high %v12703_v22, %v12704_v36  ;;  %v12730_v43 = vcombine.low %v12728_v5, %v12729_v42  ;;  %v12731_v44 = vcombine.high %v12728_v5, %v12729_v42  ;;  %v14602_v5 = vld [vmem:[%s14049_s27 + $0xf8] sm:$0xff]  }
  0xd9   : > { %12751 = vmac.bf16.f32.vacc0 %v14513_v27, %v14092_v8  ;;  %12775 = vmac.bf16.f32.vacc1 %v14513_v27, %v14117_v15  ;;  %12794 = vmul.bf16.f32.vacc3 %v11305_v35, %v14080_v4 }
  0xda   : > { %v12712_v47 = vrot.slane %v12705_v41, %v14126_v26  ;;  %v12718_v25 = vrot.slane %v12706_v23, %v14126_v26  ;;  %v12737_v46 = vrot.slane %v12730_v43, %v14126_v26  ;;  %v12743_v49 = vrot.slane %v12731_v44, %v14126_v26  ;;  %v14580_v23 = vld [vmem:[%s14049_s27 + $0xf0] sm:$0xff]  }
  0xdb   : > { %12752 = vmac.bf16.f32.vacc0 %v14531_v40, %v14098_v10  ;;  %12795 = vmac.bf16.f32.vacc3 %v14381_v48, %v14282_v33  ;;  %12776 = vmac.bf16.f32.vacc1 %v14531_v40, %v14092_v8  ;;  %v11306_v48 = vld [vmem:[%s14049_s27 + $0xb0] sm:$0xff]  }
  0xdc   : > { %vm6245_vm2 = vcmp.gt.f32.partialorder %v12712_v47, 0.0  ;;  %v6373_v31 = vmul.f32 0.1, %v12712_v47  ;;  %vm6246_vm3 = vcmp.gt.f32.partialorder %v12718_v25, 0.0  ;;  %v6374_v34 = vmul.f32 0.1, %v12718_v25 }
  0xdd   : > { %vm6247_vm4 = vcmp.gt.f32.partialorder %v12737_v46, 0.0  ;;  %v6375_v52 = vmul.f32 0.1, %v12737_v46  ;;  %vm6248_vm5 = vcmp.gt.f32.partialorder %v12743_v49, 0.0  ;;  %v6376_v53 = vmul.f32 0.1, %v12743_v49 }
  0xde   : > { %v6501_v37 = vsel %vm6245_vm2, %v12712_v47, %v6373_v31  ;;  %v6502_v39 = vsel %vm6246_vm3, %v12718_v25, %v6374_v34  ;;  %v12753_v38 = vmovacc.add.low.vacc0  ;;  %12796 = vmac.bf16.f32.vacc3 %v14408_v59, %v14250_v55 }
  0xdf   : > { %v6612_v51 = vpack.c.bf16 %v6502_v39, %v6501_v37  ;;  %v6503_v7 = vsel %vm6247_vm4, %v12737_v46, %v6375_v52  ;;  %v6504_v60 = vsel %vm6248_vm5, %v12743_v49, %v6376_v53  ;;  %v12754_v57 = vmovacc.add.high.vacc0  ;;  %v11411_v49 = vld [vmem:[%s14049_s27 + $0x78] sm:$0xff]  }
  0xe0   : > { %v6613_v56 = vpack.c.bf16 %v6504_v60, %v6503_v7  ;;  %12777 = vmac.bf16.f32.vacc1 %v14558_v28, %v14098_v10  ;;  %12797 = vmac.bf16.f32.vacc3 %v14434_v20, %v14261_v63  ;;  %12819 = vmul.bf16.f32.vacc2 %v11306_v48, %v14080_v4 }
  0xe1   : > { %11971 = vmatmul.mubr.bf16.gmra.mrb[32].mxu0 %v6612_v51  ;;  %v12755_v14 = vcombine.low %v12753_v38, %v12754_v57  ;;  %v12756_v24 = vcombine.high %v12753_v38, %v12754_v57  ;;  %12798 = vmac.bf16.f32.vacc3 %v14107_v13, %v11304_v50  ;;  %12820 = vmac.bf16.f32.vacc2 %v14408_v59, %v14282_v33  ;;  %v11307_v59 = vld [vmem:[%s14049_s27 + $0xb8] sm:$0xff]   ;;  %v14629_v38 = vld [vmem:[%s14049_s27 + $0x100] sm:$0xff]  }
  0xe2   : > { %11974 = vmatprep.mubr.bf16.mxu0 %v6613_v56  ;;  %v12778_v30 = vmovacc.add.low.vacc1  ;;  %12799 = vmac.bf16.f32.vacc3 %v14391_v45, %v14086_v6  ;;  %12821 = vmac.bf16.f32.vacc2 %v14434_v20, %v14250_v55  ;;  %12844 = vmul.bf16.f32.vacc0 %v11307_v59, %v14080_v4 }
  0xe3   : > { %v12762_v21 = vrot.slane %v12755_v14, %v14126_v26  ;;  %v12768_v61 = vrot.slane %v12756_v24, %v14126_v26  ;;  %v12779_v16 = vmovacc.add.high.vacc1  ;;  %12800 = vmac.bf16.f32.vacc3 %v14531_v40, %v14117_v15  ;;  %v14632_v24 = vld [vmem:[%s14049_s27 + $0x108] sm:$0xff]  }
  0xe4   : > { %12801 = vmac.bf16.f32.vacc3 %v14558_v28, %v14092_v8  ;;  %12822 = vmac.bf16.f32.vacc2 %v14261_v63, %v14426_v3  ;;  %12845 = vmac.bf16.f32.vacc0 %v14434_v20, %v14282_v33 }
  0xe5   : > { %vm6249_vm6 = vcmp.gt.f32.partialorder %v12762_v21, 0.0  ;;  %v6377_v62 = vmul.f32 0.1, %v12762_v21  ;;  %vm6250_vm7 = vcmp.gt.f32.partialorder %v12768_v61, 0.0  ;;  %v6378_v0 = vmul.f32 0.1, %v12768_v61 }
  0xe6   : > { %v12780_v19 = vcombine.low %v12778_v30, %v12779_v16  ;;  %v12781_v22 = vcombine.high %v12778_v30, %v12779_v16  ;;  %12802 = vmac.bf16.f32.vacc3 %v14580_v23, %v14098_v10  ;;  %12823 = vmac.bf16.f32.vacc2 %v14107_v13, %v11305_v35  ;;  %v14650_v30 = vld [vmem:[%s14049_s27 + $0x88] sm:$0xff]  }
  0xe7   : > { %v6505_v11 = vsel %vm6249_vm6, %v12762_v21, %v6377_v62  ;;  %v6506_v1 = vsel %vm6250_vm7, %v12768_v61, %v6378_v0  ;;  %12824 = vmac.bf16.f32.vacc2 %v14422_v2, %v14086_v6  ;;  %12846 = vmac.bf16.f32.vacc0 %v11411_v49, %v14250_v55 }
  0xe8   : > { %v6614_v12 = vpack.c.bf16 %v6506_v1, %v6505_v11  ;;  %v12787_v36 = vrot.slane %v12780_v19, %v14126_v26  ;;  %v12793_v41 = vrot.slane %v12781_v22, %v14126_v26  ;;  %v12803_v34 = vmovacc.add.low.vacc3  ;;  %v14645_v1 = vld [vmem:[%s14049_s27 + $0xc8] sm:$0xff]  }
  0xe9   : > { %v12804_v37 = vmovacc.add.high.vacc3  ;;  %12825 = vmac.bf16.f32.vacc2 %v14558_v28, %v14117_v15  ;;  %12847 = vmac.bf16.f32.vacc0 %v14107_v13, %v11306_v48  ;;  %12866 = vmul.bf16.f32.vacc1 %v14461_v17, %v14080_v4 }
  0xea   : > { %11975 = vmatmul.mubr.bf16.gmra.mrb[36].mxu0 %v6614_v12  ;;  %vm6251_vm8 = vcmp.gt.f32.partialorder %v12787_v36, 0.0  ;;  %v6379_v47 = vmul.f32 0.1, %v12787_v36  ;;  %vm6252_vm9 = vcmp.gt.f32.partialorder %v12793_v41, 0.0  ;;  %v6380_v25 = vmul.f32 0.1, %v12793_v41 }
  0xeb   : > { %v12805_v45 = vcombine.low %v12803_v34, %v12804_v37  ;;  %v12806_v39 = vcombine.high %v12803_v34, %v12804_v37  ;;  %12826 = vmac.bf16.f32.vacc2 %v14580_v23, %v14092_v8  ;;  %12867 = vmac.bf16.f32.vacc1 %v14477_v58, %v14250_v55 }
  0xec   : > { %v6507_v27 = vsel %vm6251_vm8, %v12787_v36, %v6379_v47  ;;  %v6508_v29 = vsel %vm6252_vm9, %v12793_v41, %v6380_v25  ;;  %12827 = vmac.bf16.f32.vacc2 %v14602_v5, %v14098_v10  ;;  %12848 = vmac.bf16.f32.vacc0 %v14580_v23, %v14117_v15 }
  0xed   : > { %v6615_v31 = vpack.c.bf16 %v6508_v29, %v6507_v27  ;;  %v12812_v51 = vrot.slane %v12805_v45, %v14126_v26  ;;  %v12818_v40 = vrot.slane %v12806_v39, %v14126_v26  ;;  %12868 = vmac.bf16.f32.vacc1 %v14261_v63, %v14470_v54  ;;  %v11523_v29 = vld [vmem:[%s14049_s27 + $0xc0] sm:$0xff]   ;;  %v14664_v45 = vld [vmem:[%s14049_s27 + $0x110] sm:$0xff]  }
  0xee   : > { %v12828_v3 = vmovacc.add.low.vacc2  ;;  %12849 = vmac.bf16.f32.vacc0 %v14602_v5, %v14092_v8  ;;  %12869 = vmac.bf16.f32.vacc1 %v14464_v9, %v14086_v6 }
  0xef   : > { %11978 = vmatprep.mubr.bf16.mxu0 %v6615_v31  ;;  %vm6253_vm10 = vcmp.gt.f32.partialorder %v12812_v51, 0.0  ;;  %v6381_v42 = vmul.f32 0.1, %v12812_v51  ;;  %vm6254_vm11 = vcmp.gt.f32.partialorder %v12818_v40, 0.0  ;;  %v6382_v43 = vmul.f32 0.1, %v12818_v40 }
  0xf0   : > { %v12829_v52 = vmovacc.add.high.vacc2  ;;  %v12850_v17 = vmovacc.add.low.vacc0  ;;  %12870 = vmac.bf16.f32.vacc1 %v14629_v38, %v14092_v8 }
  0xf1   : > { %v6509_v44 = vsel %vm6253_vm10, %v12812_v51, %v6381_v42  ;;  %v6510_v46 = vsel %vm6254_vm11, %v12818_v40, %v6382_v43  ;;  %v12851_v61 = vmovacc.add.high.vacc0  ;;  %12871 = vmac.bf16.f32.vacc1 %v14632_v24, %v14098_v10  ;;  %v14669_v51 = vld [vmem:[%s14049_s27 + $0x130] sm:$0xff]   ;;  %v11593_v40 = vld [vmem:[%s14049_s27 + $0x138] sm:$0xff]  }
  0xf2   : > { %v6616_v50 = vpack.c.bf16 %v6510_v46, %v6509_v44  ;;  %v12830_v2 = vcombine.low %v12828_v3, %v12829_v52  ;;  %v12831_v53 = vcombine.high %v12828_v3, %v12829_v52  ;;  %v11757_v3 = vld [vmem:[%s14049_s27 + $0x178] sm:$0xff]   ;;  %12938 = vmul.bf16.f32.vacc3 %v11593_v40, %v14080_v4 }
  0xf3   : > { %v12852_v62 = vcombine.low %v12850_v17, %v12851_v61  ;;  %v12853_v35 = vcombine.high %v12850_v17, %v12851_v61  ;;  %v12872_v36 = vmovacc.add.low.vacc1  ;;  %12913 = vmul.bf16.f32.vacc0 %v14669_v51, %v14080_v4 }
  0xf4   : > { %11979 = vmatmul.mubr.bf16.gmra.mrb[40].mxu0 %v6616_v50  ;;  %v12837_v7 = vrot.slane %v12830_v2, %v14126_v26  ;;  %v12843_v60 = vrot.slane %v12831_v53, %v14126_v26  ;;  %v12873_v9 = vmovacc.add.high.vacc1  ;;  %12914 = vmac.bf16.f32.vacc0 %v14558_v28, %v14282_v33 }
  0xf5   : > { %v12859_v0 = vrot.slane %v12852_v62, %v14126_v26  ;;  %v12865_v11 = vrot.slane %v12853_v35, %v14126_v26  ;;  %12915 = vmac.bf16.f32.vacc0 %v14580_v23, %v14250_v55  ;;  %12939 = vmac.bf16.f32.vacc3 %v14580_v23, %v14282_v33  ;;  %v11414_v23 = vld [vmem:[%s14049_s27 + $0x90] sm:$0xff]   ;;  %v14715_v62 = vld [vmem:[%s14049_s27 + $0x98] sm:$0xff]  }
  0xf6   : > { %vm6255_vm12 = vcmp.gt.f32.partialorder %v12837_v7, 0.0  ;;  %vm6256_vm13 = vcmp.gt.f32.partialorder %v12843_v60, 0.0  ;;  %v6383_v20 = vmul.f32 0.1, %v12837_v7  ;;  %v6384_v56 = vmul.f32 0.1, %v12843_v60 }
  0xf7   : > { %vm6257_vm14 = vcmp.gt.f32.partialorder %v12859_v0, 0.0  ;;  %vm6258_vm15 = vcmp.gt.f32.partialorder %v12865_v11, 0.0  ;;  %v6385_v54 = vmul.f32 0.1, %v12859_v0  ;;  %v6386_v12 = vmul.f32 0.1, %v12865_v11 }
  0xf8   : > { %v6511_v57 = vsel %vm6255_vm12, %v12837_v7, %v6383_v20  ;;  %v6512_v14 = vsel %vm6256_vm13, %v12843_v60, %v6384_v56  ;;  %v12874_v41 = vcombine.low %v12872_v36, %v12873_v9  ;;  %v12875_v48 = vcombine.high %v12872_v36, %v12873_v9  ;;  %v14725_v36 = vld [vmem:[%s14049_s27 + $0xd8] sm:$0xff]  }
  0xf9   : > { %v6617_v21 = vpack.c.bf16 %v6512_v14, %v6511_v57  ;;  %v6513_v16 = vsel %vm6257_vm14, %v12859_v0, %v6385_v54  ;;  %v6514_v19 = vsel %vm6258_vm15, %v12865_v11, %v6386_v12  ;;  %12888 = vmul.bf16.f32.vacc1 %v14645_v1, %v14080_v4 }
  0xfa   : > { %v6618_v22 = vpack.c.bf16 %v6514_v19, %v6513_v16  ;;  %v12881_v47 = vrot.slane %v12874_v41, %v14126_v26  ;;  %v12887_v25 = vrot.slane %v12875_v48, %v14126_v26  ;;  %12889 = vmac.bf16.f32.vacc1 %v14477_v58, %v14282_v33  ;;  %v14675_v58 = vld [vmem:[%s14049_s27 + $0x128] sm:$0xff]  }
  0xfb   : > { %11982 = vmatprep.mubr.bf16.mxu0 %v6617_v21  ;;  %12890 = vmac.bf16.f32.vacc1 %v14650_v30, %v14250_v55  ;;  %12916 = vmac.bf16.f32.vacc0 %v14602_v5, %v14261_v63  ;;  %v11310_v21 = vld [vmem:[%s14049_s27 + $0xd0] sm:$0xff]   ;;  %12940 = vmac.bf16.f32.vacc3 %v14602_v5, %v14250_v55 }
  0xfc   : > { %11983 = vmatmul.mubr.bf16.gmra.mrb[44].mxu0 %v6618_v22  ;;  %vm6259_vm0 = vcmp.gt.f32.partialorder %v12881_v47, 0.0  ;;  %v6387_v27 = vmul.f32 0.1, %v12881_v47  ;;  %vm6260_vm1 = vcmp.gt.f32.partialorder %v12887_v25, 0.0  ;;  %v6388_v31 = vmul.f32 0.1, %v12887_v25 }
  0xfd   : > { %12891 = vmac.bf16.f32.vacc1 %v14261_v63, %v14494_v18  ;;  %v11649_v18 = vld [vmem:[%s14049_s27 + $0x168] sm:$0xff]   ;;  %12917 = vmac.bf16.f32.vacc0 %v14675_v58, %v14107_v13  ;;  %12941 = vmac.bf16.f32.vacc3 %v14107_v13, %v14669_v51  ;;  %12960 = vmul.bf16.f32.vacc2 %v11310_v21, %v14080_v4 }
  0xfe   : > { %v6515_v34 = vsel %vm6259_vm0, %v12881_v47, %v6387_v27  ;;  %v6516_v37 = vsel %vm6260_vm1, %v12887_v25, %v6388_v31  ;;  %12892 = vmac.bf16.f32.vacc1 %v11523_v29, %v14107_v13  ;;  %12918 = vmac.bf16.f32.vacc0 %v11593_v40, %v14086_v6  ;;  %v14731_v27 = vld [vmem:[%s14049_s27 + $0x118] sm:$0xff]   ;;  %v14746_v29 = vld [vmem:[%s14049_s27 + $0xe0] sm:$0xff]  }
  0xff   : > { %v6619_v39 = vpack.c.bf16 %v6516_v37, %v6515_v34  ;;  %12893 = vmac.bf16.f32.vacc1 %v14491_v32, %v14086_v6  ;;  %v11704_v32 = vld [vmem:[%s14049_s27 + $0x170] sm:$0xff]   ;;  %12919 = vmac.bf16.f32.vacc0 %v11649_v18, %v14117_v15  ;;  %12961 = vmac.bf16.f32.vacc2 %v14650_v30, %v14282_v33  ;;  %v14738_v30 = vld [vmem:[%s14049_s27 + $0xa0] sm:$0xff]  }
 0x100   : > { %12894 = vmac.bf16.f32.vacc1 %v14629_v38, %v14117_v15  ;;  %12920 = vmac.bf16.f32.vacc0 %v11704_v32, %v14092_v8  ;;  %12942 = vmac.bf16.f32.vacc3 %v11704_v32, %v14117_v15  ;;  %12962 = vmac.bf16.f32.vacc2 %v11414_v23, %v14250_v55  ;;  %v14759_v18 = vld [vmem:[%s14049_s27 + $0x120] sm:$0xff]  }
 0x101   : > { %11986 = vmatprep.mubr.bf16.mxu0 %v6619_v39  ;;  %12895 = vmac.bf16.f32.vacc1 %v14632_v24, %v14092_v8  ;;  %12921 = vmac.bf16.f32.vacc0 %v11757_v3, %v14098_v10  ;;  %12943 = vmac.bf16.f32.vacc3 %v11757_v3, %v14092_v8  ;;  %12963 = vmac.bf16.f32.vacc2 %v14715_v62, %v14261_v63  ;;  %v11324_v32 = vld [vmem:[%s14049_s27 + $0x140] sm:$0xff]  }
 0x102   : > { %12896 = vmac.bf16.f32.vacc1 %v14664_v45, %v14098_v10  ;;  %12964 = vmac.bf16.f32.vacc2 %v14107_v13, %v14645_v1 }
 0x103   : > { %v12922_v7 = vmovacc.add.low.vacc0  ;;  %v12944_v5 = vmovacc.add.low.vacc3  ;;  %12965 = vmac.bf16.f32.vacc2 %v14725_v36, %v14086_v6 }
 0x104   : > { %v12897_v42 = vmovacc.add.low.vacc1  ;;  %v12923_v60 = vmovacc.add.high.vacc0  ;;  %v12945_v54 = vmovacc.add.high.vacc3  ;;  %12966 = vmac.bf16.f32.vacc2 %v14632_v24, %v14117_v15 }
 0x105   : > { %v12898_v59 = vmovacc.add.high.vacc1  ;;  %12967 = vmac.bf16.f32.vacc2 %v14664_v45, %v14092_v8 }
 0x106   : > { %v12924_v20 = vcombine.low %v12922_v7, %v12923_v60  ;;  %v12925_v56 = vcombine.high %v12922_v7, %v12923_v60  ;;  %v12946_v12 = vcombine.low %v12944_v5, %v12945_v54  ;;  %v12947_v16 = vcombine.high %v12944_v5, %v12945_v54  ;;  %v14793_v5 = vld [vmem:[%s14049_s27 + $0x150] sm:$0xff]  }
 0x107   : > { %v12899_v43 = vcombine.low %v12897_v42, %v12898_v59  ;;  %v12900_v44 = vcombine.high %v12897_v42, %v12898_v59  ;;  %12985 = vmul.bf16.f32.vacc3 %v14725_v36, %v14080_v4  ;;  %12968 = vmac.bf16.f32.vacc2 %v14731_v27, %v14098_v10 }
 0x108   : > { %v12931_v57 = vrot.slane %v12924_v20, %v14126_v26  ;;  %v12937_v14 = vrot.slane %v12925_v56, %v14126_v26  ;;  %v12953_v19 = vrot.slane %v12946_v12, %v14126_v26  ;;  %v12959_v22 = vrot.slane %v12947_v16, %v14126_v26  ;;  %v14802_v16 = vld [vmem:[%s14049_s27 + $0x190] sm:$0xff]  }
 0x109   : > { %v12906_v46 = vrot.slane %v12899_v43, %v14126_v26  ;;  %v12912_v28 = vrot.slane %v12900_v44, %v14126_v26  ;;  %12986 = vmac.bf16.f32.vacc3 %v11414_v23, %v14282_v33  ;;  %v12969_v1 = vmovacc.add.low.vacc2 }
 0x10a   : > { %vm6287_vm4 = vcmp.gt.f32.partialorder %v12931_v57, 0.0  ;;  %vm6288_vm5 = vcmp.gt.f32.partialorder %v12937_v14, 0.0  ;;  %v6415_v17 = vmul.f32 0.1, %v12931_v57  ;;  %v6416_v61 = vmul.f32 0.1, %v12937_v14 }
 0x10b   : > { %vm6261_vm2 = vcmp.gt.f32.partialorder %v12906_v46, 0.0  ;;  %v6389_v49 = vmul.f32 0.1, %v12906_v46  ;;  %vm6262_vm3 = vcmp.gt.f32.partialorder %v12912_v28, 0.0  ;;  %v6390_v50 = vmul.f32 0.1, %v12912_v28 }
 0x10c   : > { %v6543_v35 = vsel %vm6287_vm4, %v12931_v57, %v6415_v17  ;;  %v6544_v0 = vsel %vm6288_vm5, %v12937_v14, %v6416_v61  ;;  %vm6289_vm6 = vcmp.gt.f32.partialorder %v12953_v19, 0.0  ;;  %vm6290_vm7 = vcmp.gt.f32.partialorder %v12959_v22, 0.0 }
 0x10d   : > { %v6517_v52 = vsel %vm6261_vm2, %v12906_v46, %v6389_v49  ;;  %v6518_v2 = vsel %vm6262_vm3, %v12912_v28, %v6390_v50  ;;  %v6633_v11 = vpack.c.bf16 %v6544_v0, %v6543_v35  ;;  %v6417_v9 = vmul.f32 0.1, %v12953_v19  ;;  %v14766_v28 = vld [vmem:[%s14049_s27 + $0x148] sm:$0xff]   ;;  %v11706_v49 = vld [vmem:[%s14049_s27 + $0x180] sm:$0xff]  }
 0x10e   : > { %v6620_v53 = vpack.c.bf16 %v6518_v2, %v6517_v52  ;;  %v6418_v41 = vmul.f32 0.1, %v12959_v22  ;;  %12987 = vmac.bf16.f32.vacc3 %v14715_v62, %v14250_v55  ;;  %v12970_v31 = vmovacc.add.high.vacc2  ;;  %v14777_v50 = vld [vmem:[%s14049_s27 + $0x188] sm:$0xff]  }
 0x10f   : > { %12014 = vmatprep.mubr.bf16.mxu1 %v6633_v11  ;;  %v6545_v48 = vsel %vm6289_vm6, %v12953_v19, %v6417_v9  ;;  %12988 = vmac.bf16.f32.vacc3 %v14738_v30, %v14261_v63  ;;  %13010 = vmul.bf16.f32.vacc0 %v11324_v32, %v14080_v4  ;;  %13032 = vmul.bf16.f32.vacc1 %v14766_v28, %v14080_v4 }
 0x110   : > { %11987 = vmatmul.mubr.bf16.gmra.mrb[48].mxu0 %v6620_v53  ;;  %v6546_v47 = vsel %vm6290_vm7, %v12959_v22, %v6418_v41  ;;  %v12971_v34 = vcombine.low %v12969_v1, %v12970_v31  ;;  %v12972_v37 = vcombine.high %v12969_v1, %v12970_v31  ;;  %12989 = vmac.bf16.f32.vacc3 %v14107_v13, %v11310_v21 }
 0x111   : > { %v6634_v25 = vpack.c.bf16 %v6546_v47, %v6545_v48  ;;  %12990 = vmac.bf16.f32.vacc3 %v14746_v29, %v14086_v6  ;;  %13011 = vmac.bf16.f32.vacc0 %v14629_v38, %v14250_v55  ;;  %13033 = vmac.bf16.f32.vacc1 %v14629_v38, %v14282_v33  ;;  %v14808_v38 = vld [vmem:[%s14049_s27 + $0xa8] sm:$0xff]  }
 0x112   : > { %v12978_v39 = vrot.slane %v12971_v34, %v14126_v26  ;;  %v12984_v40 = vrot.slane %v12972_v37, %v14126_v26  ;;  %12991 = vmac.bf16.f32.vacc3 %v14664_v45, %v14117_v15  ;;  %13012 = vmac.bf16.f32.vacc0 %v14632_v24, %v14261_v63  ;;  %v14835_v34 = vld [vmem:[%s14049_s27 + $0xb0] sm:$0xff]  }
 0x113   : > { %12015 = vmatmul.mubr.bf16.vlgmr.msra.gmra.mrb[0].mxu1 %v6634_v25  ;;  %12992 = vmac.bf16.f32.vacc3 %v14731_v27, %v14092_v8  ;;  %13013 = vmac.bf16.f32.vacc0 %v14766_v28, %v14086_v6  ;;  %13034 = vmac.bf16.f32.vacc1 %v14632_v24, %v14250_v55  ;;  %13057 = vmul.bf16.f32.vacc2 %v14746_v29, %v14080_v4  ;;  %v14817_v24 = vld [vmem:[%s14049_s27 + $0xe8] sm:$0xff]  }
 0x114   : > { %vm6263_vm8 = vcmp.gt.f32.partialorder %v12978_v39, 0.0  ;;  %vm6264_vm9 = vcmp.gt.f32.partialorder %v12984_v40, 0.0  ;;  %v6391_v42 = vmul.f32 0.1, %v12978_v39  ;;  %v6392_v59 = vmul.f32 0.1, %v12984_v40 }
 0x115   : > { %12993 = vmac.bf16.f32.vacc3 %v14759_v18, %v14098_v10  ;;  %13014 = vmac.bf16.f32.vacc0 %v11706_v49, %v14092_v8  ;;  %13035 = vmac.bf16.f32.vacc1 %v14664_v45, %v14261_v63  ;;  %13058 = vmac.bf16.f32.vacc2 %v14715_v62, %v14282_v33 }
 0x116   : > { %v6519_v43 = vsel %vm6263_vm8, %v12978_v39, %v6391_v42  ;;  %v6520_v44 = vsel %vm6264_vm9, %v12984_v40, %v6392_v59  ;;  %13015 = vmac.bf16.f32.vacc0 %v14777_v50, %v14098_v10  ;;  %13036 = vmac.bf16.f32.vacc1 %v14107_v13, %v11324_v32 }
 0x117   : > { %v6621_v46 = vpack.c.bf16 %v6520_v44, %v6519_v43  ;;  %v12994_v3 = vmovacc.add.low.vacc3  ;;  %13037 = vmac.bf16.f32.vacc1 %v14793_v5, %v14086_v6  ;;  %13059 = vmac.bf16.f32.vacc2 %v14738_v30, %v14250_v55 }
 0x118   : > { %v12995_v52 = vmovacc.add.high.vacc3  ;;  %v13016_v17 = vmovacc.add.low.vacc0  ;;  %13038 = vmac.bf16.f32.vacc1 %v11706_v49, %v14117_v15  ;;  %13060 = vmac.bf16.f32.vacc2 %v14808_v38, %v14261_v63 }
 0x119   : > { %11990 = vmatprep.mubr.bf16.mxu0 %v6621_v46  ;;  %v13017_v61 = vmovacc.add.high.vacc0  ;;  %13039 = vmac.bf16.f32.vacc1 %v14777_v50, %v14092_v8  ;;  %13061 = vmac.bf16.f32.vacc2 %v14725_v36, %v14107_v13  ;;  %v14846_v36 = vld [vmem:[%s14049_s27 + $0xf0] sm:$0xff]  }
 0x11a   : > { %v12996_v2 = vcombine.low %v12994_v3, %v12995_v52  ;;  %v12997_v53 = vcombine.high %v12994_v3, %v12995_v52  ;;  %13040 = vmac.bf16.f32.vacc1 %v14802_v16, %v14098_v10  ;;  %13062 = vmac.bf16.f32.vacc2 %v14817_v24, %v14086_v6  ;;  %v14859_v52 = vld [vmem:[%s14049_s27 + $0x108] sm:$0xff]  }
 0x11b   : > { %v13018_v23 = vcombine.low %v13016_v17, %v13017_v61  ;;  %v13019_v35 = vcombine.high %v13016_v17, %v13017_v61  ;;  %13063 = vmac.bf16.f32.vacc2 %v14731_v27, %v14117_v15  ;;  %13082 = vmul.bf16.f32.vacc0 %v14817_v24, %v14080_v4  ;;  %v14884_v17 = vld [vmem:[%s14049_s27 + $0x198] sm:$0xff]  }
 0x11c   : > { %v13003_v7 = vrot.slane %v12996_v2, %v14126_v26  ;;  %v13009_v60 = vrot.slane %v12997_v53, %v14126_v26  ;;  %v13041_v45 = vmovacc.add.low.vacc1  ;;  %13064 = vmac.bf16.f32.vacc2 %v14759_v18, %v14092_v8  ;;  %v14862_v2 = vld [vmem:[%s14049_s27 + $0x110] sm:$0xff]  }
 0x11d   : > { %v13025_v0 = vrot.slane %v13018_v23, %v14126_v26  ;;  %v13031_v11 = vrot.slane %v13019_v35, %v14126_v26  ;;  %v13042_v41 = vmovacc.add.high.vacc1  ;;  %13083 = vmac.bf16.f32.vacc0 %v14738_v30, %v14282_v33 }
 0x11e   : > { %vm6265_vm10 = vcmp.gt.f32.partialorder %v13003_v7, 0.0  ;;  %vm6266_vm11 = vcmp.gt.f32.partialorder %v13009_v60, 0.0  ;;  %v6393_v20 = vmul.f32 0.1, %v13003_v7  ;;  %v6394_v56 = vmul.f32 0.1, %v13009_v60 }
 0x11f   : > { %vm6291_vm12 = vcmp.gt.f32.partialorder %v13025_v0, 0.0  ;;  %vm6292_vm13 = vcmp.gt.f32.partialorder %v13031_v11, 0.0  ;;  %v6419_v54 = vmul.f32 0.1, %v13025_v0  ;;  %v6420_v12 = vmul.f32 0.1, %v13031_v11 }
 0x120   : > { %v6521_v57 = vsel %vm6265_vm10, %v13003_v7, %v6393_v20  ;;  %v6522_v14 = vsel %vm6266_vm11, %v13009_v60, %v6394_v56  ;;  %v13043_v62 = vcombine.low %v13041_v45, %v13042_v41  ;;  %v13044_v48 = vcombine.high %v13041_v45, %v13042_v41  ;;  %v14869_v60 = vld [vmem:[%s14049_s27 + $0x158] sm:$0xff]  }
 0x121   : > { %v6622_v21 = vpack.c.bf16 %v6522_v14, %v6521_v57  ;;  %v6547_v19 = vsel %vm6291_vm12, %v13025_v0, %v6419_v54  ;;  %v6548_v22 = vsel %vm6292_vm13, %v13031_v11, %v6420_v12  ;;  %13065 = vmac.bf16.f32.vacc2 %v14098_v10, %v14675_v58  ;;  %v14893_v0 = vld [vmem:[%s14049_s27 + $0x160] sm:$0xff]   ;;  %v11473_v41 = vld [vmem:[%s14049_s27 + $0xb8] sm:$0xff]  }
 0x122   : > { %v6635_v9 = vpack.c.bf16 %v6548_v22, %v6547_v19  ;;  %v13050_v47 = vrot.slane %v13043_v62, %v14126_v26  ;;  %v13056_v25 = vrot.slane %v13044_v48, %v14126_v26  ;;  %13084 = vmac.bf16.f32.vacc0 %v14808_v38, %v14250_v55 }
 0x123   : > { %11991 = vmatmul.mubr.bf16.gmra.mrb[52].mxu0 %v6622_v21  ;;  %v13066_v32 = vmovacc.add.low.vacc2  ;;  %13085 = vmac.bf16.f32.vacc0 %v14835_v34, %v14261_v63  ;;  %13107 = vmul.bf16.f32.vacc3 %v14793_v5, %v14080_v4  ;;  %13132 = vmul.bf16.f32.vacc1 %v14869_v60, %v14080_v4 }
 0x124   : > { %12018 = vmatprep.mubr.bf16.mxu1 %v6635_v9  ;;  %vm6293_vm14 = vcmp.gt.f32.partialorder %v13050_v47, 0.0  ;;  %vm6294_vm15 = vcmp.gt.f32.partialorder %v13056_v25, 0.0  ;;  %v6421_v1 = vmul.f32 0.1, %v13050_v47  ;;  %v6422_v31 = vmul.f32 0.1, %v13056_v25 }
 0x125   : > { %v13067_v42 = vmovacc.add.high.vacc2  ;;  %13086 = vmac.bf16.f32.vacc0 %v14746_v29, %v14107_v13  ;;  %13108 = vmac.bf16.f32.vacc3 %v14859_v52, %v14282_v33  ;;  %13133 = vmac.bf16.f32.vacc1 %v14862_v2, %v14282_v33 }
 0x126   : > { %v6549_v37 = vsel %vm6293_vm14, %v13050_v47, %v6421_v1  ;;  %v6550_v39 = vsel %vm6294_vm15, %v13056_v25, %v6422_v31  ;;  %13087 = vmac.bf16.f32.vacc0 %v14846_v36, %v14086_v6  ;;  %13109 = vmac.bf16.f32.vacc3 %v14862_v2, %v14250_v55 }
 0x127   : > { %v6636_v40 = vpack.c.bf16 %v6550_v39, %v6549_v37  ;;  %v13068_v59 = vcombine.low %v13066_v32, %v13067_v42  ;;  %v13069_v43 = vcombine.high %v13066_v32, %v13067_v42  ;;  %13088 = vmac.bf16.f32.vacc0 %v14759_v18, %v14117_v15  ;;  %v14939_v39 = vld [vmem:[%s14049_s27 + $0x130] sm:$0xff]   ;;  %v14944_v42 = vld [vmem:[%s14049_s27 + $0x138] sm:$0xff]  }
 0x128   : > { %13089 = vmac.bf16.f32.vacc0 %v14092_v8, %v14675_v58  ;;  %13110 = vmac.bf16.f32.vacc3 %v14731_v27, %v14261_v63  ;;  %13134 = vmac.bf16.f32.vacc1 %v14731_v27, %v14250_v55  ;;  %13157 = vmul.bf16.f32.vacc2 %v14846_v36, %v14080_v4 }
 0x129   : > { %12019 = vmatmul.mubr.bf16.gmra.mrb[4].mxu1 %v6636_v40  ;;  %v13075_v44 = vrot.slane %v13068_v59, %v14126_v26  ;;  %v13081_v46 = vrot.slane %v13069_v43, %v14126_v26  ;;  %13090 = vmac.bf16.f32.vacc0 %v14098_v10, %v14669_v51  ;;  %13111 = vmac.bf16.f32.vacc3 %v14766_v28, %v14107_v13  ;;  %v14906_v28 = vld [vmem:[%s14049_s27 + $0x1a0] sm:$0xff]  }
 0x12a   : > { %13112 = vmac.bf16.f32.vacc3 %v14869_v60, %v14086_v6  ;;  %13135 = vmac.bf16.f32.vacc1 %v14759_v18, %v14261_v63  ;;  %13158 = vmac.bf16.f32.vacc2 %v14808_v38, %v14282_v33  ;;  %v11586_v18 = vld [vmem:[%s14049_s27 + $0xf8] sm:$0xff]  }
 0x12b   : > { %vm6267_vm0 = vcmp.gt.f32.partialorder %v13075_v44, 0.0  ;;  %v6395_v30 = vmul.f32 0.1, %v13075_v44  ;;  %vm6268_vm1 = vcmp.gt.f32.partialorder %v13081_v46, 0.0  ;;  %v6396_v49 = vmul.f32 0.1, %v13081_v46 }
 0x12c   : > { %v13091_v29 = vmovacc.add.low.vacc0  ;;  %13113 = vmac.bf16.f32.vacc3 %v14777_v50, %v14117_v15  ;;  %13136 = vmac.bf16.f32.vacc1 %v14793_v5, %v14107_v13  ;;  %v14929_v5 = vld [vmem:[%s14049_s27 + $0x128] sm:$0xff]   ;;  %13159 = vmac.bf16.f32.vacc2 %v14835_v34, %v14250_v55 }
 0x12d   : > { %v6523_v3 = vsel %vm6267_vm0, %v13075_v44, %v6395_v30  ;;  %v6524_v53 = vsel %vm6268_vm1, %v13081_v46, %v6396_v49  ;;  %v13092_v20 = vmovacc.add.high.vacc0  ;;  %13114 = vmac.bf16.f32.vacc3 %v14802_v16, %v14092_v8 }
 0x12e   : > { %v6623_v7 = vpack.c.bf16 %v6524_v53, %v6523_v3  ;;  %13115 = vmac.bf16.f32.vacc3 %v14884_v17, %v14098_v10  ;;  %13137 = vmac.bf16.f32.vacc1 %v14893_v0, %v14086_v6  ;;  %13160 = vmac.bf16.f32.vacc2 %v11473_v41, %v14261_v63  ;;  %v14960_v53 = vld [vmem:[%s14049_s27 + $0x118] sm:$0xff]  }
 0x12f   : > { %v13093_v56 = vcombine.low %v13091_v29, %v13092_v20  ;;  %v13094_v57 = vcombine.high %v13091_v29, %v13092_v20  ;;  %13138 = vmac.bf16.f32.vacc1 %v14802_v16, %v14117_v15  ;;  %13161 = vmac.bf16.f32.vacc2 %v14817_v24, %v14107_v13 }
 0x130   : > { %11994 = vmatprep.mubr.bf16.mxu0 %v6623_v7  ;;  %v13116_v11 = vmovacc.add.low.vacc3  ;;  %13139 = vmac.bf16.f32.vacc1 %v14884_v17, %v14092_v8  ;;  %13162 = vmac.bf16.f32.vacc2 %v11586_v18, %v14086_v6  ;;  %13182 = vmul.bf16.f32.vacc0 %v11586_v18, %v14080_v4  ;;  %v14963_v7 = vld [vmem:[%s14049_s27 + $0x120] sm:$0xff]  }
 0x131   : > { %v13100_v14 = vrot.slane %v13093_v56, %v14126_v26  ;;  %v13106_v21 = vrot.slane %v13094_v57, %v14126_v26  ;;  %v13117_v50 = vmovacc.add.high.vacc3  ;;  %13140 = vmac.bf16.f32.vacc1 %v14906_v28, %v14098_v10 }
 0x132   : > { %13163 = vmac.bf16.f32.vacc2 %v14929_v5, %v14117_v15  ;;  %13183 = vmac.bf16.f32.vacc0 %v14835_v34, %v14282_v33 }
 0x133   : > { %vm6269_vm2 = vcmp.gt.f32.partialorder %v13100_v14, 0.0  ;;  %v6397_v58 = vmul.f32 0.1, %v13100_v14  ;;  %vm6270_vm3 = vcmp.gt.f32.partialorder %v13106_v21, 0.0  ;;  %v6398_v61 = vmul.f32 0.1, %v13106_v21 }
 0x134   : > { %v13118_v54 = vcombine.low %v13116_v11, %v13117_v50  ;;  %v13119_v12 = vcombine.high %v13116_v11, %v13117_v50  ;;  %v13141_v47 = vmovacc.add.low.vacc1  ;;  %13164 = vmac.bf16.f32.vacc2 %v14939_v39, %v14092_v8 }
 0x135   : > { %v6525_v51 = vsel %vm6269_vm2, %v13100_v14, %v6397_v58  ;;  %v6526_v23 = vsel %vm6270_vm3, %v13106_v21, %v6398_v61  ;;  %v13142_v16 = vmovacc.add.high.vacc1  ;;  %13165 = vmac.bf16.f32.vacc2 %v14944_v42, %v14098_v10 }
 0x136   : > { %v6624_v35 = vpack.c.bf16 %v6526_v23, %v6525_v51  ;;  %v13125_v19 = vrot.slane %v13118_v54, %v14126_v26  ;;  %v13131_v22 = vrot.slane %v13119_v12, %v14126_v26  ;;  %13184 = vmac.bf16.f32.vacc0 %v11473_v41, %v14250_v55  ;;  %v14983_v12 = vld [vmem:[%s14049_s27 + $0x1a8] sm:$0xff]  }
 0x137   : > { %v13143_v25 = vcombine.low %v13141_v47, %v13142_v16  ;;  %v13144_v1 = vcombine.high %v13141_v47, %v13142_v16  ;;  %v13166_v24 = vmovacc.add.low.vacc2  ;;  %13185 = vmac.bf16.f32.vacc0 %v14846_v36, %v14107_v13  ;;  %v14974_v36 = vld [vmem:[%s14049_s27 + $0x168] sm:$0xff]   ;;  %v11420_v16 = vld [vmem:[%s14049_s27 + $0xc0] sm:$0xff]  }
 0x138   : > { %11995 = vmatmul.mubr.bf16.gmra.mrb[56].mxu0 %v6624_v35  ;;  %vm6295_vm4 = vcmp.gt.f32.partialorder %v13125_v19, 0.0  ;;  %v6423_v27 = vmul.f32 0.1, %v13125_v19  ;;  %vm6296_vm5 = vcmp.gt.f32.partialorder %v13131_v22, 0.0  ;;  %v6424_v9 = vmul.f32 0.1, %v13131_v22 }
 0x139   : > { %v13150_v31 = vrot.slane %v13143_v25, %v14126_v26  ;;  %v13156_v37 = vrot.slane %v13144_v1, %v14126_v26  ;;  %v13167_v44 = vmovacc.add.high.vacc2  ;;  %13186 = vmac.bf16.f32.vacc0 %v14939_v39, %v14117_v15 }
 0x13a   : > { %v6551_v45 = vsel %vm6295_vm4, %v13125_v19, %v6423_v27  ;;  %v6552_v62 = vsel %vm6296_vm5, %v13131_v22, %v6424_v9  ;;  %13187 = vmac.bf16.f32.vacc0 %v14944_v42, %v14092_v8  ;;  %13204 = vmul.bf16.f32.vacc3 %v14893_v0, %v14080_v4  ;;  %v14996_v22 = vld [vmem:[%s14049_s27 + $0x170] sm:$0xff]  }
 0x13b   : > { %v6637_v48 = vpack.c.bf16 %v6552_v62, %v6551_v45  ;;  %vm6297_vm6 = vcmp.gt.f32.partialorder %v13150_v31, 0.0  ;;  %v6425_v38 = vmul.f32 0.1, %v13150_v31  ;;  %vm6298_vm7 = vcmp.gt.f32.partialorder %v13156_v37, 0.0  ;;  %v15011_v62 = vld [vmem:[%s14049_s27 + $0x1b0] sm:$0xff]  }
 0x13c   : > { %v6426_v40 = vmul.f32 0.1, %v13156_v37  ;;  %v13168_v46 = vcombine.low %v13166_v24, %v13167_v44  ;;  %v13169_v30 = vcombine.high %v13166_v24, %v13167_v44  ;;  %v13188_v14 = vmovacc.add.low.vacc0 }
 0x13d   : > { %12022 = vmatprep.mubr.bf16.mxu1 %v6637_v48  ;;  %v6553_v32 = vsel %vm6297_vm6, %v13150_v31, %v6425_v38  ;;  %v13189_v21 = vmovacc.add.high.vacc0  ;;  %13205 = vmac.bf16.f32.vacc3 %v14960_v53, %v14282_v33  ;;  %13229 = vmul.bf16.f32.vacc1 %v14974_v36, %v14080_v4  ;;  %v11316_v48 = vld [vmem:[%s14049_s27 + $0x100] sm:$0xff]   ;;  %v15020_v31 = vld [vmem:[%s14049_s27 + $0xc8] sm:$0xff]  }
 0x13e   : > { %v6554_v59 = vsel %vm6298_vm7, %v13156_v37, %v6426_v40  ;;  %v13175_v49 = vrot.slane %v13168_v46, %v14126_v26  ;;  %v13181_v3 = vrot.slane %v13169_v30, %v14126_v26  ;;  %13206 = vmac.bf16.f32.vacc3 %v14963_v7, %v14250_v55 }
 0x13f   : > { %v6638_v43 = vpack.c.bf16 %v6554_v59, %v6553_v32  ;;  %v13190_v58 = vcombine.low %v13188_v14, %v13189_v21  ;;  %v13191_v61 = vcombine.high %v13188_v14, %v13189_v21  ;;  %13207 = vmac.bf16.f32.vacc3 %v14929_v5, %v14261_v63 }
 0x140   : > { %vm6271_vm8 = vcmp.gt.f32.partialorder %v13175_v49, 0.0  ;;  %vm6272_vm9 = vcmp.gt.f32.partialorder %v13181_v3, 0.0  ;;  %v6399_v34 = vmul.f32 0.1, %v13175_v49  ;;  %v6400_v29 = vmul.f32 0.1, %v13181_v3 }
 0x141   : > { %12023 = vmatmul.mubr.bf16.gmra.mrb[8].mxu1 %v6638_v43  ;;  %v13197_v51 = vrot.slane %v13190_v58, %v14126_v26  ;;  %v13203_v23 = vrot.slane %v13191_v61, %v14126_v26  ;;  %13208 = vmac.bf16.f32.vacc3 %v14869_v60, %v14107_v13  ;;  %13230 = vmac.bf16.f32.vacc1 %v14963_v7, %v14282_v33 }
 0x142   : > { %v6527_v20 = vsel %vm6271_vm8, %v13175_v49, %v6399_v34  ;;  %v6528_v56 = vsel %vm6272_vm9, %v13181_v3, %v6400_v29  ;;  %13209 = vmac.bf16.f32.vacc3 %v14974_v36, %v14086_v6  ;;  %13231 = vmac.bf16.f32.vacc1 %v14929_v5, %v14250_v55  ;;  %v15043_v34 = vld [vmem:[%s14049_s27 + $0xd0] sm:$0xff]  }
 0x143   : > { %v6625_v57 = vpack.c.bf16 %v6528_v56, %v6527_v20  ;;  %vm6273_vm10 = vcmp.gt.f32.partialorder %v13197_v51, 0.0  ;;  %vm6274_vm11 = vcmp.gt.f32.partialorder %v13203_v23, 0.0  ;;  %v6401_v35 = vmul.f32 0.1, %v13197_v51 }
 0x144   : > { %v6402_v11 = vmul.f32 0.1, %v13203_v23  ;;  %13210 = vmac.bf16.f32.vacc3 %v14884_v17, %v14117_v15  ;;  %13232 = vmac.bf16.f32.vacc1 %v14939_v39, %v14261_v63  ;;  %13254 = vmul.bf16.f32.vacc0 %v11316_v48, %v14080_v4 }
 0x145   : > { %11998 = vmatprep.mubr.bf16.mxu0 %v6625_v57  ;;  %v6529_v50 = vsel %vm6273_vm10, %v13197_v51, %v6401_v35  ;;  %13211 = vmac.bf16.f32.vacc3 %v14906_v28, %v14092_v8  ;;  %13233 = vmac.bf16.f32.vacc1 %v14893_v0, %v14107_v13  ;;  %v15027_v0 = vld [vmem:[%s14049_s27 + $0x140] sm:$0xff]   ;;  %13255 = vmac.bf16.f32.vacc0 %v11420_v16, %v14250_v55 }
 0x146   : > { %v6530_v54 = vsel %vm6274_vm11, %v13203_v23, %v6402_v11  ;;  %13212 = vmac.bf16.f32.vacc3 %v14983_v12, %v14098_v10  ;;  %13234 = vmac.bf16.f32.vacc1 %v14996_v22, %v14086_v6  ;;  %13256 = vmac.bf16.f32.vacc0 %v15020_v31, %v14261_v63  ;;  %v11600_v11 = vld [vmem:[%s14049_s27 + $0x178] sm:$0xff]  }
 0x147   : > { %v6626_v19 = vpack.c.bf16 %v6530_v54, %v6529_v50  ;;  %13235 = vmac.bf16.f32.vacc1 %v14906_v28, %v14117_v15  ;;  %v15036_v28 = vld [vmem:[%s14049_s27 + $0x148] sm:$0xff]   ;;  %13257 = vmac.bf16.f32.vacc0 %v14086_v6, %v14859_v52  ;;  %13276 = vmul.bf16.f32.vacc2 %v14859_v52, %v14080_v4  ;;  %v15059_v52 = vld [vmem:[%s14049_s27 + $0x150] sm:$0xff]  }
 0x148   : > { %v13213_v60 = vmovacc.add.low.vacc3  ;;  %13236 = vmac.bf16.f32.vacc1 %v14983_v12, %v14092_v8  ;;  %13258 = vmac.bf16.f32.vacc0 %v15027_v0, %v14092_v8  ;;  %13277 = vmac.bf16.f32.vacc2 %v11420_v16, %v14282_v33 }
 0x149   : > { %11999 = vmatmul.mubr.bf16.gmra.mrb[60].mxu0 %v6626_v19  ;;  %v13214_v27 = vmovacc.add.high.vacc3  ;;  %13237 = vmac.bf16.f32.vacc1 %v15011_v62, %v14098_v10  ;;  %13259 = vmac.bf16.f32.vacc0 %v15036_v28, %v14098_v10  ;;  %13278 = vmac.bf16.f32.vacc2 %v15020_v31, %v14250_v55 }
 0x14a   : > { %13279 = vmac.bf16.f32.vacc2 %v15043_v34, %v14261_v63 }
 0x14b   : > { %v13215_v9 = vcombine.low %v13213_v60, %v13214_v27  ;;  %v13216_v45 = vcombine.high %v13213_v60, %v13214_v27  ;;  %v13238_v38 = vmovacc.add.low.vacc1  ;;  %v13260_v29 = vmovacc.add.low.vacc0 }
 0x14c   : > { %v13239_v40 = vmovacc.add.high.vacc1  ;;  %v13261_v20 = vmovacc.add.high.vacc0  ;;  %13280 = vmac.bf16.f32.vacc2 %v14107_v13, %v11316_v48  ;;  %13301 = vmul.bf16.f32.vacc3 %v14996_v22, %v14080_v4 }
 0x14d   : > { %v13222_v17 = vrot.slane %v13215_v9, %v14126_v26  ;;  %v13228_v41 = vrot.slane %v13216_v45, %v14126_v26  ;;  %13281 = vmac.bf16.f32.vacc2 %v14086_v6, %v14862_v2  ;;  %13302 = vmac.bf16.f32.vacc3 %v14929_v5, %v14282_v33  ;;  %v11764_v5 = vld [vmem:[%s14049_s27 + $0x1b8] sm:$0xff]  }
 0x14e   : > { %v13240_v32 = vcombine.low %v13238_v38, %v13239_v40  ;;  %v13241_v59 = vcombine.high %v13238_v38, %v13239_v40  ;;  %v13262_v56 = vcombine.low %v13260_v29, %v13261_v20  ;;  %v13263_v57 = vcombine.high %v13260_v29, %v13261_v20  ;;  %v15103_v38 = vld [vmem:[%s14049_s27 + $0xd8] sm:$0xff]  }
 0x14f   : > { %vm6299_vm12 = vcmp.gt.f32.partialorder %v13222_v17, 0.0  ;;  %vm6300_vm13 = vcmp.gt.f32.partialorder %v13228_v41, 0.0  ;;  %v6427_v18 = vmul.f32 0.1, %v13222_v17  ;;  %v6428_v47 = vmul.f32 0.1, %v13228_v41 }
 0x150   : > { %v13247_v43 = vrot.slane %v13240_v32, %v14126_v26  ;;  %v13253_v24 = vrot.slane %v13241_v59, %v14126_v26  ;;  %v13269_v14 = vrot.slane %v13262_v56, %v14126_v26  ;;  %v13275_v21 = vrot.slane %v13263_v57, %v14126_v26  ;;  %v11531_v32 = vld [vmem:[%s14049_s27 + $0x108] sm:$0xff]   ;;  %v15118_v29 = vld [vmem:[%s14049_s27 + $0x158] sm:$0xff]   ;;  %v15124_v56 = vld [vmem:[%s14049_s27 + $0xe0] sm:$0xff]  }
 0x151   : > { %v6555_v25 = vsel %vm6299_vm12, %v13222_v17, %v6427_v18  ;;  %v6556_v1 = vsel %vm6300_vm13, %v13228_v41, %v6428_v47  ;;  %13282 = vmac.bf16.f32.vacc2 %v15027_v0, %v14117_v15  ;;  %13303 = vmac.bf16.f32.vacc3 %v14939_v39, %v14250_v55  ;;  %v15088_v18 = vld [vmem:[%s14049_s27 + $0x110] sm:$0xff]   ;;  %v15139_v57 = vld [vmem:[%s14049_s27 + $0x160] sm:$0xff]  }
 0x152   : > { %v6639_v37 = vpack.c.bf16 %v6556_v1, %v6555_v25  ;;  %vm6301_vm14 = vcmp.gt.f32.partialorder %v13247_v43, 0.0  ;;  %vm6302_vm15 = vcmp.gt.f32.partialorder %v13253_v24, 0.0  ;;  %v6429_v44 = vmul.f32 0.1, %v13247_v43 }
 0x153   : > { %v6430_v46 = vmul.f32 0.1, %v13253_v24  ;;  %vm6275_vm0 = vcmp.gt.f32.partialorder %v13269_v14, 0.0  ;;  %v6403_v58 = vmul.f32 0.1, %v13269_v14  ;;  %vm6276_vm1 = vcmp.gt.f32.partialorder %v13275_v21, 0.0 }
 0x154   : > { %12026 = vmatprep.mubr.bf16.mxu1 %v6639_v37  ;;  %v6557_v30 = vsel %vm6301_vm14, %v13247_v43, %v6429_v44  ;;  %v6404_v61 = vmul.f32 0.1, %v13275_v21  ;;  %13283 = vmac.bf16.f32.vacc2 %v15036_v28, %v14092_v8  ;;  %13304 = vmac.bf16.f32.vacc3 %v14944_v42, %v14261_v63 }
 0x155   : > { %v6558_v49 = vsel %vm6302_vm15, %v13253_v24, %v6430_v46  ;;  %v6531_v51 = vsel %vm6275_vm0, %v13269_v14, %v6403_v58  ;;  %13284 = vmac.bf16.f32.vacc2 %v15059_v52, %v14098_v10  ;;  %13305 = vmac.bf16.f32.vacc3 %v14974_v36, %v14107_v13 }
 0x156   : > { %v6640_v3 = vpack.c.bf16 %v6558_v49, %v6557_v30  ;;  %v6532_v23 = vsel %vm6276_vm1, %v13275_v21, %v6404_v61  ;;  %13306 = vmac.bf16.f32.vacc3 %v11600_v11, %v14086_v6  ;;  %13326 = vmul.bf16.f32.vacc0 %v11600_v11, %v14080_v4 }
 0x157   : > { %v6627_v35 = vpack.c.bf16 %v6532_v23, %v6531_v51  ;;  %v13285_v2 = vmovacc.add.low.vacc2  ;;  %13307 = vmac.bf16.f32.vacc3 %v14983_v12, %v14117_v15  ;;  %13327 = vmac.bf16.f32.vacc0 %v14939_v39, %v14282_v33  ;;  %v11332_v51 = vld [vmem:[%s14049_s27 + $0x180] sm:$0xff]  }
 0x158   : > { %12027 = vmatmul.mubr.bf16.gmra.mrb[12].mxu1 %v6640_v3  ;;  %v13286_v50 = vmovacc.add.high.vacc2  ;;  %13308 = vmac.bf16.f32.vacc3 %v15011_v62, %v14092_v8  ;;  %13328 = vmac.bf16.f32.vacc0 %v14944_v42, %v14250_v55  ;;  %13348 = vmul.bf16.f32.vacc1 %v15088_v18, %v14080_v4 }
 0x159   : > { %12002 = vmatprep.mubr.bf16.mxu0 %v6627_v35  ;;  %13309 = vmac.bf16.f32.vacc3 %v11764_v5, %v14098_v10  ;;  %13329 = vmac.bf16.f32.vacc0 %v14996_v22, %v14107_v13  ;;  %13349 = vmac.bf16.f32.vacc1 %v15020_v31, %v14282_v33 }
 0x15a   : > { %v13287_v54 = vcombine.low %v13285_v2, %v13286_v50  ;;  %v13288_v19 = vcombine.high %v13285_v2, %v13286_v50  ;;  %13330 = vmac.bf16.f32.vacc0 %v15011_v62, %v14117_v15  ;;  %13350 = vmac.bf16.f32.vacc1 %v15043_v34, %v14250_v55  ;;  %v15151_v50 = vld [vmem:[%s14049_s27 + $0x188] sm:$0xff]  }
 0x15b   : > { %v13310_v36 = vmovacc.add.low.vacc3  ;;  %13331 = vmac.bf16.f32.vacc0 %v11764_v5, %v14092_v8  ;;  %13351 = vmac.bf16.f32.vacc1 %v15103_v38, %v14261_v63  ;;  %13373 = vmul.bf16.f32.vacc2 %v14960_v53, %v14080_v4 }
 0x15c   : > { %v13294_v60 = vrot.slane %v13287_v54, %v14126_v26  ;;  %v13300_v27 = vrot.slane %v13288_v19, %v14126_v26  ;;  %v13311_v47 = vmovacc.add.high.vacc3  ;;  %13352 = vmac.bf16.f32.vacc1 %v11531_v32, %v14107_v13  ;;  %v11714_v19 = vld [vmem:[%s14049_s27 + $0x1c0] sm:$0xff]  }
 0x15d   : > { %v13332_v22 = vmovacc.add.low.vacc0  ;;  %13353 = vmac.bf16.f32.vacc1 %v14086_v6, %v14960_v53  ;;  %13374 = vmac.bf16.f32.vacc2 %v15043_v34, %v14282_v33 }
 0x15e   : > { %vm6277_vm2 = vcmp.gt.f32.partialorder %v13294_v60, 0.0  ;;  %v6405_v9 = vmul.f32 0.1, %v13294_v60  ;;  %vm6278_vm3 = vcmp.gt.f32.partialorder %v13300_v27, 0.0  ;;  %v6406_v45 = vmul.f32 0.1, %v13300_v27 }
 0x15f   : > { %v13312_v16 = vcombine.low %v13310_v36, %v13311_v47  ;;  %v13313_v25 = vcombine.high %v13310_v36, %v13311_v47  ;;  %v13333_v43 = vmovacc.add.high.vacc0  ;;  %13354 = vmac.bf16.f32.vacc1 %v15036_v28, %v14117_v15 }
 0x160   : > { %v6533_v17 = vsel %vm6277_vm2, %v13294_v60, %v6405_v9  ;;  %v6534_v41 = vsel %vm6278_vm3, %v13300_v27, %v6406_v45  ;;  %13375 = vmac.bf16.f32.vacc2 %v15103_v38, %v14250_v55  ;;  %13355 = vmac.bf16.f32.vacc1 %v15059_v52, %v14092_v8  ;;  %v15162_v60 = vld [vmem:[%s14049_s27 + $0x1c8] sm:$0xff]  }
 0x161   : > { %v6628_v48 = vpack.c.bf16 %v6534_v41, %v6533_v17  ;;  %v13319_v12 = vrot.slane %v13312_v16, %v14126_v26  ;;  %v13325_v1 = vrot.slane %v13313_v25, %v14126_v26  ;;  %v13334_v24 = vcombine.low %v13332_v22, %v13333_v43 }
 0x162   : > { %v13335_v44 = vcombine.high %v13332_v22, %v13333_v43  ;;  %13356 = vmac.bf16.f32.vacc1 %v15118_v29, %v14098_v10  ;;  %13376 = vmac.bf16.f32.vacc2 %v15124_v56, %v14261_v63  ;;  %13398 = vmul.bf16.f32.vacc0 %v11332_v51, %v14080_v4 }
 0x163   : > { %12003 = vmatmul.mubr.bf16.gmra.mrb[64].mxu0 %v6628_v48  ;;  %vm6303_vm4 = vcmp.gt.f32.partialorder %v13319_v12, 0.0  ;;  %v6431_v37 = vmul.f32 0.1, %v13319_v12  ;;  %vm6304_vm5 = vcmp.gt.f32.partialorder %v13325_v1, 0.0  ;;  %v6432_v39 = vmul.f32 0.1, %v13325_v1 }
 0x164   : > { %v13341_v46 = vrot.slane %v13334_v24, %v14126_v26  ;;  %v13347_v62 = vrot.slane %v13335_v44, %v14126_v26  ;;  %v13357_v14 = vmovacc.add.low.vacc1  ;;  %13377 = vmac.bf16.f32.vacc2 %v14107_v13, %v15088_v18  ;;  %v11320_v24 = vld [vmem:[%s14049_s27 + $0x120] sm:$0xff]   ;;  %v11478_v44 = vld [vmem:[%s14049_s27 + $0xe8] sm:$0xff]  }
 0x165   : > { %v6559_v40 = vsel %vm6303_vm4, %v13319_v12, %v6431_v37  ;;  %v6560_v59 = vsel %vm6304_vm5, %v13325_v1, %v6432_v39  ;;  %v13358_v53 = vmovacc.add.high.vacc1  ;;  %13378 = vmac.bf16.f32.vacc2 %v14086_v6, %v14963_v7 }
 0x166   : > { %v6641_v42 = vpack.c.bf16 %v6560_v59, %v6559_v40  ;;  %vm6305_vm6 = vcmp.gt.f32.partialorder %v13341_v46, 0.0  ;;  %vm6306_vm7 = vcmp.gt.f32.partialorder %v13347_v62, 0.0  ;;  %v6433_v31 = vmul.f32 0.1, %v13341_v46  ;;  %v15184_v40 = vld [vmem:[%s14049_s27 + $0x190] sm:$0xff]  }
 0x167   : > { %v6434_v30 = vmul.f32 0.1, %v13347_v62  ;;  %v13359_v21 = vcombine.low %v13357_v14, %v13358_v53  ;;  %v13360_v34 = vcombine.high %v13357_v14, %v13358_v53  ;;  %13379 = vmac.bf16.f32.vacc2 %v15059_v52, %v14117_v15 }
 0x168   : > { %12030 = vmatprep.mubr.bf16.mxu1 %v6641_v42  ;;  %v6561_v49 = vsel %vm6305_vm6, %v13341_v46, %v6433_v31  ;;  %13399 = vmac.bf16.f32.vacc0 %v15027_v0, %v14250_v55  ;;  %13380 = vmac.bf16.f32.vacc2 %v15118_v29, %v14092_v8  ;;  %13420 = vmul.bf16.f32.vacc3 %v15151_v50, %v14080_v4  ;;  %v11533_v46 = vld [vmem:[%s14049_s27 + $0x118] sm:$0xff]  }
 0x169   : > { %v6562_v3 = vsel %vm6306_vm7, %v13347_v62, %v6434_v30  ;;  %v13366_v58 = vrot.slane %v13359_v21, %v14126_v26  ;;  %v13372_v61 = vrot.slane %v13360_v34, %v14126_v26  ;;  %13400 = vmac.bf16.f32.vacc0 %v15036_v28, %v14261_v63 }
 0x16a   : > { %v6642_v20 = vpack.c.bf16 %v6562_v3, %v6561_v49  ;;  %13381 = vmac.bf16.f32.vacc2 %v15139_v57, %v14098_v10  ;;  %13401 = vmac.bf16.f32.vacc0 %v15151_v50, %v14086_v6  ;;  %13421 = vmac.bf16.f32.vacc3 %v15027_v0, %v14282_v33  ;;  %v15191_v0 = vld [vmem:[%s14049_s27 + $0x1d0] sm:$0xff]  }
 0x16b   : > { %vm6279_vm8 = vcmp.gt.f32.partialorder %v13366_v58, 0.0  ;;  %vm6280_vm9 = vcmp.gt.f32.partialorder %v13372_v61, 0.0  ;;  %v6407_v23 = vmul.f32 0.1, %v13366_v58  ;;  %v6408_v35 = vmul.f32 0.1, %v13372_v61 }
 0x16c   : > { %12031 = vmatmul.mubr.bf16.gmra.mrb[16].mxu1 %v6642_v20  ;;  %v13382_v7 = vmovacc.add.low.vacc2  ;;  %13402 = vmac.bf16.f32.vacc0 %v11714_v19, %v14092_v8  ;;  %13422 = vmac.bf16.f32.vacc3 %v15036_v28, %v14250_v55  ;;  %v11591_v28 = vld [vmem:[%s14049_s27 + $0x128] sm:$0xff]  }
 0x16d   : > { %v6535_v11 = vsel %vm6279_vm8, %v13366_v58, %v6407_v23  ;;  %v6536_v2 = vsel %vm6280_vm9, %v13372_v61, %v6408_v35  ;;  %v13383_v27 = vmovacc.add.high.vacc2  ;;  %13403 = vmac.bf16.f32.vacc0 %v15162_v60, %v14098_v10  ;;  %v15215_v20 = vld [vmem:[%s14049_s27 + $0x168] sm:$0xff]   ;;  %v11479_v58 = vld [vmem:[%s14049_s27 + $0xf0] sm:$0xff]  }
 0x16e   : > { %v6629_v54 = vpack.c.bf16 %v6536_v2, %v6535_v11  ;;  %13423 = vmac.bf16.f32.vacc3 %v15059_v52, %v14261_v63  ;;  %13470 = vmul.bf16.f32.vacc1 %v11591_v28, %v14080_v4 }
 0x16f   : > { %v13384_v5 = vcombine.low %v13382_v7, %v13383_v27  ;;  %v13385_v9 = vcombine.high %v13382_v7, %v13383_v27  ;;  %v13404_v16 = vmovacc.add.low.vacc0  ;;  %13424 = vmac.bf16.f32.vacc3 %v14107_v13, %v11332_v51  ;;  %v15234_v7 = vld [vmem:[%s14049_s27 + $0x170] sm:$0xff]  }
 0x170   : > { %12006 = vmatprep.mubr.bf16.mxu0 %v6629_v54  ;;  %v13405_v25 = vmovacc.add.high.vacc0  ;;  %13425 = vmac.bf16.f32.vacc3 %v15184_v40, %v14086_v6  ;;  %13471 = vmac.bf16.f32.vacc1 %v15124_v56, %v14282_v33  ;;  %v11592_v54 = vld [vmem:[%s14049_s27 + $0x130] sm:$0xff]   ;;  %13495 = vmul.bf16.f32.vacc2 %v15184_v40, %v14080_v4 }
 0x171   : > { %v13391_v45 = vrot.slane %v13384_v5, %v14126_v26  ;;  %v13397_v17 = vrot.slane %v13385_v9, %v14126_v26  ;;  %13426 = vmac.bf16.f32.vacc3 %v11714_v19, %v14117_v15  ;;  %13472 = vmac.bf16.f32.vacc1 %v11478_v44, %v14250_v55 }
 0x172   : > { %v13406_v12 = vcombine.low %v13404_v16, %v13405_v25  ;;  %v13407_v1 = vcombine.high %v13404_v16, %v13405_v25  ;;  %13445 = vmul.bf16.f32.vacc0 %v11320_v24, %v14080_v4  ;;  %13427 = vmac.bf16.f32.vacc3 %v15162_v60, %v14092_v8 }
 0x173   : > { %vm6281_vm10 = vcmp.gt.f32.partialorder %v13391_v45, 0.0  ;;  %vm6282_vm11 = vcmp.gt.f32.partialorder %v13397_v17, 0.0  ;;  %v6409_v41 = vmul.f32 0.1, %v13391_v45  ;;  %v6410_v48 = vmul.f32 0.1, %v13397_v17 }
 0x174   : > { %v13413_v37 = vrot.slane %v13406_v12, %v14126_v26  ;;  %v13419_v39 = vrot.slane %v13407_v1, %v14126_v26  ;;  %13446 = vmac.bf16.f32.vacc0 %v15103_v38, %v14282_v33  ;;  %13428 = vmac.bf16.f32.vacc3 %v15191_v0, %v14098_v10  ;;  %v15254_v12 = vpop.f32.mrb[0].mxu0 }
 0x175   : > { %v6537_v18 = vsel %vm6281_vm10, %v13391_v45, %v6409_v41  ;;  %v6538_v36 = vsel %vm6282_vm11, %v13397_v17, %v6410_v48  ;;  %13447 = vmac.bf16.f32.vacc0 %v15124_v56, %v14250_v55  ;;  %13473 = vmac.bf16.f32.vacc1 %v11479_v58, %v14261_v63  ;;  %v11383_v45 = vld [vmem:[%s14049_s27 + $0x148] sm:$0xff]   ;;  %v11438_v17 = vld [vmem:[%s14049_s27 + $0x150] sm:$0xff]   ;;  %v15243_v41 = vld [vmem:[%s14049_s27 + $0x198] sm:$0xff]   ;;  %17582 = vst [vmem:[#allocation25_spill] sm:$0xff] %v15254_v12  ;;  %v15257_v1 = vpop.f32.mrb[1].mxu0 }
 0x176   : > { %v6630_v47 = vpack.c.bf16 %v6538_v36, %v6537_v18  ;;  %vm6307_vm12 = vcmp.gt.f32.partialorder %v13413_v37, 0.0  ;;  %vm6308_vm13 = vcmp.gt.f32.partialorder %v13419_v39, 0.0  ;;  %v6435_v32 = vmul.f32 0.1, %v13413_v37  ;;  %17583 = vst [vmem:[#allocation26_spill] sm:$0xff] %v15257_v1  ;;  %v15309_v58 = vld [vmem:[%s14049_s27 + $0x1e0] sm:$0xff]  }
 0x177   : > { %v6436_v59 = vmul.f32 0.1, %v13419_v39  ;;  %v13429_v52 = vmovacc.add.low.vacc3  ;;  %13448 = vmac.bf16.f32.vacc0 %v11478_v44, %v14261_v63  ;;  %13474 = vmac.bf16.f32.vacc1 %v14107_v13, %v11320_v24 }
 0x178   : > { %12007 = vmatmul.mubr.bf16.gmra.mrb[68].mxu0 %v6630_v47  ;;  %v6563_v42 = vsel %vm6307_vm12, %v13413_v37, %v6435_v32  ;;  %v13430_v62 = vmovacc.add.high.vacc3  ;;  %13449 = vmac.bf16.f32.vacc0 %v11533_v46, %v14107_v13  ;;  %13475 = vmac.bf16.f32.vacc1 %v11592_v54, %v14086_v6  ;;  %v15262_v32 = vpop.f32.mrb[2].mxu0 }
 0x179   : > { %v6564_v22 = vsel %vm6308_vm13, %v13419_v39, %v6436_v59  ;;  %13450 = vmac.bf16.f32.vacc0 %v11591_v28, %v14086_v6  ;;  %13476 = vmac.bf16.f32.vacc1 %v15139_v57, %v14117_v15  ;;  %13496 = vmac.bf16.f32.vacc2 %v11383_v45, %v14282_v33  ;;  %v15260_v39 = vld [vmem:[%s14049_s27 + $0x1d8] sm:$0xff]   ;;  %17584 = vst [vmem:[#allocation27_spill] sm:$0xff] %v15262_v32 }
 0x17a   : > { %v6643_v43 = vpack.c.bf16 %v6564_v22, %v6563_v42  ;;  %v13431_v31 = vcombine.low %v13429_v52, %v13430_v62  ;;  %v13432_v30 = vcombine.high %v13429_v52, %v13430_v62  ;;  %13451 = vmac.bf16.f32.vacc0 %v15118_v29, %v14117_v15  ;;  %v15266_v42 = vpop.f32.mrb[3].mxu0  ;;  %v15281_v62 = vld [vmem:[%s14049_s27 + $0x1a0] sm:$0xff]  }
 0x17b   : > { %13452 = vmac.bf16.f32.vacc0 %v15139_v57, %v14092_v8  ;;  %13477 = vmac.bf16.f32.vacc1 %v15215_v20, %v14092_v8  ;;  %13497 = vmac.bf16.f32.vacc2 %v11438_v17, %v14250_v55  ;;  %17585 = vst [vmem:[#allocation28_spill] sm:$0xff] %v15266_v42  ;;  %13520 = vmul.bf16.f32.vacc3 %v15243_v41, %v14080_v4 }
 0x17c   : > { %12034 = vmatprep.mubr.bf16.mxu1 %v6643_v43  ;;  %v13438_v49 = vrot.slane %v13431_v31, %v14126_v26  ;;  %v13444_v3 = vrot.slane %v13432_v30, %v14126_v26  ;;  %13453 = vmac.bf16.f32.vacc0 %v15215_v20, %v14098_v10  ;;  %13478 = vmac.bf16.f32.vacc1 %v15234_v7, %v14098_v10  ;;  %v15268_v43 = vpop.f32.mrb[4].mxu0 }
 0x17d   : > { %13498 = vmac.bf16.f32.vacc2 %v15118_v29, %v14261_v63  ;;  %17586 = vst [vmem:[#allocation29_spill] sm:$0xff] %v15268_v43  ;;  %v15272_v44 = vpop.f32.mrb[5].mxu0  ;;  %13521 = vmac.bf16.f32.vacc3 %v11438_v17, %v14282_v33 }
 0x17e   : > { %vm6309_vm14 = vcmp.gt.f32.partialorder %v13438_v49, 0.0  ;;  %v6437_v38 = vmul.f32 0.1, %v13438_v49  ;;  %vm6310_vm15 = vcmp.gt.f32.partialorder %v13444_v3, 0.0  ;;  %v6438_v14 = vmul.f32 0.1, %v13444_v3 }
 0x17f   : > { %v13454_v61 = vmovacc.add.low.vacc0  ;;  %v13479_v48 = vmovacc.add.low.vacc1  ;;  %13499 = vmac.bf16.f32.vacc2 %v15151_v50, %v14107_v13  ;;  %17587 = vst [vmem:[#allocation30_spill] sm:$0xff] %v15272_v44  ;;  %v15274_v28 = vpop.f32.mrb[6].mxu0  ;;  %13522 = vmac.bf16.f32.vacc3 %v15118_v29, %v14250_v55 }
 0x180   : > { %v6565_v53 = vsel %vm6309_vm14, %v13438_v49, %v6437_v38  ;;  %v6566_v21 = vsel %vm6310_vm15, %v13444_v3, %v6438_v14  ;;  %v13455_v51 = vmovacc.add.high.vacc0  ;;  %v13480_v18 = vmovacc.add.high.vacc1  ;;  %17588 = vst [vmem:[#allocation31_spill] sm:$0xff] %v15274_v28  ;;  %v15278_v52 = vpop.f32.mrb[7].mxu0 }
 0x181   : > { %v6644_v34 = vpack.c.bf16 %v6566_v21, %v6565_v53  ;;  %13500 = vmac.bf16.f32.vacc2 %v15243_v41, %v14086_v6  ;;  %17589 = vst [vmem:[#allocation32_spill] sm:$0xff] %v15278_v52  ;;  %v15283_v31 = vpop.f32.mrb[8].mxu0  ;;  %13523 = vmac.bf16.f32.vacc3 %v15139_v57, %v14261_v63 }
 0x182   : > { %v13456_v23 = vcombine.low %v13454_v61, %v13455_v51  ;;  %v13457_v35 = vcombine.high %v13454_v61, %v13455_v51  ;;  %v13481_v36 = vcombine.low %v13479_v48, %v13480_v18  ;;  %v13482_v47 = vcombine.high %v13479_v48, %v13480_v18  ;;  %17590 = vst [vmem:[#allocation33_spill] sm:$0xff] %v15283_v31  ;;  %v15290_v50 = vpop.f32.mrb[9].mxu0 }
 0x183   : > { %12035 = vmatmul.mubr.bf16.gmra.mrb[20].mxu1 %v6644_v34  ;;  %13501 = vmac.bf16.f32.vacc2 %v15162_v60, %v14117_v15  ;;  %17591 = vst [vmem:[#allocation34_spill] sm:$0xff] %v15290_v50  ;;  %v15292_v30 = vpop.f32.mrb[10].mxu0  ;;  %13524 = vmac.bf16.f32.vacc3 %v15184_v40, %v14107_v13  ;;  %13545 = vmul.bf16.f32.vacc0 %v15281_v62, %v14080_v4 }
 0x184   : > { %v13463_v11 = vrot.slane %v13456_v23, %v14126_v26  ;;  %v13469_v2 = vrot.slane %v13457_v35, %v14126_v26  ;;  %v13488_v16 = vrot.slane %v13481_v36, %v14126_v26  ;;  %v13494_v25 = vrot.slane %v13482_v47, %v14126_v26  ;;  %17592 = vst [vmem:[#allocation35_spill] sm:$0xff] %v15292_v30  ;;  %v15298_v49 = vpop.f32.mrb[11].mxu0 }
 0x185   : > { %13502 = vmac.bf16.f32.vacc2 %v15191_v0, %v14092_v8  ;;  %17593 = vst [vmem:[#allocation36_spill] sm:$0xff] %v15298_v49  ;;  %v15300_v3 = vpop.f32.mrb[12].mxu0  ;;  %13525 = vmac.bf16.f32.vacc3 %v15281_v62, %v14086_v6  ;;  %13546 = vmac.bf16.f32.vacc0 %v15118_v29, %v14282_v33 }
 0x186   : > { %vm6283_vm0 = vcmp.gt.f32.partialorder %v13463_v11, 0.0  ;;  %vm6284_vm1 = vcmp.gt.f32.partialorder %v13469_v2, 0.0  ;;  %v6411_v56 = vmul.f32 0.1, %v13463_v11  ;;  %v6412_v19 = vmul.f32 0.1, %v13469_v2 }
 0x187   : > { %vm6285_vm2 = vcmp.gt.f32.partialorder %v13488_v16, 0.0  ;;  %v6413_v37 = vmul.f32 0.1, %v13488_v16  ;;  %vm6286_vm3 = vcmp.gt.f32.partialorder %v13494_v25, 0.0  ;;  %v6414_v59 = vmul.f32 0.1, %v13494_v25 }
 0x188   : > { %v6539_v27 = vsel %vm6283_vm0, %v13463_v11, %v6411_v56  ;;  %v6540_v5 = vsel %vm6284_vm1, %v13469_v2, %v6412_v19  ;;  %17594 = vst [vmem:[#allocation37_spill] sm:$0xff] %v15300_v3  ;;  %13503 = vmac.bf16.f32.vacc2 %v15260_v39, %v14098_v10  ;;  %v15311_v61 = vpop.f32.mrb[13].mxu0  ;;  %13526 = vmac.bf16.f32.vacc3 %v15191_v0, %v14117_v15 }
 0x189   : > { %v6631_v9 = vpack.c.bf16 %v6540_v5, %v6539_v27  ;;  %v6541_v22 = vsel %vm6285_vm2, %v13488_v16, %v6413_v37  ;;  %v6542_v24 = vsel %vm6286_vm3, %v13494_v25, %v6414_v59  ;;  %17595 = vst [vmem:[#allocation38_spill] sm:$0xff] %v15311_v61  ;;  %v15313_v51 = vpop.f32.mrb[14].mxu0  ;;  %v15326_v5 = vld [vmem:[%s14049_s27 + $0x1a8] sm:$0xff]   ;;  %13527 = vmac.bf16.f32.vacc3 %v15260_v39, %v14092_v8 }
 0x18a   : > { %v6632_v46 = vpack.c.bf16 %v6542_v24, %v6541_v22  ;;  %v13504_v60 = vmovacc.add.low.vacc2  ;;  %17596 = vst [vmem:[#allocation39_spill] sm:$0xff] %v15313_v51  ;;  %v15317_v11 = vpop.f32.mrb[15].mxu0  ;;  %13547 = vmac.bf16.f32.vacc0 %v15139_v57, %v14250_v55  ;;  %13528 = vmac.bf16.f32.vacc3 %v15309_v58, %v14098_v10  ;;  %v15353_v25 = vld [vmem:[%s14049_s27 + $0x1e8] sm:$0xff]  }
 0x18b   : > { %12010 = vmatprep.mubr.bf16.mxu0 %v6631_v9  ;;  %v13505_v38 = vmovacc.add.high.vacc2  ;;  %17597 = vst [vmem:[#allocation40_spill] sm:$0xff] %v15317_v11  ;;  %v15319_v56 = vpop.f32.mrb[16].mxu0  ;;  %13548 = vmac.bf16.f32.vacc0 %v15215_v20, %v14261_v63  ;;  %13570 = vmul.bf16.f32.vacc1 %v15326_v5, %v14080_v4 }
 0x18c   : > { %12011 = vmatmul.mubr.bf16.gmra.mrb[72].mxu0 %v6632_v46  ;;  %17598 = vst [vmem:[#allocation41_spill] sm:$0xff] %v15319_v56  ;;  %v15323_v27 = vpop.f32.mrb[17].mxu0  ;;  %v13529_v48 = vmovacc.add.low.vacc3  ;;  %13549 = vmac.bf16.f32.vacc0 %v15243_v41, %v14107_v13  ;;  %13571 = vmac.bf16.f32.vacc1 %v15139_v57, %v14282_v33 }
 0x18d   : > { %v13506_v14 = vcombine.low %v13504_v60, %v13505_v38  ;;  %v13507_v53 = vcombine.high %v13504_v60, %v13505_v38  ;;  %17599 = vst [vmem:[#allocation42_spill] sm:$0xff] %v15323_v27  ;;  %v15328_v9 = vpop.f32.mrb[18].mxu0  ;;  %v13530_v18 = vmovacc.add.high.vacc3  ;;  %13550 = vmac.bf16.f32.vacc0 %v15326_v5, %v14086_v6 }
 0x18e   : > { %17600 = vst [vmem:[#allocation43_spill] sm:$0xff] %v15328_v9  ;;  %v15332_v40 = vpop.f32.mrb[19].mxu0  ;;  %13551 = vmac.bf16.f32.vacc0 %v15260_v39, %v14117_v15  ;;  %13572 = vmac.bf16.f32.vacc1 %v15215_v20, %v14250_v55 }
 0x18f   : > { %v13513_v21 = vrot.slane %v13506_v14, %v14126_v26  ;;  %v13519_v34 = vrot.slane %v13507_v53, %v14126_v26  ;;  %17601 = vst [vmem:[#allocation44_spill] sm:$0xff] %v15332_v40  ;;  %v15338_v45 = vpop.f32.mrb[20].mxu0  ;;  %v13531_v36 = vcombine.low %v13529_v48, %v13530_v18  ;;  %v13532_v47 = vcombine.high %v13529_v48, %v13530_v18 }
 0x190   : > { %17602 = vst [vmem:[#allocation45_spill] sm:$0xff] %v15338_v45  ;;  %v15342_v17 = vpop.f32.mrb[21].mxu0  ;;  %13552 = vmac.bf16.f32.vacc0 %v15309_v58, %v14092_v8  ;;  %13573 = vmac.bf16.f32.vacc1 %v15234_v7, %v14261_v63 }
 0x191   : > { %vm6311_vm4 = vcmp.gt.f32.partialorder %v13513_v21, 0.0  ;;  %vm6312_vm5 = vcmp.gt.f32.partialorder %v13519_v34, 0.0  ;;  %v6439_v23 = vmul.f32 0.1, %v13513_v21  ;;  %v6440_v35 = vmul.f32 0.1, %v13519_v34 }
 0x192   : > { %17603 = vst [vmem:[#allocation46_spill] sm:$0xff] %v15342_v17  ;;  %v15346_v0 = vpop.f32.mrb[22].mxu0  ;;  %v13538_v29 = vrot.slane %v13531_v36, %v14126_v26  ;;  %v13544_v16 = vrot.slane %v13532_v47, %v14126_v26  ;;  %13553 = vmac.bf16.f32.vacc0 %v15353_v25, %v14098_v10  ;;  %13574 = vmac.bf16.f32.vacc1 %v15281_v62, %v14107_v13 }
 0x193   : > { %v6567_v2 = vsel %vm6311_vm4, %v13513_v21, %v6439_v23  ;;  %v6568_v54 = vsel %vm6312_vm5, %v13519_v34, %v6440_v35  ;;  %17604 = vst [vmem:[#allocation47_spill] sm:$0xff] %v15346_v0  ;;  %v15355_v37 = vpop.f32.mrb[23].mxu0  ;;  %v15376_v23 = vld [vmem:[%s14049_s27 + $0x1b0] sm:$0xff]  }
 0x194   : > { %v6645_v19 = vpack.c.bf16 %v6568_v54, %v6567_v2  ;;  %17605 = vst [vmem:[#allocation48_spill] sm:$0xff] %v15355_v37  ;;  %vm6313_vm6 = vcmp.gt.f32.partialorder %v13538_v29, 0.0  ;;  %vm6314_vm7 = vcmp.gt.f32.partialorder %v13544_v16, 0.0  ;;  %v6441_v22 = vmul.f32 0.1, %v13538_v29 }
 0x195   : > { %v6442_v24 = vmul.f32 0.1, %v13544_v16  ;;  %v13554_v48 = vmovacc.add.low.vacc0  ;;  %13575 = vmac.bf16.f32.vacc1 %v15376_v23, %v14086_v6  ;;  %13595 = vmul.bf16.f32.vacc2 %v15376_v23, %v14080_v4 }
 0x196   : > { %12038 = vmatprep.mubr.bf16.mxu1 %v6645_v19  ;;  %v6569_v60 = vsel %vm6313_vm6, %v13538_v29, %v6441_v22  ;;  %v13555_v18 = vmovacc.add.high.vacc0  ;;  %13576 = vmac.bf16.f32.vacc1 %v15309_v58, %v14117_v15  ;;  %13596 = vmac.bf16.f32.vacc2 %v15215_v20, %v14282_v33 }
 0x197   : > { %v6570_v38 = vsel %vm6314_vm7, %v13544_v16, %v6442_v24  ;;  %v15405_v24 = vld [vmem:[%s14049_s27 + $0x1f0] sm:$0xff]   ;;  %13577 = vmac.bf16.f32.vacc1 %v15353_v25, %v14092_v8  ;;  %13597 = vmac.bf16.f32.vacc2 %v15234_v7, %v14250_v55 }
 0x198   : > { %v6646_v53 = vpack.c.bf16 %v6570_v38, %v6569_v60  ;;  %v13556_v36 = vcombine.low %v13554_v48, %v13555_v18  ;;  %v13557_v57 = vcombine.high %v13554_v48, %v13555_v18  ;;  %13578 = vmac.bf16.f32.vacc1 %v15405_v24, %v14098_v10 }
 0x19a   : > { %12039 = vmatmul.mubr.bf16.gmra.mrb[24].mxu1 %v6646_v53  ;;  %v13563_v47 = vrot.slane %v13556_v36, %v14126_v26  ;;  %v13569_v29 = vrot.slane %v13557_v57, %v14126_v26  ;;  %v13579_v20 = vmovacc.add.low.vacc1 }
 0x19c   : > { %v15359_v59 = vpop.f32.mrb[24].mxu0  ;;  %vm6315_vm8 = vcmp.gt.f32.partialorder %v13563_v47, 0.0  ;;  %vm6316_vm9 = vcmp.gt.f32.partialorder %v13569_v29, 0.0  ;;  %v6443_v53 = vmul.f32 0.1, %v13563_v47 }
 0x19d   : > { %17606 = vst [vmem:[#allocation49_spill] sm:$0xff] %v15359_v59  ;;  %v15363_v46 = vpop.f32.mrb[25].mxu0  ;;  %v6444_v48 = vmul.f32 0.1, %v13569_v29 }
 0x19e   : > { %17607 = vst [vmem:[#allocation50_spill] sm:$0xff] %v15363_v46  ;;  %v15365_v14 = vpop.f32.mrb[26].mxu0  ;;  %v6571_v57 = vsel %vm6315_vm8, %v13563_v47, %v6443_v53 }
 0x19f   : > { %17608 = vst [vmem:[#allocation51_spill] sm:$0xff] %v15365_v14  ;;  %v15369_v21 = vpop.f32.mrb[27].mxu0 }
 0x1a0   : > { %17609 = vst [vmem:[#allocation52_spill] sm:$0xff] %v15369_v21 }
 0x1a5   : > { %v15371_v34 = vpop.f32.mrb[28].mxu0 }
 0x1a6   : > { %17610 = vst [vmem:[#allocation53_spill] sm:$0xff] %v15371_v34  ;;  %v15378_v35 = vpop.f32.mrb[29].mxu0 }
 0x1a7   : > { %17611 = vst [vmem:[#allocation54_spill] sm:$0xff] %v15378_v35  ;;  %v15384_v2 = vpop.f32.mrb[30].mxu0 }
 0x1a8   : > { %17612 = vst [vmem:[#allocation55_spill] sm:$0xff] %v15384_v2  ;;  %v15388_v54 = vpop.f32.mrb[31].mxu0 }
 0x1a9   : > { %17613 = vst [vmem:[#allocation56_spill] sm:$0xff] %v15388_v54 }
 0x1b4   : > { %v15392_v19 = vpop.f32.mrb[32].mxu0 }
 0x1b5   : > { %17614 = vst [vmem:[#allocation57_spill] sm:$0xff] %v15392_v19  ;;  %v15398_v16 = vpop.f32.mrb[33].mxu0 }
 0x1b6   : > { %17615 = vst [vmem:[#allocation58_spill] sm:$0xff] %v15398_v16  ;;  %v15407_v60 = vpop.f32.mrb[34].mxu0 }
 0x1b7   : > { %17617 = vst [vmem:[#allocation60_spill] sm:$0xff] %v15407_v60  ;;  %v15413_v18 = vpop.f32.mrb[35].mxu0 }
 0x1b8   : > { %17619 = vst [vmem:[#allocation62_spill] sm:$0xff] %v15413_v18 }
 0x1bd   : > { %v15417_v19 = vpop.f32.mrb[36].mxu0 }
 0x1be   : > { %17621 = vst [vmem:[#allocation64_spill] sm:$0xff] %v15417_v19  ;;  %v15424_v16 = vpop.f32.mrb[37].mxu0 }
 0x1bf   : > { %17623 = vst [vmem:[#allocation66_spill] sm:$0xff] %v15424_v16  ;;  %v15428_v34 = vpop.f32.mrb[38].mxu0 }
 0x1c0   : > { %17625 = vst [vmem:[#allocation68_spill] sm:$0xff] %v15428_v34  ;;  %v15434_v47 = vpop.f32.mrb[39].mxu0 }
 0x1c1   : > { %17627 = vst [vmem:[#allocation70_spill] sm:$0xff] %v15434_v47 }
 0x1c7   : > { %v15445_v53 = vpop.f32.mrb[40].mxu0 }
 0x1c8   : > { %17629 = vst [vmem:[#allocation72_spill] sm:$0xff] %v15445_v53  ;;  %v15465_v53 = vld [vmem:[%s14049_s27 + $0x1f8] sm:$0xff]  }
 0x1e6   : > { %v15400_v22 = vpop.f32.mrb[0].mxu1 }
 0x1e7   : > { %17616 = vst [vmem:[#allocation59_spill] sm:$0xff] %v15400_v22  ;;  %v15409_v38 = vpop.f32.mrb[1].mxu1  ;;  %v6572_v22 = vsel %vm6316_vm9, %v13569_v29, %v6444_v48 }
 0x1e8   : > { %17618 = vst [vmem:[#allocation61_spill] sm:$0xff] %v15409_v38  ;;  %v15415_v36 = vpop.f32.mrb[2].mxu1  ;;  %v6647_v60 = vpack.c.bf16 %v6572_v22, %v6571_v57  ;;  %v11494_v38 = vld [vmem:[%s14049_s27 + $0x178] sm:$0xff]  }
 0x1e9   : > { %17620 = vst [vmem:[#allocation63_spill] sm:$0xff] %v15415_v36  ;;  %v15419_v2 = vpop.f32.mrb[3].mxu1  ;;  %v15443_v22 = vld [vmem:[%s14049_s27 + $0x1b8] sm:$0xff]   ;;  %13598 = vmac.bf16.f32.vacc2 %v11494_v38, %v14261_v63 }
 0x1ea   : > { %17622 = vst [vmem:[#allocation65_spill] sm:$0xff] %v15419_v2  ;;  %12042 = vmatprep.mubr.bf16.mxu1 %v6647_v60  ;;  %v15451_v60 = vpop.f32.mrb[41].mxu0  ;;  %13599 = vmac.bf16.f32.vacc2 %v15326_v5, %v14107_v13  ;;  %13620 = vmul.bf16.f32.vacc3 %v15443_v22, %v14080_v4 }
 0x1eb   : > { %17631 = vst [vmem:[#allocation74_spill] sm:$0xff] %v15451_v60  ;;  %v15455_v57 = vpop.f32.mrb[42].mxu0  ;;  %13600 = vmac.bf16.f32.vacc2 %v15443_v22, %v14086_v6  ;;  %13621 = vmac.bf16.f32.vacc3 %v15234_v7, %v14282_v33 }
 0x1ec   : > { %17632 = vst [vmem:[#allocation75_spill] sm:$0xff] %v15455_v57  ;;  %v15461_v2 = vpop.f32.mrb[43].mxu0  ;;  %13601 = vmac.bf16.f32.vacc2 %v15353_v25, %v14117_v15  ;;  %13622 = vmac.bf16.f32.vacc3 %v11494_v38, %v14250_v55 }
 0x1ed   : > { %17633 = vst [vmem:[#allocation76_spill] sm:$0xff] %v15461_v2  ;;  %v15467_v34 = vpop.f32.mrb[44].mxu0  ;;  %13602 = vmac.bf16.f32.vacc2 %v15405_v24, %v14092_v8  ;;  %13623 = vmac.bf16.f32.vacc3 %v15376_v23, %v14107_v13 }
 0x1ee   : > { %17634 = vst [vmem:[#allocation77_spill] sm:$0xff] %v15467_v34  ;;  %13603 = vmac.bf16.f32.vacc2 %v15465_v53, %v14098_v10  ;;  %v11495_v10 = vld [vmem:[%s14049_s27 + $0x188] sm:$0xff]   ;;  %13624 = vmac.bf16.f32.vacc3 %v15405_v24, %v14117_v15 }
 0x1ef   : > { %13625 = vmac.bf16.f32.vacc3 %v15465_v53, %v14092_v8 }
 0x1f0   : > { %v13605_v7 = vmovacc.add.high.vacc2 }
 0x1fc   : > { %v15426_v54 = vpop.f32.mrb[4].mxu1 }
 0x1fd   : > { %17624 = vst [vmem:[#allocation67_spill] sm:$0xff] %v15426_v54  ;;  %v15430_v18 = vpop.f32.mrb[5].mxu1 }
 0x1fe   : > { %17626 = vst [vmem:[#allocation69_spill] sm:$0xff] %v15430_v18  ;;  %v15436_v29 = vpop.f32.mrb[6].mxu1 }
 0x1ff   : > { %17628 = vst [vmem:[#allocation71_spill] sm:$0xff] %v15436_v29  ;;  %v15447_v48 = vpop.f32.mrb[7].mxu1  ;;  %v13580_v29 = vmovacc.add.high.vacc1 }
 0x200   : > { %17630 = vst [vmem:[#allocation73_spill] sm:$0xff] %v15447_v48 }
 0x201   : > { %v13581_v54 = vcombine.low %v13579_v20, %v13580_v29  ;;  %v13582_v36 = vcombine.high %v13579_v20, %v13580_v29  ;;  %v15471_v29 = vpop.f32.mrb[45].mxu0 }
 0x202   : > { %17635 = vst [vmem:[#allocation78_spill] sm:$0xff] %v15471_v29  ;;  %v15473_v20 = vpop.f32.mrb[46].mxu0 }
 0x203   : > { %v13588_v18 = vrot.slane %v13581_v54, %v14126_v26  ;;  %v13594_v48 = vrot.slane %v13582_v36, %v14126_v26  ;;  %17636 = vst [vmem:[#allocation79_spill] sm:$0xff] %v15473_v20  ;;  %v15477_v47 = vpop.f32.mrb[47].mxu0  ;;  %v11444_v20 = vld [vmem:[%s14049_s27 + $0x180] sm:$0xff]  }
 0x204   : > { %17637 = vst [vmem:[#allocation80_spill] sm:$0xff] %v15477_v47  ;;  %v15479_v34 = vpop.f32.mrb[48].mxu0  ;;  %v13627_v47 = vmovacc.add.high.vacc3 }
 0x205   : > { %vm6317_vm10 = vcmp.gt.f32.partialorder %v13588_v18, 0.0  ;;  %vm6318_vm11 = vcmp.gt.f32.partialorder %v13594_v48, 0.0  ;;  %v6445_v57 = vmul.f32 0.1, %v13588_v18  ;;  %v6446_v60 = vmul.f32 0.1, %v13594_v48 }
 0x206   : > { %17638 = vst [vmem:[#allocation81_spill] sm:$0xff] %v15479_v34  ;;  %v15483_v19 = vpop.f32.mrb[49].mxu0 }
 0x207   : > { %v6573_v54 = vsel %vm6317_vm10, %v13588_v18, %v6445_v57  ;;  %v6574_v36 = vsel %vm6318_vm11, %v13594_v48, %v6446_v60  ;;  %17639 = vst [vmem:[#allocation82_spill] sm:$0xff] %v15483_v19  ;;  %v15489_v18 = vpop.f32.mrb[50].mxu0  ;;  %v15494_v48 = vld [vmem:[%s14049_s27 + $0x1c0] sm:$0xff]   ;;  %v13604_v57 = vmovacc.add.low.vacc2 }
 0x208   : > { %v6648_v2 = vpack.c.bf16 %v6574_v36, %v6573_v54  ;;  %17640 = vst [vmem:[#allocation83_spill] sm:$0xff] %v15489_v18  ;;  %13642 = vmul.bf16.f32.vacc0 %v15494_v48, %v14080_v4 }
 0x209   : > { %v13606_v54 = vcombine.low %v13604_v57, %v13605_v7  ;;  %v13607_v36 = vcombine.high %v13604_v57, %v13605_v7  ;;  %v15518_v57 = vld [vmem:[%s14049_s27 + $0x1c8] sm:$0xff]   ;;  %13643 = vmac.bf16.f32.vacc0 %v11444_v20, %v14250_v55  ;;  %13728 = vmul.bf16.f32.vacc2 %v15309_v58, %v14080_v4 }
 0x20a   : > { %12043 = vmatmul.mubr.bf16.gmra.mrb[28].mxu1 %v6648_v2  ;;  %v15496_v2 = vpop.f32.mrb[51].mxu0  ;;  %13644 = vmac.bf16.f32.vacc0 %v11495_v10, %v14261_v63 }
 0x20b   : > { %17641 = vst [vmem:[#allocation84_spill] sm:$0xff] %v15496_v2  ;;  %v15499_v60 = vpop.f32.mrb[52].mxu0  ;;  %v13613_v18 = vrot.slane %v13606_v54, %v14126_v26  ;;  %v13619_v34 = vrot.slane %v13607_v36, %v14126_v26  ;;  %13645 = vmac.bf16.f32.vacc0 %v15518_v57, %v14086_v6 }
 0x20c   : > { %17642 = vst [vmem:[#allocation85_spill] sm:$0xff] %v15499_v60  ;;  %v15506_v19 = vpop.f32.mrb[53].mxu0 }
 0x20d   : > { %17643 = vst [vmem:[#allocation86_spill] sm:$0xff] %v15506_v19  ;;  %v15510_v38 = vpop.f32.mrb[54].mxu0  ;;  %vm6319_vm12 = vcmp.gt.f32.partialorder %v13613_v18, 0.0  ;;  %v6447_v60 = vmul.f32 0.1, %v13613_v18  ;;  %vm6320_vm13 = vcmp.gt.f32.partialorder %v13619_v34, 0.0 }
 0x20e   : > { %17644 = vst [vmem:[#allocation87_spill] sm:$0xff] %v15510_v38  ;;  %v15513_v2 = vpop.f32.mrb[55].mxu0  ;;  %v6448_v54 = vmul.f32 0.1, %v13619_v34  ;;  %v13626_v38 = vmovacc.add.low.vacc3 }
 0x20f   : > { %17645 = vst [vmem:[#allocation88_spill] sm:$0xff] %v15513_v2  ;;  %v15520_v7 = vpop.f32.mrb[56].mxu0  ;;  %v6575_v36 = vsel %vm6319_vm12, %v13613_v18, %v6447_v60 }
 0x210   : > { %17646 = vst [vmem:[#allocation89_spill] sm:$0xff] %v15520_v7  ;;  %v15522_v19 = vpop.f32.mrb[57].mxu0  ;;  %v13628_v29 = vcombine.low %v13626_v38, %v13627_v47  ;;  %v13629_v16 = vcombine.high %v13626_v38, %v13627_v47  ;;  %v6576_v7 = vsel %vm6320_vm13, %v13619_v34, %v6448_v54  ;;  %v13647_v54 = vmovacc.add.high.vacc0 }
 0x211   : > { %17647 = vst [vmem:[#allocation90_spill] sm:$0xff] %v15522_v19  ;;  %v15528_v14 = vpop.f32.mrb[58].mxu0  ;;  %v6649_v18 = vpack.c.bf16 %v6576_v7, %v6575_v36  ;;  %v13646_v7 = vmovacc.add.low.vacc0  ;;  %13706 = vmul.bf16.f32.vacc3 %v15260_v39, %v14080_v4 }
 0x212   : > { %v13635_v2 = vrot.slane %v13628_v29, %v14126_v26  ;;  %v13641_v15 = vrot.slane %v13629_v16, %v14126_v26  ;;  %17648 = vst [vmem:[#allocation91_spill] sm:$0xff] %v15528_v14  ;;  %v15530_v35 = vpop.f32.mrb[59].mxu0  ;;  %v11496_v16 = vld [vmem:[%s14049_s27 + $0x190] sm:$0xff]  }
 0x213   : > { %17649 = vst [vmem:[#allocation92_spill] sm:$0xff] %v15530_v35  ;;  %12046 = vmatprep.mubr.bf16.mxu1 %v6649_v18  ;;  %v13648_v36 = vcombine.low %v13646_v7, %v13647_v54  ;;  %v13649_v14 = vcombine.high %v13646_v7, %v13647_v54  ;;  %13662 = vmul.bf16.f32.vacc0 %v15518_v57, %v14080_v4 }
 0x214   : > { %vm6321_vm14 = vcmp.gt.f32.partialorder %v13635_v2, 0.0  ;;  %v6449_v60 = vmul.f32 0.1, %v13635_v2  ;;  %vm6322_vm15 = vcmp.gt.f32.partialorder %v13641_v15, 0.0  ;;  %v6450_v19 = vmul.f32 0.1, %v13641_v15 }
 0x215   : > { %v15537_v29 = vpop.f32.mrb[8].mxu1  ;;  %v13655_v18 = vrot.slane %v13648_v36, %v14126_v26  ;;  %13663 = vmac.bf16.f32.vacc0 %v11444_v20, %v14282_v33  ;;  %13707 = vmac.bf16.f32.vacc3 %v11496_v16, %v14282_v33 }
 0x216   : > { %v6577_v8 = vsel %vm6321_vm14, %v13635_v2, %v6449_v60  ;;  %v6578_v47 = vsel %vm6322_vm15, %v13641_v15, %v6450_v19  ;;  %17650 = vst [vmem:[#allocation93_spill] sm:$0xff] %v15537_v29  ;;  %v15539_v38 = vpop.f32.mrb[9].mxu1  ;;  %v13661_v19 = vrot.slane %v13649_v14, %v14126_v26  ;;  %13664 = vmac.bf16.f32.vacc0 %v11495_v10, %v14250_v55 }
 0x217   : > { %v6650_v34 = vpack.c.bf16 %v6578_v47, %v6577_v8  ;;  %17651 = vst [vmem:[#allocation94_spill] sm:$0xff] %v15539_v38  ;;  %v15545_v2 = vpop.f32.mrb[10].mxu1  ;;  %vm6323_vm0 = vcmp.gt.f32.partialorder %v13655_v18, 0.0  ;;  %v6451_v60 = vmul.f32 0.1, %v13655_v18  ;;  %v11609_v8 = vld [vmem:[%s14049_s27 + $0x1d0] sm:$0xff]   ;;  %13665 = vmac.bf16.f32.vacc0 %v11496_v16, %v14261_v63 }
 0x218   : > { %17652 = vst [vmem:[#allocation95_spill] sm:$0xff] %v15545_v2  ;;  %v15547_v15 = vpop.f32.mrb[11].mxu1  ;;  %vm6324_vm1 = vcmp.gt.f32.partialorder %v13661_v19, 0.0  ;;  %v6452_v47 = vmul.f32 0.1, %v13661_v19  ;;  %13666 = vmac.bf16.f32.vacc0 %v14107_v13, %v15494_v48  ;;  %13684 = vmul.bf16.f32.vacc1 %v11609_v8, %v14080_v4 }
 0x219   : > { %12047 = vmatmul.mubr.bf16.gmra.mrb[32].mxu1 %v6650_v34  ;;  %17653 = vst [vmem:[#allocation96_spill] sm:$0xff] %v15547_v15  ;;  %v6579_v7 = vsel %vm6323_vm0, %v13655_v18, %v6451_v60  ;;  %13685 = vmac.bf16.f32.vacc1 %v11495_v10, %v14282_v33  ;;  %13667 = vmac.bf16.f32.vacc0 %v11609_v8, %v14086_v6  ;;  %vm13847_vm0 = vmmov 0  }
 0x21a   : > { %v6580_v54 = vsel %vm6324_vm1, %v13661_v19, %v6452_v47  ;;  %13686 = vmac.bf16.f32.vacc1 %v11496_v16, %v14250_v55  ;;  %13708 = vmac.bf16.f32.vacc3 %v15243_v41, %v14250_v55  ;;  %v11392_v16 = vld [vmem:[%s14049_s27 + $0x198] sm:$0xff]   ;;  %vm7437_vm1 = vcmask 261120  }
 0x21b   : > { %v6651_v14 = vpack.c.bf16 %v6580_v54, %v6579_v7  ;;  %v13668_v20 = vmovacc.add.low.vacc0  ;;  %13687 = vmac.bf16.f32.vacc1 %v15243_v41, %v14261_v63  ;;  %13709 = vmac.bf16.f32.vacc3 %v15281_v62, %v14261_v63 }
 0x21c   : > { %v13669_v34 = vmovacc.add.high.vacc0  ;;  %13688 = vmac.bf16.f32.vacc1 %v15518_v57, %v14107_v13  ;;  %13710 = vmac.bf16.f32.vacc3 %v11609_v8, %v14107_v13  ;;  %13729 = vmac.bf16.f32.vacc2 %v11392_v16, %v14282_v33 }
 0x21d   : > { %12050 = vmatprep.mubr.bf16.mxu1 %v6651_v14  ;;  %v15570_v14 = vpop.f32.mrb[60].mxu0  ;;  %13689 = vmac.bf16.f32.vacc1 %v15260_v39, %v14086_v6  ;;  %13711 = vmac.bf16.f32.vacc3 %v15309_v58, %v14086_v6  ;;  %13730 = vmac.bf16.f32.vacc2 %v15281_v62, %v14250_v55 }
 0x21e   : > { %v13670_v36 = vcombine.low %v13668_v20, %v13669_v34  ;;  %v13671_v18 = vcombine.high %v13668_v20, %v13669_v34  ;;  %17654 = vst [vmem:[#allocation97_spill] sm:$0xff] %v15570_v14  ;;  %13731 = vmac.bf16.f32.vacc2 %v15326_v5, %v14261_v63  ;;  %13750 = vmul.bf16.f32.vacc0 %v15353_v25, %v14080_v4 }
 0x21f   : > { %v13690_v20 = vmovacc.add.low.vacc1  ;;  %v13712_v41 = vmovacc.add.low.vacc3 }
 0x220   : > { %v13677_v60 = vrot.slane %v13670_v36, %v14126_v26  ;;  %v13683_v19 = vrot.slane %v13671_v18, %v14126_v26  ;;  %v13691_v34 = vmovacc.add.high.vacc1 }
 0x222   : > { %vm6325_vm2 = vcmp.gt.f32.partialorder %v13677_v60, 0.0  ;;  %vm6326_vm3 = vcmp.gt.f32.partialorder %v13683_v19, 0.0  ;;  %v6453_v47 = vmul.f32 0.1, %v13677_v60  ;;  %v6454_v48 = vmul.f32 0.1, %v13683_v19 }
 0x223   : > { %v13692_v36 = vcombine.low %v13690_v20, %v13691_v34  ;;  %v13693_v18 = vcombine.high %v13690_v20, %v13691_v34  ;;  %13772 = vmul.bf16.f32.vacc1 %v15405_v24, %v14080_v4 }
 0x224   : > { %v6581_v10 = vsel %vm6325_vm2, %v13677_v60, %v6453_v47  ;;  %v6582_v7 = vsel %vm6326_vm3, %v13683_v19, %v6454_v48  ;;  %v15576_v19 = vpop.f32.mrb[61].mxu0  ;;  %13773 = vmac.bf16.f32.vacc1 %v15326_v5, %v14282_v33 }
 0x225   : > { %v6652_v54 = vpack.c.bf16 %v6582_v7, %v6581_v10  ;;  %v13699_v60 = vrot.slane %v13692_v36, %v14126_v26  ;;  %v13705_v57 = vrot.slane %v13693_v18, %v14126_v26  ;;  %17655 = vst [vmem:[#allocation98_spill] sm:$0xff] %v15576_v19  ;;  %v15581_v47 = vpop.f32.mrb[62].mxu0  ;;  %v13713_v36 = vmovacc.add.high.vacc3 }
 0x226   : > { %17656 = vst [vmem:[#allocation99_spill] sm:$0xff] %v15581_v47  ;;  %v15583_v39 = vpop.f32.mrb[63].mxu0  ;;  %13774 = vmac.bf16.f32.vacc1 %v15376_v23, %v14250_v55 }
 0x227   : > { %12051 = vmatmul.mubr.bf16.gmra.mrb[36].mxu1 %v6652_v54  ;;  %vm6327_vm4 = vcmp.gt.f32.partialorder %v13699_v60, 0.0  ;;  %v6455_v48 = vmul.f32 0.1, %v13699_v60  ;;  %17657 = vst [vmem:[#allocation100_spill] sm:$0xff] %v15583_v39  ;;  %vm6328_vm5 = vcmp.gt.f32.partialorder %v13705_v57, 0.0  ;;  %v11554_v54 = vld [vmem:[%s14049_s27 + $0x1d8] sm:$0xff]   ;;  %v13714_v18 = vcombine.low %v13712_v41, %v13713_v36 }
 0x228   : > { %v6456_v10 = vmul.f32 0.1, %v13705_v57  ;;  %v13715_v2 = vcombine.high %v13712_v41, %v13713_v36  ;;  %13732 = vmac.bf16.f32.vacc2 %v11554_v54, %v14107_v13  ;;  %13775 = vmac.bf16.f32.vacc1 %v15443_v22, %v14261_v63 }
 0x229   : > { %v6583_v7 = vsel %vm6327_vm4, %v13699_v60, %v6455_v48  ;;  %v13721_v15 = vrot.slane %v13714_v18, %v14126_v26  ;;  %13733 = vmac.bf16.f32.vacc2 %v15353_v25, %v14086_v6  ;;  %13776 = vmac.bf16.f32.vacc1 %v15353_v25, %v14107_v13 }
 0x22a   : > { %v6584_v20 = vsel %vm6328_vm5, %v13705_v57, %v6456_v10  ;;  %v13727_v29 = vrot.slane %v13715_v2, %v14126_v26  ;;  %v11393_v57 = vld [vmem:[%s14049_s27 + $0x1a0] sm:$0xff]   ;;  %13777 = vmac.bf16.f32.vacc1 %v15465_v53, %v14086_v6  ;;  %13794 = vmul.bf16.f32.vacc3 %v15465_v53, %v14080_v4 }
 0x22b   : > { %v6653_v34 = vpack.c.bf16 %v6584_v20, %v6583_v7  ;;  %vm6329_vm6 = vcmp.gt.f32.partialorder %v13721_v15, 0.0  ;;  %v6457_v8 = vmul.f32 0.1, %v13721_v15  ;;  %v11555_v2 = vld [vmem:[%s14049_s27 + $0x1e0] sm:$0xff]   ;;  %v13734_v58 = vmovacc.add.low.vacc2 }
 0x22c   : > { %vm6330_vm7 = vcmp.gt.f32.partialorder %v13727_v29, 0.0  ;;  %v6458_v60 = vmul.f32 0.1, %v13727_v29  ;;  %v13735_v16 = vmovacc.add.high.vacc2  ;;  %13751 = vmac.bf16.f32.vacc0 %v11393_v57, %v14282_v33 }
 0x22d   : > { %12054 = vmatprep.mubr.bf16.mxu1 %v6653_v34  ;;  %v6585_v48 = vsel %vm6329_vm6, %v13721_v15, %v6457_v8  ;;  %13752 = vmac.bf16.f32.vacc0 %v15326_v5, %v14250_v55  ;;  %v15619_v8 = vpop.f32.mrb[12].mxu1  ;;  %13795 = vmac.bf16.f32.vacc3 %v15376_v23, %v14282_v33  ;;  %v7268_v25 = vadd.f32 %v15254_v12, %v15257_v1  ;;  %v16159_v1 = vld [vmem:[%s14049_s27 + $0x1c8] sm:$0xff]  }
 0x22e   : > { %v6586_v10 = vsel %vm6330_vm7, %v13727_v29, %v6458_v60  ;;  %v13736_v20 = vcombine.low %v13734_v58, %v13735_v16  ;;  %v13737_v34 = vcombine.high %v13734_v58, %v13735_v16  ;;  %13753 = vmac.bf16.f32.vacc0 %v15376_v23, %v14261_v63  ;;  %17658 = vst [vmem:[#allocation101_spill] sm:$0xff] %v15619_v8  ;;  %v15623_v60 = vpop.f32.mrb[13].mxu1  ;;  %v17804_v12 = vld [vmem:[#allocation26_spill] sm:$0xff] }
 0x22f   : > { %v6654_v7 = vpack.c.bf16 %v6586_v10, %v6585_v48  ;;  %13754 = vmac.bf16.f32.vacc0 %v11555_v2, %v14107_v13  ;;  %17659 = vst [vmem:[#allocation102_spill] sm:$0xff] %v15623_v60  ;;  %v15629_v2 = vpop.f32.mrb[14].mxu1  ;;  %13796 = vmac.bf16.f32.vacc3 %v15443_v22, %v14250_v55  ;;  %v7269_v4 = vadd.f32 %v7268_v25, %v15272_v44  ;;  %v17816_v44 = vld [vmem:[#allocation50_spill] sm:$0xff] }
 0x230   : > { %v13743_v62 = vrot.slane %v13736_v20, %v14126_v26  ;;  %v13749_v15 = vrot.slane %v13737_v34, %v14126_v26  ;;  %13755 = vmac.bf16.f32.vacc0 %v15405_v24, %v14086_v6  ;;  %17660 = vst [vmem:[#allocation103_spill] sm:$0xff] %v15629_v2  ;;  %v15633_v16 = vpop.f32.mrb[15].mxu1  ;;  %v12225_v6 = vld [vmem:[%s17337_s5] sm:$0xff]   ;;  %13797 = vmac.bf16.f32.vacc3 %v15405_v24, %v14107_v13  ;;  %v12226_v13 = vld [vmem:[%s17337_s5 + $0x8] sm:$0xff]  }
 0x231   : > { %12055 = vmatmul.mubr.bf16.gmra.mrb[40].mxu1 %v6654_v7  ;;  %17661 = vst [vmem:[#allocation104_spill] sm:$0xff] %v15633_v16  ;;  %v17393_v55 = vmov 0.0   ;;  %17786 = vst [vmem:[#allocation185_spill] sm:$0xff] %v16159_v1  ;;  %v17809_v1 = vld [vmem:[#allocation33_spill] sm:$0xff] }
 0x232   : > { %vm6331_vm8 = vcmp.gt.f32.partialorder %v13743_v62, 0.0  ;;  %v6459_v29 = vmul.f32 0.1, %v13743_v62  ;;  %vm6332_vm9 = vcmp.gt.f32.partialorder %v13749_v15, 0.0  ;;  %v6460_v54 = vmul.f32 0.1, %v13749_v15  ;;  %12066 = vmatprep.subr.bf16.mxu1 %v17393_v55 }
 0x233   : > { %v13756_v57 = vmovacc.add.low.vacc0  ;;  %v13798_v53 = vmovacc.add.low.vacc3  ;;  %12067 = vmatpush3.bf16.msra.mxu1 %v12225_v6 }
 0x234   : > { %v6587_v41 = vsel %vm6331_vm8, %v13743_v62, %v6459_v29  ;;  %v6588_v36 = vsel %vm6332_vm9, %v13749_v15, %v6460_v54  ;;  %v13757_v48 = vmovacc.add.high.vacc0  ;;  %v13778_v54 = vmovacc.add.low.vacc1  ;;  %12068 = vmatprep.subr.bf16.mxu1 %v17393_v55 }
 0x235   : > { %v6655_v18 = vpack.c.bf16 %v6588_v36, %v6587_v41  ;;  %v13779_v41 = vmovacc.add.high.vacc1 }
 0x236   : > { %v13758_v10 = vcombine.low %v13756_v57, %v13757_v48  ;;  %v13759_v7 = vcombine.high %v13756_v57, %v13757_v48 }
 0x237   : > { %12058 = vmatprep.mubr.bf16.mxu1 %v6655_v18  ;;  %v13780_v36 = vcombine.low %v13778_v54, %v13779_v41  ;;  %v13781_v18 = vcombine.high %v13778_v54, %v13779_v41  ;;  %12069 = vmatpush3.bf16.msra.mxu1 %v12226_v13 }
 0x238   : > { %v13765_v5 = vrot.slane %v13758_v10, %v14126_v26  ;;  %v13771_v58 = vrot.slane %v13759_v7, %v14126_v26  ;;  %v7331_v10 = vadd.f32 %v15262_v32, %v15266_v42  ;;  %v13799_v7 = vmovacc.add.high.vacc3  ;;  %12074 = vmatprep.subr.bf16.mxu1 %v17393_v55  ;;  %v17680_v55 = vld [vmem:[#allocation64_spill] sm:$0xff]  ;;  %v17696_v32 = vld [vmem:[#allocation85_spill] sm:$0xff] }
 0x239   : > { %v13787_v63 = vrot.slane %v13780_v36, %v14126_v26  ;;  %v13793_v57 = vrot.slane %v13781_v18, %v14126_v26  ;;  %v17697_v42 = vld [vmem:[#allocation88_spill] sm:$0xff] }
 0x23a   : > { %vm6333_vm10 = vcmp.gt.f32.partialorder %v13765_v5, 0.0  ;;  %vm6334_vm11 = vcmp.gt.f32.partialorder %v13771_v58, 0.0  ;;  %v6461_v20 = vmul.f32 0.1, %v13765_v5  ;;  %v6462_v34 = vmul.f32 0.1, %v13771_v58 }
 0x23b   : > { %vm6335_vm12 = vcmp.gt.f32.partialorder %v13787_v63, 0.0  ;;  %v6463_v48 = vmul.f32 0.1, %v13787_v63  ;;  %vm6336_vm13 = vcmp.gt.f32.partialorder %v13793_v57, 0.0  ;;  %v6464_v33 = vmul.f32 0.1, %v13793_v57 }
 0x23c   : > { %v6589_v62 = vsel %vm6333_vm10, %v13765_v5, %v6461_v20  ;;  %v6590_v15 = vsel %vm6334_vm11, %v13771_v58, %v6462_v34  ;;  %v13800_v5 = vcombine.low %v13798_v53, %v13799_v7  ;;  %v13801_v58 = vcombine.high %v13798_v53, %v13799_v7  ;;  %v15678_v53 = vpop.f32.mrb[64].mxu0 }
 0x23d   : > { %v6656_v29 = vpack.c.bf16 %v6590_v15, %v6589_v62  ;;  %v6591_v23 = vsel %vm6335_vm12, %v13787_v63, %v6463_v48  ;;  %v7332_v22 = vadd.f32 %v7331_v10, %v15278_v52  ;;  %v7270_v62 = vadd.f32 %v15268_v43, %v7269_v4  ;;  %17662 = vst [vmem:[#allocation105_spill] sm:$0xff] %v15678_v53 }
 0x23e   : > { %v13807_v20 = vrot.slane %v13800_v5, %v14126_v26  ;;  %v13813_v34 = vrot.slane %v13801_v58, %v14126_v26  ;;  %v6592_v24 = vsel %vm6336_vm13, %v13793_v57, %v6464_v33  ;;  %v15681_v5 = vpop.f32.mrb[65].mxu0 }
 0x23f   : > { %12059 = vmatmul.mubr.bf16.gmra.mrb[44].mxu1 %v6656_v29  ;;  %v6657_v29 = vpack.c.bf16 %v6592_v24, %v6591_v23  ;;  %v7271_v54 = vadd.f32 %v7270_v62, %v15290_v50  ;;  %v7333_v36 = vadd.f32 %v15274_v28, %v7332_v22  ;;  %17663 = vst [vmem:[#allocation106_spill] sm:$0xff] %v15681_v5  ;;  %v16175_v50 = vld [vmem:[%s14049_s27 + $0x1e8] sm:$0xff]  }
 0x240   : > { %vm6337_vm14 = vcmp.gt.f32.partialorder %v13807_v20, 0.0  ;;  %v6465_v15 = vmul.f32 0.1, %v13807_v20  ;;  %vm6338_vm15 = vcmp.gt.f32.partialorder %v13813_v34, 0.0  ;;  %v6466_v26 = vmul.f32 0.1, %v13813_v34 }
 0x241   : > { %12062 = vmatprep.mubr.bf16.mxu1 %v6657_v29  ;;  %v7272_v63 = vadd.f32 %v15283_v31, %v7271_v54  ;;  %v7334_v57 = vadd.f32 %v7333_v36, %v15298_v49  ;;  %v16172_v31 = vld [vmem:[%s14049_s27 + $0x1e0] sm:$0xff]   ;;  %17790 = vst [vmem:[#allocation189_spill] sm:$0xff] %v16175_v50 }
 0x242   : > { %v6593_v41 = vsel %vm6337_vm14, %v13807_v20, %v6465_v15  ;;  %v6594_v18 = vsel %vm6338_vm15, %v13813_v34, %v6466_v26  ;;  %v15684_v20 = vpop.f32.mrb[66].mxu0  ;;  %17789 = vst [vmem:[#allocation188_spill] sm:$0xff] %v16172_v31  ;;  %v17813_v31 = vld [vmem:[#allocation41_spill] sm:$0xff] }
 0x243   : > { %v6658_v25 = vpack.c.bf16 %v6594_v18, %v6593_v41  ;;  %v7273_v6 = vadd.f32 %v7272_v63, %v15311_v61  ;;  %v7335_v48 = vadd.f32 %v15292_v30, %v7334_v57  ;;  %17664 = vst [vmem:[#allocation107_spill] sm:$0xff] %v15684_v20  ;;  %v15687_v22 = vpop.f32.mrb[67].mxu0  ;;  %v17666_v41 = vld [vmem:[#allocation54_spill] sm:$0xff]  ;;  %v17667_v18 = vld [vmem:[#allocation51_spill] sm:$0xff]  ;;  %v16137_v61 = vld [vmem:[%s14049_s27 + $0x1a0] sm:$0xff]  }
 0x244   : > { %17665 = vst [vmem:[#allocation108_spill] sm:$0xff] %v15687_v22  ;;  %17781 = vst [vmem:[#allocation180_spill] sm:$0xff] %v16137_v61  ;;  %v17814_v61 = vld [vmem:[#allocation46_spill] sm:$0xff] }
 0x245   : > { %v7274_v10 = vadd.f32 %v15300_v3, %v7273_v6  ;;  %v7336_v4 = vadd.f32 %v7335_v48, %v15317_v11  ;;  %v17669_v6 = vld [vmem:[#allocation56_spill] sm:$0xff]  ;;  %v17688_v11 = vld [vmem:[#allocation77_spill] sm:$0xff]  ;;  %v16143_v3 = vld [vmem:[%s14049_s27 + $0x1a8] sm:$0xff]  }
 0x246   : > { %17782 = vst [vmem:[#allocation181_spill] sm:$0xff] %v16143_v3 }
 0x247   : > { %12063 = vmatmul.mubr.bf16.gmra.mrb[48].mxu1 %v6658_v25  ;;  %v7275_v33 = vadd.f32 %v7274_v10, %v15323_v27  ;;  %v7337_v23 = vadd.f32 %v15313_v51, %v7336_v4  ;;  %v17668_v25 = vld [vmem:[#allocation53_spill] sm:$0xff]  ;;  %v17670_v10 = vld [vmem:[#allocation58_spill] sm:$0xff] }
 0x248   : > { %v16156_v27 = vld [vmem:[%s14049_s27 + $0x1c0] sm:$0xff]  }
 0x249   : > { %v7276_v7 = vadd.f32 %v15319_v56, %v7275_v33  ;;  %v7338_v58 = vadd.f32 %v7337_v23, %v15332_v40  ;;  %v17671_v33 = vld [vmem:[#allocation55_spill] sm:$0xff]  ;;  %17785 = vst [vmem:[#allocation184_spill] sm:$0xff] %v16156_v27 }
 0x24a   : > { %v16146_v56 = vld [vmem:[%s14049_s27 + $0x1b0] sm:$0xff]  }
 0x24b   : > { %v7277_v34 = vadd.f32 %v7276_v7, %v15342_v17  ;;  %v7339_v62 = vadd.f32 %v15328_v9, %v7338_v58  ;;  %v15702_v7 = vpop.f32.mrb[16].mxu1  ;;  %v17673_v58 = vld [vmem:[#allocation57_spill] sm:$0xff]  ;;  %v17685_v9 = vld [vmem:[#allocation76_spill] sm:$0xff]  ;;  %v16111_v17 = vld [vmem:[%s14049_s27 + $0x170] sm:$0xff]   ;;  %17783 = vst [vmem:[#allocation182_spill] sm:$0xff] %v16146_v56 }
 0x24c   : > { %17672 = vst [vmem:[#allocation109_spill] sm:$0xff] %v15702_v7  ;;  %17775 = vst [vmem:[#allocation174_spill] sm:$0xff] %v16111_v17 }
 0x24d   : > { %v7278_v13 = vadd.f32 %v15338_v45, %v7277_v34  ;;  %v7340_v24 = vadd.f32 %v7339_v62, %v15355_v37  ;;  %v15705_v62 = vpop.f32.mrb[17].mxu1  ;;  %v16108_v45 = vld [vmem:[%s14049_s27 + $0x168] sm:$0xff]  }
 0x24e   : > { %17674 = vst [vmem:[#allocation110_spill] sm:$0xff] %v15705_v62  ;;  %17774 = vst [vmem:[#allocation173_spill] sm:$0xff] %v16108_v45  ;;  %v17819_v45 = vld [vmem:[#allocation53_spill] sm:$0xff] }
 0x24f   : > { %v7279_v15 = vadd.f32 %v7278_v13, %v15363_v46  ;;  %v7341_v29 = vadd.f32 %v15346_v0, %v7340_v24  ;;  %v17675_v13 = vld [vmem:[#allocation62_spill] sm:$0xff]  ;;  %v17684_v0 = vld [vmem:[#allocation72_spill] sm:$0xff]  ;;  %v16121_v46 = vld [vmem:[%s14049_s27 + $0x180] sm:$0xff]  }
 0x250   : > { %17777 = vst [vmem:[#allocation176_spill] sm:$0xff] %v16121_v46  ;;  %v17818_v46 = vld [vmem:[#allocation54_spill] sm:$0xff] }
 0x251   : > { %v7280_v26 = vadd.f32 %v15359_v59, %v7279_v15  ;;  %v7342_v54 = vadd.f32 %v7341_v29, %v15369_v21  ;;  %v15708_v15 = vpop.f32.mrb[18].mxu1  ;;  %v17677_v29 = vld [vmem:[#allocation66_spill] sm:$0xff]  ;;  %v17683_v21 = vld [vmem:[#allocation68_spill] sm:$0xff] }
 0x252   : > { %17676 = vst [vmem:[#allocation111_spill] sm:$0xff] %v15708_v15  ;;  %v16124_v59 = vld [vmem:[%s14049_s27 + $0x188] sm:$0xff]  }
 0x253   : > { %v7281_v36 = vadd.f32 %v7280_v26, %v17666_v41  ;;  %v7343_v63 = vadd.f32 %v17667_v18, %v7342_v54  ;;  %v15711_v54 = vpop.f32.mrb[19].mxu1  ;;  %17778 = vst [vmem:[#allocation177_spill] sm:$0xff] %v16124_v59  ;;  %v17820_v59 = vld [vmem:[#allocation58_spill] sm:$0xff] }
 0x254   : > { %17678 = vst [vmem:[#allocation112_spill] sm:$0xff] %v15711_v54 }
 0x255   : > { %v7282_v57 = vadd.f32 %v17668_v25, %v7281_v36  ;;  %v7344_v48 = vadd.f32 %v7343_v63, %v17669_v6  ;;  %v17679_v36 = vld [vmem:[#allocation60_spill] sm:$0xff]  ;;  %v17681_v6 = vld [vmem:[#allocation70_spill] sm:$0xff]  ;;  %v16086_v25 = vld [vmem:[%s14049_s27 + $0x140] sm:$0xff]  }
 0x256   : > { %17769 = vst [vmem:[#allocation168_spill] sm:$0xff] %v16086_v25 }
 0x257   : > { %v7283_v4 = vadd.f32 %v7282_v57, %v17670_v10  ;;  %v7345_v23 = vadd.f32 %v17671_v33, %v7344_v48  ;;  %v17682_v33 = vld [vmem:[#allocation74_spill] sm:$0xff]  ;;  %v16083_v10 = vld [vmem:[%s14049_s27 + $0x138] sm:$0xff]  }
 0x258   : > { %17768 = vst [vmem:[#allocation167_spill] sm:$0xff] %v16083_v10 }
 0x259   : > { %v7284_v34 = vadd.f32 %v17673_v58, %v7283_v4  ;;  %v7346_v24 = vadd.f32 %v7345_v23, %v17675_v13  ;;  %v17686_v13 = vld [vmem:[#allocation78_spill] sm:$0xff]  ;;  %v16118_v58 = vld [vmem:[%s14049_s27 + $0x178] sm:$0xff]  }
 0x25a   : > { %17776 = vst [vmem:[#allocation175_spill] sm:$0xff] %v16118_v58  ;;  %v16182_v58 = vld [vmem:[%s14049_s27 + $0x1f0] sm:$0xff]  }
 0x25b   : > { %v7285_v26 = vadd.f32 %v7284_v34, %v17677_v29  ;;  %v7347_v63 = vadd.f32 %v17679_v36, %v7346_v24  ;;  %v17687_v34 = vld [vmem:[#allocation75_spill] sm:$0xff]  ;;  %v17689_v24 = vld [vmem:[#allocation80_spill] sm:$0xff]  ;;  %17791 = vst [vmem:[#allocation190_spill] sm:$0xff] %v16182_v58  ;;  %v17806_v58 = vld [vmem:[#allocation30_spill] sm:$0xff] }
 0x25d   : > { %v7286_v57 = vadd.f32 %v17680_v55, %v7285_v26  ;;  %v7348_v48 = vadd.f32 %v7347_v63, %v17681_v6  ;;  %v17690_v26 = vld [vmem:[#allocation82_spill] sm:$0xff]  ;;  %v17691_v63 = vld [vmem:[#allocation79_spill] sm:$0xff] }
 0x25e   : > { %v16073_v55 = vld [vmem:[%s14049_s27 + $0x128] sm:$0xff]  }
 0x25f   : > { %v7287_v18 = vadd.f32 %v7286_v57, %v17682_v33  ;;  %v7349_v4 = vadd.f32 %v17683_v21, %v7348_v48  ;;  %v17692_v57 = vld [vmem:[#allocation81_spill] sm:$0xff]  ;;  %v17693_v48 = vld [vmem:[#allocation84_spill] sm:$0xff]  ;;  %17766 = vst [vmem:[#allocation165_spill] sm:$0xff] %v16073_v55  ;;  %v17824_v55 = vld [vmem:[#allocation74_spill] sm:$0xff] }
 0x261   : > { %v7288_v37 = vadd.f32 %v17684_v0, %v7287_v18  ;;  %v7350_v23 = vadd.f32 %v7349_v4, %v17685_v9  ;;  %v17694_v18 = vld [vmem:[#allocation86_spill] sm:$0xff]  ;;  %v17695_v4 = vld [vmem:[#allocation83_spill] sm:$0xff] }
 0x263   : > { %v7289_v40 = vadd.f32 %v7288_v37, %v17686_v13  ;;  %v7351_v51 = vadd.f32 %v17687_v34, %v7350_v23  ;;  %v17698_v34 = vld [vmem:[#allocation90_spill] sm:$0xff]  ;;  %v16061_v13 = vld [vmem:[%s14049_s27 + $0x110] sm:$0xff]  }
 0x264   : > { %17763 = vst [vmem:[#allocation162_spill] sm:$0xff] %v16061_v13  ;;  %v17827_v13 = vld [vmem:[#allocation77_spill] sm:$0xff] }
 0x265   : > { %v7290_v30 = vadd.f32 %v17688_v11, %v7289_v40  ;;  %v7352_v36 = vadd.f32 %v7351_v51, %v17689_v24  ;;  %v17699_v11 = vld [vmem:[#allocation87_spill] sm:$0xff]  ;;  %v17700_v24 = vld [vmem:[#allocation89_spill] sm:$0xff] }
 0x267   : > { %v7291_v49 = vadd.f32 %v7290_v30, %v17690_v26  ;;  %v7353_v6 = vadd.f32 %v17691_v63, %v7352_v36  ;;  %v17717_v63 = vld [vmem:[#allocation65_spill] sm:$0xff]  ;;  %v16058_v26 = vld [vmem:[%s14049_s27 + $0x108] sm:$0xff]  }
 0x268   : > { %17762 = vst [vmem:[#allocation161_spill] sm:$0xff] %v16058_v26  ;;  %v17828_v26 = vld [vmem:[#allocation82_spill] sm:$0xff] }
 0x269   : > { %v7292_v28 = vadd.f32 %v17692_v57, %v7291_v49  ;;  %v7354_v21 = vadd.f32 %v7353_v6, %v17693_v48  ;;  %v15737_v49 = vpop.f32.mrb[68].mxu0  ;;  %v17702_v6 = vmov 0.0   ;;  %v16055_v57 = vld [vmem:[%s14049_s27 + $0x100] sm:$0xff]  }
 0x26a   : > { %17701 = vst [vmem:[#allocation113_spill] sm:$0xff] %v15737_v49  ;;  %12070 = vmatprep.mubr.msk.bf16.mxu1 %vm13847_vm0, %v17702_v6  ;;  %17761 = vst [vmem:[#allocation160_spill] sm:$0xff] %v16055_v57  ;;  %v17829_v57 = vld [vmem:[#allocation81_spill] sm:$0xff] }
 0x26b   : > { %v7293_v52 = vadd.f32 %v7292_v28, %v17694_v18  ;;  %v7355_v9 = vadd.f32 %v17695_v4, %v7354_v21 }
 0x26d   : > { %v7294_v37 = vadd.f32 %v17696_v32, %v7293_v52  ;;  %v7356_v23 = vadd.f32 %v7355_v9, %v17697_v42  ;;  %v15742_v52 = vpop.f32.mrb[69].mxu0  ;;  %v17704_v9 = vld [vmem:[#allocation91_spill] sm:$0xff]  ;;  %v16048_v32 = vld [vmem:[%s14049_s27 + $0xf8] sm:$0xff]  }
 0x26e   : > { %17703 = vst [vmem:[#allocation114_spill] sm:$0xff] %v15742_v52  ;;  %17760 = vst [vmem:[#allocation159_spill] sm:$0xff] %v16048_v32  ;;  %v17830_v32 = vld [vmem:[#allocation86_spill] sm:$0xff] }
 0x26f   : > { %v7295_v40 = vadd.f32 %v7294_v37, %v17698_v34  ;;  %v7357_v51 = vadd.f32 %v17699_v11, %v7356_v23  ;;  %v15745_v37 = vpop.f32.mrb[70].mxu0  ;;  %v16045_v34 = vld [vmem:[%s14049_s27 + $0xf0] sm:$0xff]  }
 0x270   : > { %17705 = vst [vmem:[#allocation115_spill] sm:$0xff] %v15745_v37  ;;  %17759 = vst [vmem:[#allocation158_spill] sm:$0xff] %v16045_v34  ;;  %v17832_v34 = vld [vmem:[#allocation85_spill] sm:$0xff] }
 0x271   : > { %v7296_v30 = vadd.f32 %v17700_v24, %v7295_v40  ;;  %v7358_v36 = vadd.f32 %v7357_v51, %v15530_v35  ;;  %v15748_v40 = vpop.f32.mrb[71].mxu0  ;;  %v17723_v24 = vld [vmem:[#allocation93_spill] sm:$0xff] }
 0x272   : > { %17706 = vst [vmem:[#allocation116_spill] sm:$0xff] %v15748_v40 }
 0x273   : > { %v7297_v28 = vadd.f32 %v7296_v30, %v15576_v19  ;;  %v7359_v21 = vadd.f32 %v17704_v9, %v7358_v36  ;;  %v12227_v36 = vld [vmem:[%s477_s24] sm:$0xff]  }
 0x274   : > { %12071 = vmatmul.mubr.msk.bf16.vlgmr.msra.gmra.mrb[52].mxu1 %vm7437_vm1, %v12227_v36  ;;  %v15774_v36 = vpop.f32.mrb[20].mxu1 }
 0x275   : > { %v7298_v23 = vadd.f32 %v15570_v14, %v7297_v28  ;;  %v7360_v51 = vadd.f32 %v7359_v21, %v15583_v39  ;;  %v12228_v21 = vld [vmem:[%s17336_s4] sm:$0xff]   ;;  %12090 = vmatprep.mubr.msk.bf16.mxu1 %vm13847_vm0, %v17702_v6  ;;  %17707 = vst [vmem:[#allocation117_spill] sm:$0xff] %v15774_v36  ;;  %v17720_v14 = vld [vmem:[#allocation67_spill] sm:$0xff] }
 0x276   : > { %12075 = vmatpush3.bf16.msra.mxu1 %v12228_v21  ;;  %v12230_v21 = vld [vmem:[%s17336_s4 + $0x10] sm:$0xff]  }
 0x277   : > { %v7299_v35 = vadd.f32 %v7298_v23, %v15681_v5  ;;  %v7361_v30 = vadd.f32 %v15581_v47, %v7360_v51  ;;  %12076 = vmatprep.subr.bf16.mxu1 %v17702_v6 }
 0x279   : > { %v7300_v9 = vadd.f32 %v15678_v53, %v7299_v35  ;;  %v7362_v11 = vadd.f32 %v7361_v30, %v15687_v22  ;;  %v15776_v22 = vpop.f32.mrb[21].mxu1  ;;  %v17719_v53 = vld [vmem:[#allocation63_spill] sm:$0xff] }
 0x27a   : > { %17708 = vst [vmem:[#allocation118_spill] sm:$0xff] %v15776_v22 }
 0x27b   : > { %v7301_v28 = vadd.f32 %v7300_v9, %v15742_v52  ;;  %v7363_v23 = vadd.f32 %v15684_v20, %v7362_v11  ;;  %v12229_v9 = vld [vmem:[%s17336_s4 + $0x8] sm:$0xff]   ;;  %v15778_v11 = vpop.f32.mrb[22].mxu1 }
 0x27c   : > { %12077 = vmatpush3.bf16.msra.mxu1 %v12229_v9  ;;  %17709 = vst [vmem:[#allocation119_spill] sm:$0xff] %v15778_v11  ;;  %v12233_v9 = vld [vmem:[%s17336_s4 + $0x28] sm:$0xff]  }
 0x27d   : > { %v7302_v51 = vadd.f32 %v15737_v49, %v7301_v28  ;;  %v7364_v35 = vadd.f32 %v7363_v23, %v15748_v40  ;;  %12078 = vmatprep.subr.bf16.mxu1 %v17702_v6  ;;  %v15780_v28 = vpop.f32.mrb[23].mxu1  ;;  %v12231_v23 = vld [vmem:[%s17336_s4 + $0x18] sm:$0xff]   ;;  %v17718_v49 = vld [vmem:[#allocation69_spill] sm:$0xff] }
 0x27e   : > { %17710 = vst [vmem:[#allocation120_spill] sm:$0xff] %v15780_v28 }
 0x27f   : > { %v7365_v30 = vadd.f32 %v15745_v37, %v7364_v35  ;;  %v12232_v35 = vld [vmem:[%s17336_s4 + $0x20] sm:$0xff]  }
 0x280   : > { %12079 = vmatpush3.bf16.msra.mxu1 %v12230_v21  ;;  %v12234_v21 = vld [vmem:[%s17336_s4 + $0x30] sm:$0xff]  }
 0x281   : > { %12080 = vmatprep.subr.bf16.mxu1 %v17702_v6 }
 0x284   : > { %12081 = vmatpush3.bf16.msra.mxu1 %v12231_v23  ;;  %v15801_v23 = vpop.f32.mrb[72].mxu0 }
 0x285   : > { %12082 = vmatprep.subr.bf16.mxu1 %v17702_v6  ;;  %17711 = vst [vmem:[#allocation121_spill] sm:$0xff] %v15801_v23  ;;  %v15803_v37 = vpop.f32.mrb[73].mxu0 }
 0x286   : > { %17712 = vst [vmem:[#allocation122_spill] sm:$0xff] %v15803_v37  ;;  %v15807_v40 = vpop.f32.mrb[74].mxu0 }
 0x287   : > { %17713 = vst [vmem:[#allocation123_spill] sm:$0xff] %v15807_v40  ;;  %v15812_v20 = vpop.f32.mrb[75].mxu0 }
 0x288   : > { %12083 = vmatpush3.bf16.msra.mxu1 %v12232_v35  ;;  %v7303_v35 = vadd.f32 %v7302_v51, %v15803_v37  ;;  %17714 = vst [vmem:[#allocation124_spill] sm:$0xff] %v15812_v20  ;;  %v7366_v39 = vadd.f32 %v7365_v30, %v15812_v20  ;;  %v17716_v51 = vld [vmem:[#allocation59_spill] sm:$0xff] }
 0x289   : > { %12084 = vmatprep.subr.bf16.mxu1 %v17702_v6 }
 0x28a   : > { %v7304_v47 = vadd.f32 %v15801_v23, %v7303_v35  ;;  %v7367_v4 = vadd.f32 %v15807_v40, %v7366_v39  ;;  %v17721_v35 = vld [vmem:[#allocation73_spill] sm:$0xff]  ;;  %v17725_v40 = vld [vmem:[#allocation95_spill] sm:$0xff] }
 0x28c   : > { %12085 = vmatpush3.bf16.msra.mxu1 %v12233_v9  ;;  %v12235_v9 = vld [vmem:[%s17336_s4 + $0x38] sm:$0xff]   ;;  %v7368_v37 = vadd.f32 %v7367_v4, %v17717_v63 }
 0x28d   : > { %12086 = vmatprep.subr.bf16.mxu1 %v17702_v6 }
 0x28e   : > { %v7369_v5 = vadd.f32 %v17719_v53, %v7368_v37 }
 0x290   : > { %12087 = vmatpush3.bf16.msra.mxu1 %v12234_v21  ;;  %v17715_v21 = vld [vmem:[#allocation61_spill] sm:$0xff]  ;;  %v7370_v23 = vadd.f32 %v7369_v5, %v17721_v35  ;;  %v15835_v35 = vpop.f32.mrb[24].mxu1 }
 0x291   : > { %12088 = vmatprep.subr.bf16.mxu1 %v17702_v6  ;;  %v7305_v42 = vadd.f32 %v7304_v47, %v17715_v21  ;;  %v17724_v21 = vld [vmem:[#allocation96_spill] sm:$0xff]  ;;  %17726 = vst [vmem:[#allocation125_spill] sm:$0xff] %v15835_v35 }
 0x293   : > { %v7306_v48 = vadd.f32 %v17716_v51, %v7305_v42  ;;  %v16070_v51 = vld [vmem:[%s14049_s27 + $0x120] sm:$0xff]  }
 0x294   : > { %12089 = vmatpush3.bf16.msra.mxu1 %v12235_v9  ;;  %v17722_v9 = vld [vmem:[#allocation71_spill] sm:$0xff]  ;;  %17765 = vst [vmem:[#allocation164_spill] sm:$0xff] %v16070_v51  ;;  %v17825_v51 = vld [vmem:[#allocation72_spill] sm:$0xff] }
 0x295   : > { %12094 = vmatprep.subr.bf16.mxu1 %v17702_v6  ;;  %v7307_v52 = vadd.f32 %v7306_v48, %v17718_v49  ;;  %v7371_v20 = vadd.f32 %v17722_v9, %v7370_v23 }
 0x297   : > { %v7308_v19 = vadd.f32 %v17720_v14, %v7307_v52  ;;  %v7372_v39 = vadd.f32 %v7371_v20, %v17724_v21  ;;  %v16032_v14 = vld [vmem:[%s14049_s27 + $0xd8] sm:$0xff]  }
 0x298   : > { %17756 = vst [vmem:[#allocation155_spill] sm:$0xff] %v16032_v14  ;;  %v17838_v14 = vld [vmem:[#allocation98_spill] sm:$0xff] }
 0x299   : > { %v7309_v30 = vadd.f32 %v7308_v19, %v15539_v38  ;;  %v7373_v4 = vadd.f32 %v17725_v40, %v7372_v39  ;;  %v15837_v19 = vpop.f32.mrb[25].mxu1  ;;  %v16029_v38 = vld [vmem:[%s14049_s27 + $0xd0] sm:$0xff]  }
 0x29a   : > { %17727 = vst [vmem:[#allocation126_spill] sm:$0xff] %v15837_v19  ;;  %17755 = vst [vmem:[#allocation154_spill] sm:$0xff] %v16029_v38  ;;  %v17840_v38 = vld [vmem:[#allocation97_spill] sm:$0xff] }
 0x29b   : > { %v7310_v47 = vadd.f32 %v17723_v24, %v7309_v30  ;;  %v7374_v37 = vadd.f32 %v7373_v4, %v15633_v16  ;;  %v15841_v30 = vpop.f32.mrb[26].mxu1  ;;  %v16080_v24 = vld [vmem:[%s14049_s27 + $0x130] sm:$0xff]  }
 0x29c   : > { %17728 = vst [vmem:[#allocation127_spill] sm:$0xff] %v15841_v30  ;;  %v15844_v39 = vpop.f32.mrb[27].mxu1  ;;  %17767 = vst [vmem:[#allocation166_spill] sm:$0xff] %v16080_v24  ;;  %v17823_v24 = vld [vmem:[#allocation64_spill] sm:$0xff] }
 0x29d   : > { %v7311_v42 = vadd.f32 %v7310_v47, %v15623_v60  ;;  %v7375_v5 = vadd.f32 %v15629_v2, %v7374_v37  ;;  %17729 = vst [vmem:[#allocation128_spill] sm:$0xff] %v15844_v39 }
 0x29f   : > { %v7312_v48 = vadd.f32 %v15619_v8, %v7311_v42  ;;  %v7376_v20 = vadd.f32 %v7375_v5, %v15711_v54  ;;  %v16019_v8 = vld [vmem:[%s14049_s27 + $0xc0] sm:$0xff]  }
 0x2a1   : > { %v7313_v52 = vadd.f32 %v7312_v48, %v15705_v62  ;;  %v7377_v42 = vadd.f32 %v15708_v15, %v7376_v20  ;;  %v16039_v62 = vld [vmem:[%s14049_s27 + $0xe0] sm:$0xff]  }
 0x2a2   : > { %17757 = vst [vmem:[#allocation156_spill] sm:$0xff] %v16039_v62  ;;  %v17836_v62 = vld [vmem:[#allocation89_spill] sm:$0xff] }
 0x2a3   : > { %v7314_v23 = vadd.f32 %v15702_v7, %v7313_v52  ;;  %v7378_v48 = vadd.f32 %v7377_v42, %v15780_v28  ;;  %v16067_v7 = vld [vmem:[%s14049_s27 + $0x118] sm:$0xff]  }
 0x2a4   : > { %17764 = vst [vmem:[#allocation163_spill] sm:$0xff] %v16067_v7  ;;  %v17826_v7 = vld [vmem:[#allocation78_spill] sm:$0xff] }
 0x2a5   : > { %v7315_v47 = vadd.f32 %v7314_v23, %v15776_v22  ;;  %v7379_v2 = vadd.f32 %v15778_v11, %v7378_v48  ;;  %v16006_v22 = vld [vmem:[%s14049_s27 + $0xa8] sm:$0xff]  }
 0x2a7   : > { %v7316_v4 = vadd.f32 %v15774_v36, %v7315_v47  ;;  %v7380_v52 = vadd.f32 %v7379_v2, %v15844_v39  ;;  %v16003_v36 = vld [vmem:[%s14049_s27 + $0xa0] sm:$0xff]  }
 0x2a9   : > { %v7317_v37 = vadd.f32 %v7316_v4, %v15837_v19  ;;  %v7381_v54 = vadd.f32 %v15841_v30, %v7380_v52  ;;  %v16000_v19 = vld [vmem:[%s14049_s27 + $0x98] sm:$0xff]  }
 0x2ab   : > { %v7318_v5 = vadd.f32 %v15835_v35, %v7317_v37  ;;  %v16016_v35 = vld [vmem:[%s14049_s27 + $0xb8] sm:$0xff]  }
 0x2dd   : > { %v15854_v16 = vpop.f32.mrb[28].mxu1 }
 0x2de   : > { %17730 = vst [vmem:[#allocation129_spill] sm:$0xff] %v15854_v16  ;;  %v15856_v23 = vpop.f32.mrb[29].mxu1 }
 0x2df   : > { %17731 = vst [vmem:[#allocation130_spill] sm:$0xff] %v15856_v23  ;;  %v7319_v20 = vadd.f32 %v7318_v5, %v15856_v23  ;;  %v15859_v15 = vpop.f32.mrb[30].mxu1  ;;  %v16013_v23 = vld [vmem:[%s14049_s27 + $0xb0] sm:$0xff]  }
 0x2e0   : > { %17732 = vst [vmem:[#allocation131_spill] sm:$0xff] %v15859_v15  ;;  %v15861_v47 = vpop.f32.mrb[31].mxu1 }
 0x2e1   : > { %17733 = vst [vmem:[#allocation132_spill] sm:$0xff] %v15861_v47  ;;  %v7382_v42 = vadd.f32 %v7381_v54, %v15861_v47  ;;  %v7320_v4 = vadd.f32 %v15854_v16, %v7319_v20  ;;  %v16026_v16 = vld [vmem:[%s14049_s27 + $0xc8] sm:$0xff]  }
 0x2e3   : > { %v7383_v2 = vadd.f32 %v15859_v15, %v7382_v42 }
 0x2ec   : > { %v15866_v48 = vpop.f32.mrb[32].mxu1 }
 0x2ed   : > { %17734 = vst [vmem:[#allocation133_spill] sm:$0xff] %v15866_v48  ;;  %v15868_v37 = vpop.f32.mrb[33].mxu1 }
 0x2ee   : > { %17735 = vst [vmem:[#allocation134_spill] sm:$0xff] %v15868_v37  ;;  %v7321_v52 = vadd.f32 %v7320_v4, %v15868_v37  ;;  %v15871_v30 = vpop.f32.mrb[34].mxu1  ;;  %v16042_v37 = vld [vmem:[%s14049_s27 + $0xe8] sm:$0xff]  }
 0x2ef   : > { %17736 = vst [vmem:[#allocation135_spill] sm:$0xff] %v15871_v30  ;;  %v15873_v39 = vpop.f32.mrb[35].mxu1  ;;  %17758 = vst [vmem:[#allocation157_spill] sm:$0xff] %v16042_v37  ;;  %v17834_v37 = vld [vmem:[#allocation90_spill] sm:$0xff] }
 0x2f0   : > { %17737 = vst [vmem:[#allocation136_spill] sm:$0xff] %v15873_v39  ;;  %v7384_v5 = vadd.f32 %v7383_v2, %v15873_v39  ;;  %v7322_v11 = vadd.f32 %v15866_v48, %v7321_v52  ;;  %v15993_v48 = vld [vmem:[%s14049_s27 + $0x90] sm:$0xff]  }
 0x2f2   : > { %v7385_v54 = vadd.f32 %v15871_v30, %v7384_v5 }
 0x2fa   : > { %v15878_v47 = vpop.f32.mrb[36].mxu1 }
 0x2fb   : > { %17738 = vst [vmem:[#allocation137_spill] sm:$0xff] %v15878_v47  ;;  %v15880_v20 = vpop.f32.mrb[37].mxu1 }
 0x2fc   : > { %17739 = vst [vmem:[#allocation138_spill] sm:$0xff] %v15880_v20  ;;  %v7323_v42 = vadd.f32 %v7322_v11, %v15880_v20  ;;  %v15883_v15 = vpop.f32.mrb[38].mxu1  ;;  %v15990_v20 = vld [vmem:[%s14049_s27 + $0x88] sm:$0xff]  }
 0x2fd   : > { %17740 = vst [vmem:[#allocation139_spill] sm:$0xff] %v15883_v15  ;;  %v15885_v28 = vpop.f32.mrb[39].mxu1 }
 0x2fe   : > { %17741 = vst [vmem:[#allocation140_spill] sm:$0xff] %v15885_v28  ;;  %v7386_v4 = vadd.f32 %v7385_v54, %v15885_v28  ;;  %v7324_v40 = vadd.f32 %v15878_v47, %v7323_v42  ;;  %v15987_v47 = vld [vmem:[%s14049_s27 + $0x80] sm:$0xff]  }
 0x300   : > { %v7387_v2 = vadd.f32 %v15883_v15, %v7386_v4 }
 0x304   : > { %v15890_v39 = vpop.f32.mrb[40].mxu1 }
 0x305   : > { %17742 = vst [vmem:[#allocation141_spill] sm:$0xff] %v15890_v39  ;;  %v15892_v52 = vpop.f32.mrb[41].mxu1 }
 0x306   : > { %17743 = vst [vmem:[#allocation142_spill] sm:$0xff] %v15892_v52  ;;  %v7325_v5 = vadd.f32 %v7324_v40, %v15892_v52  ;;  %v15895_v30 = vpop.f32.mrb[42].mxu1  ;;  %v12236_v52 = vld [vmem:[#allocation8] sm:$0xff]  }
 0x307   : > { %17744 = vst [vmem:[#allocation143_spill] sm:$0xff] %v15895_v30  ;;  %v15897_v21 = vpop.f32.mrb[43].mxu1 }
 0x308   : > { %17745 = vst [vmem:[#allocation144_spill] sm:$0xff] %v15897_v21  ;;  %v7388_v11 = vadd.f32 %v7387_v2, %v15897_v21  ;;  %v7326_v9 = vadd.f32 %v15890_v39, %v7325_v5 }
 0x30a   : > { %v7389_v54 = vadd.f32 %v15895_v30, %v7388_v11 }
 0x312   : > { %v15902_v28 = vpop.f32.mrb[44].mxu1 }
 0x313   : > { %17746 = vst [vmem:[#allocation145_spill] sm:$0xff] %v15902_v28  ;;  %v15904_v42 = vpop.f32.mrb[45].mxu1 }
 0x314   : > { %17747 = vst [vmem:[#allocation146_spill] sm:$0xff] %v15904_v42  ;;  %v7327_v4 = vadd.f32 %v7326_v9, %v15904_v42  ;;  %v15907_v15 = vpop.f32.mrb[46].mxu1 }
 0x315   : > { %17748 = vst [vmem:[#allocation147_spill] sm:$0xff] %v15907_v15  ;;  %v15909_v53 = vpop.f32.mrb[47].mxu1 }
 0x316   : > { %17749 = vst [vmem:[#allocation148_spill] sm:$0xff] %v15909_v53  ;;  %v7390_v40 = vadd.f32 %v7389_v54, %v15909_v53  ;;  %v7328_v63 = vadd.f32 %v15902_v28, %v7327_v4 }
 0x318   : > { %v7391_v2 = vadd.f32 %v15907_v15, %v7390_v40 }
 0x31a   : > { %v15914_v21 = vpop.f32.mrb[48].mxu1 }
 0x31b   : > { %17750 = vst [vmem:[#allocation149_spill] sm:$0xff] %v15914_v21  ;;  %v15916_v5 = vpop.f32.mrb[49].mxu1 }
 0x31c   : > { %17751 = vst [vmem:[#allocation150_spill] sm:$0xff] %v15916_v5  ;;  %v7329_v11 = vadd.f32 %v7328_v63, %v15916_v5  ;;  %v15919_v30 = vpop.f32.mrb[50].mxu1 }
 0x31d   : > { %17752 = vst [vmem:[#allocation151_spill] sm:$0xff] %v15919_v30  ;;  %v15921_v39 = vpop.f32.mrb[51].mxu1 }
 0x31e   : > { %17753 = vst [vmem:[#allocation152_spill] sm:$0xff] %v15921_v39  ;;  %v7330_v9 = vadd.f32 %v15914_v21, %v7329_v11  ;;  %v7392_v42 = vadd.f32 %v7391_v2, %v15921_v39  ;;  %v12237_v11 = vld [vmem:[#allocation8 + $0x8] sm:$0xff]   ;;  %v15981_v39 = vld [vmem:[%s14049_s27 + $0x70] sm:$0xff]  }
 0x31f   : > { %v15984_v21 = vld [vmem:[%s14049_s27 + $0x78] sm:$0xff]  }
 0x320   : > { %v7393_v54 = vadd.f32 %v15919_v30, %v7392_v42  ;;  %v7395_v53 = vmul.f32 0.015625, %v7330_v9  ;;  %v9041_v42 = vld [vmem:[%s17338_s6] ss:$0 sm:$0xff]  ;;  %v15978_v30 = vld [vmem:[%s14049_s27 + $0x68] sm:$0xff]  }
 0x322   : > { %v7396_v4 = vmul.f32 0.015625, %v7393_v54 }
 0x324   : > { %v7397_v28 = vpack.c.bf16 %v7396_v4, %v7395_v53 }
 0x326   : > { %12091 = vmatmul.mubr.bf16.vlgmr.msra.gmra.mrb[56].mxu1 %v7397_v28 }
 0x327   : > { %12098 = vmatprep.mubr.msk.bf16.mxu1 %vm13847_vm0, %v17702_v6  ;;  %12095 = vmatpush3.bf16.msra.mxu1 %v12236_v52 }
 0x328   : > { %12096 = vmatprep.subr.bf16.mxu1 %v17702_v6 }
 0x32b   : > { %12097 = vmatpush3.bf16.msra.mxu1 %v12237_v11 }
 0x347   : > { %v7475_v40 = vpop.f32.mrb[52].mxu1 }
 0x348   : > { %v12072_v15 = vpop.f32.mrb[53].mxu1 }
 0x349   : > { %v7478_v63 = vpop.f32.mrb[54].mxu1 }
 0x34a   : > { %v12073_v5 = vpop.f32.mrb[55].mxu1 }
 0x3f9   : > { %v7564_v2 = vpop.f32.mrb[56].mxu1 }
 0x3fa   : > { %v7565_v53 = vadd.f32 %v7564_v2, %v7475_v40  ;;  %v12092_v28 = vpop.f32.mrb[57].mxu1 }
 0x3fb   : > { %v7567_v9 = vpop.f32.mrb[58].mxu1  ;;  %v15943_v28 = vld [vmem:[%s14049_s27 + $0x18] sm:$0xff]  }
 0x3fc   : > { %v7578_v15 = vadd.f32 %v9041_v42, %v7565_v53  ;;  %v7568_v5 = vadd.f32 %v7567_v9, %v7478_v63  ;;  %v12093_v52 = vpop.f32.mrb[59].mxu1  ;;  %v15934_v63 = vld [vmem:[%s14049_s27] sm:$0xff]   ;;  %v15937_v53 = vld [vmem:[%s14049_s27 + $0x8] sm:$0xff]  }
 0x3fd   : > { %17754 = vst [vmem:[#allocation153_spill] sm:$0xff] %v15934_v63  ;;  %v15946_v9 = vld [vmem:[%s14049_s27 + $0x20] sm:$0xff]   ;;  %v15955_v52 = vld [vmem:[%s14049_s27 + $0x38] sm:$0xff]  }
 0x3fe   : > { %v7582_v6 = vmul.f32 0.1, %v7578_v15  ;;  %v7579_v54 = vadd.f32 %v9041_v42, %v7568_v5  ;;  %vm7580_vm2 = vcmp.gt.f32.partialorder %v7578_v15, 0.0  ;;  %v15940_v42 = vld [vmem:[%s14049_s27 + $0x10] sm:$0xff]  }
 0x3ff   : > { %v15952_v5 = vld [vmem:[%s14049_s27 + $0x30] sm:$0xff]  }
 0x400   : > { %vm7581_vm3 = vcmp.gt.f32.partialorder %v7579_v54, 0.0  ;;  %v7583_v4 = vmul.f32 0.1, %v7579_v54  ;;  %v7584_v40 = vsel %vm7580_vm2, %v7578_v15, %v7582_v6  ;;  %v15949_v15 = vld [vmem:[%s14049_s27 + $0x28] sm:$0xff]   ;;  %v15958_v6 = vld [vmem:[%s14049_s27 + $0x40] sm:$0xff]  }
 0x402   : > { %v7585_v11 = vsel %vm7581_vm3, %v7579_v54, %v7583_v4  ;;  %v15961_v54 = vld [vmem:[%s14049_s27 + $0x48] sm:$0xff]   ;;  %v15964_v4 = vld [vmem:[%s14049_s27 + $0x50] sm:$0xff]  }
 0x403   : > { %v7586_v2 = vpack.c.bf16 %v7585_v11, %v7584_v40  ;;  %v15967_v40 = vld [vmem:[%s14049_s27 + $0x58] sm:$0xff]   ;;  %v15972_v11 = vld [vmem:[%s17340_s8] ss:$0 sm:$0xff] }
 0x405   : > { %12099 = vmatmul.mubr.msk.bf16.vlgmr.msra.gmra.mrb[60].mxu1 %vm7437_vm1, %v7586_v2  ;;  %v15975_v2 = vld [vmem:[%s14049_s27 + $0x60] sm:$0xff]  }
 0x4d8   : > { %v7647_v60 = vpop.f32.mrb[60].mxu1 }
 0x4d9   : > { %v7648_v49 = vadd.f32 %v15972_v11, %v7647_v60  ;;  %v12100_v18 = vpop.f32.mrb[61].mxu1  ;;  %v16097_v60 = vld [vmem:[%s14049_s27 + $0x158] sm:$0xff]  }
 0x4da   : > { %v7650_v0 = vpop.f32.mrb[62].mxu1  ;;  %v16094_v18 = vld [vmem:[%s14049_s27 + $0x150] sm:$0xff]   ;;  %17772 = vst [vmem:[#allocation171_spill] sm:$0xff] %v16097_v60 }
 0x4db   : > { %v9046_v33 = vmul.f32 -1.442695, %v7648_v49  ;;  %v12101_v29 = vpop.f32.mrb[63].mxu1  ;;  %v16091_v49 = vld [vmem:[%s14049_s27 + $0x148] sm:$0xff]   ;;  %17771 = vst [vmem:[#allocation170_spill] sm:$0xff] %v16094_v18  ;;  %v7651_v41 = vadd.f32 %v15972_v11, %v7650_v0  ;;  %v16131_v11 = vld [vmem:[%s14049_s27 + $0x190] sm:$0xff]  }
 0x4dc   : > { %17770 = vst [vmem:[#allocation169_spill] sm:$0xff] %v16091_v49  ;;  %v16105_v29 = vld [vmem:[%s14049_s27 + $0x160] sm:$0xff]   ;;  %17779 = vst [vmem:[#allocation178_spill] sm:$0xff] %v16131_v11  ;;  %v16149_v0 = vld [vmem:[%s14049_s27 + $0x1b8] sm:$0xff]  }
 0x4dd   : > { %12238 = vpow2.f32 %v9046_v33  ;;  %17773 = vst [vmem:[#allocation172_spill] sm:$0xff] %v16105_v29  ;;  %v16134_v33 = vld [vmem:[%s14049_s27 + $0x198] sm:$0xff]   ;;  %17784 = vst [vmem:[#allocation183_spill] sm:$0xff] %v16149_v0  ;;  %v9047_v43 = vmul.f32 -1.442695, %v7651_v41  ;;  %v16162_v18 = vld [vmem:[%s14049_s27 + $0x1d0] sm:$0xff]  }
 0x4de   : > { %17780 = vst [vmem:[#allocation179_spill] sm:$0xff] %v16134_v33  ;;  %17787 = vst [vmem:[#allocation186_spill] sm:$0xff] %v16162_v18  ;;  %v16169_v29 = vld [vmem:[%s14049_s27 + $0x1d8] sm:$0xff]   ;;  %v17808_v18 = vld [vmem:[#allocation34_spill] sm:$0xff] }
 0x4df   : > { %17788 = vst [vmem:[#allocation187_spill] sm:$0xff] %v16169_v29  ;;  %v16185_v41 = vld [vmem:[%s14049_s27 + $0x1f8] sm:$0xff]   ;;  %12240 = vpow2.f32 %v9047_v43  ;;  %v17811_v0 = vld [vmem:[#allocation37_spill] sm:$0xff]  ;;  %v17812_v29 = vld [vmem:[#allocation42_spill] sm:$0xff]  ;;  %s8484_s27 = sshll.u32 %s14045_s25, 10 }
 0x4e0   : > { %17792 = vst [vmem:[#allocation191_spill] sm:$0xff] %v16185_v41  ;;  %v17815_v33 = vld [vmem:[#allocation45_spill] sm:$0xff]  ;;  %s16550_s28 = scalar_lea.vmem [#allocation9], %s8484_s27 }
 0x4e1   : > { %v17821_v43 = vld [vmem:[#allocation57_spill] sm:$0xff] }
 0x4e7   : > { %v12239_v49 = vpop.eup %12238 }
 0x4e8   : > { %v7660_v27 = vadd.f32 1.0, %v12239_v49  ;;  %v17822_v49 = vld [vmem:[#allocation66_spill] sm:$0xff] }
 0x4e9   : > { %v12241_v56 = vpop.eup %12240 }
 0x4ea   : > { %12242 = vrcp.f32 %v7660_v27  ;;  %v7661_v3 = vadd.f32 1.0, %v12241_v56  ;;  %v17810_v27 = vld [vmem:[#allocation38_spill] sm:$0xff]  ;;  %v17817_v56 = vld [vmem:[#allocation49_spill] sm:$0xff] }
 0x4ec   : > { %12244 = vrcp.f32 %v7661_v3  ;;  %v17807_v3 = vld [vmem:[#allocation29_spill] sm:$0xff] }
 0x4f4   : > { %v12243_v11 = vpop.eup %12242 }
 0x4f5   : > { %v16247_v41 = vadd.f32 1.0, %v12243_v11  ;;  %v17805_v11 = vld [vmem:[#allocation25_spill] sm:$0xff] }
 0x4f7   : > { %v16257_v10 = vmul.f32 %v16247_v41, %v17804_v12  ;;  %v16261_v25 = vmul.f32 %v17805_v11, %v16247_v41  ;;  %v16265_v50 = vmul.f32 %v16247_v41, %v17806_v58  ;;  %v16269_v17 = vmul.f32 %v17807_v3, %v16247_v41 }
 0x4f8   : > { %v16273_v60 = vmul.f32 %v16247_v41, %v17808_v18  ;;  %v16277_v12 = vmul.f32 %v17809_v1, %v16247_v41  ;;  %v16281_v11 = vmul.f32 %v16247_v41, %v17810_v27  ;;  %v16285_v58 = vmul.f32 %v17811_v0, %v16247_v41 }
 0x4f9   : > { %v16289_v3 = vmul.f32 %v16247_v41, %v17812_v29  ;;  %v16293_v18 = vmul.f32 %v17813_v31, %v16247_v41  ;;  %v16297_v1 = vmul.f32 %v16247_v41, %v17814_v61  ;;  %v16301_v27 = vmul.f32 %v17815_v33, %v16247_v41 }
 0x4fa   : > { %v16305_v0 = vmul.f32 %v16247_v41, %v17816_v44  ;;  %v16309_v29 = vmul.f32 %v17817_v56, %v16247_v41  ;;  %v16313_v31 = vmul.f32 %v16247_v41, %v17818_v46  ;;  %v16317_v61 = vmul.f32 %v17819_v45, %v16247_v41 }
 0x4fb   : > { %v16321_v33 = vmul.f32 %v16247_v41, %v17820_v59  ;;  %v16325_v44 = vmul.f32 %v17821_v43, %v16247_v41  ;;  %v16329_v56 = vmul.f32 %v16247_v41, %v17822_v49  ;;  %v16333_v46 = vmul.f32 %v17823_v24, %v16247_v41 }
 0x4fc   : > { %v16337_v45 = vmul.f32 %v16247_v41, %v17824_v55  ;;  %v16341_v59 = vmul.f32 %v17825_v51, %v16247_v41  ;;  %v16345_v43 = vmul.f32 %v16247_v41, %v17826_v7  ;;  %v16349_v49 = vmul.f32 %v17827_v13, %v16247_v41 }
 0x4fd   : > { %v16353_v24 = vmul.f32 %v16247_v41, %v17828_v26  ;;  %v16357_v55 = vmul.f32 %v17829_v57, %v16247_v41  ;;  %v16361_v51 = vmul.f32 %v16247_v41, %v17830_v32  ;;  %v16365_v7 = vmul.f32 %v17832_v34, %v16247_v41 }
 0x4fe   : > { %v16369_v13 = vmul.f32 %v16247_v41, %v17834_v37  ;;  %v16373_v26 = vmul.f32 %v17836_v62, %v16247_v41  ;;  %v16377_v57 = vmul.f32 %v16247_v41, %v17838_v14  ;;  %v16381_v32 = vmul.f32 %v17840_v38, %v16247_v41  ;;  %v17848_v14 = vld [vmem:[#allocation113_spill] sm:$0xff]  ;;  %v17851_v38 = vld [vmem:[#allocation122_spill] sm:$0xff] }
 0x4ff   : > { %17831 = vst [vmem:[#allocation26_spill] sm:$0xff] %v16361_v51  ;;  %17833 = vst [vmem:[#allocation25_spill] sm:$0xff] %v16365_v7  ;;  %v17842_v51 = vld [vmem:[#allocation106_spill] sm:$0xff]  ;;  %v17844_v7 = vld [vmem:[#allocation105_spill] sm:$0xff] }
 0x500   : > { %17835 = vst [vmem:[#allocation30_spill] sm:$0xff] %v16369_v13  ;;  %17837 = vst [vmem:[#allocation29_spill] sm:$0xff] %v16373_v26  ;;  %v16385_v34 = vmul.f32 %v16247_v41, %v17842_v51  ;;  %v16389_v37 = vmul.f32 %v17844_v7, %v16247_v41  ;;  %v17846_v13 = vld [vmem:[#allocation114_spill] sm:$0xff]  ;;  %v16399_v26 = vpop.eup %12244  ;;  %v17853_v51 = vld [vmem:[#allocation121_spill] sm:$0xff] }
 0x501   : > { %17839 = vst [vmem:[#allocation34_spill] sm:$0xff] %v16377_v57  ;;  %17841 = vst [vmem:[#allocation33_spill] sm:$0xff] %v16381_v32  ;;  %v16393_v62 = vmul.f32 %v16247_v41, %v17846_v13  ;;  %v16397_v57 = vmul.f32 %v17848_v14, %v16247_v41  ;;  %v16403_v32 = vmul.f32 %v16247_v41, %v17851_v38  ;;  %v17855_v7 = vld [vmem:[#allocation61_spill] sm:$0xff]  ;;  %v17857_v13 = vld [vmem:[#allocation59_spill] sm:$0xff] }
 0x502   : > { %17843 = vst [vmem:[#allocation38_spill] sm:$0xff] %v16385_v34  ;;  %17845 = vst [vmem:[#allocation37_spill] sm:$0xff] %v16389_v37  ;;  %v16407_v34 = vmul.f32 %v17853_v51, %v16247_v41  ;;  %v16411_v37 = vmul.f32 %v16247_v41, %v17855_v7  ;;  %v17859_v14 = vld [vmem:[#allocation69_spill] sm:$0xff] }
 0x503   : > { %17847 = vst [vmem:[#allocation42_spill] sm:$0xff] %v16393_v62  ;;  %17849 = vst [vmem:[#allocation41_spill] sm:$0xff] %v16397_v57  ;;  %v16415_v62 = vmul.f32 %v17857_v13, %v16247_v41  ;;  %v16419_v57 = vmul.f32 %v16247_v41, %v17859_v14 }
 0x504   : > { %17850 = vst [vmem:[#allocation46_spill] sm:$0xff] %v16399_v26  ;;  %17852 = vst [vmem:[#allocation45_spill] sm:$0xff] %v16403_v32  ;;  %v17861_v26 = vld [vmem:[#allocation67_spill] sm:$0xff]  ;;  %v17863_v32 = vld [vmem:[#allocation94_spill] sm:$0xff] }
 0x505   : > { %17854 = vst [vmem:[#allocation50_spill] sm:$0xff] %v16407_v34  ;;  %17856 = vst [vmem:[#allocation49_spill] sm:$0xff] %v16411_v37  ;;  %v16423_v38 = vmul.f32 %v17861_v26, %v16247_v41  ;;  %v16427_v51 = vmul.f32 %v16247_v41, %v17863_v32  ;;  %v17865_v34 = vld [vmem:[#allocation93_spill] sm:$0xff]  ;;  %v17867_v37 = vld [vmem:[#allocation102_spill] sm:$0xff] }
 0x506   : > { %17858 = vst [vmem:[#allocation54_spill] sm:$0xff] %v16415_v62  ;;  %17860 = vst [vmem:[#allocation53_spill] sm:$0xff] %v16419_v57  ;;  %v16431_v7 = vmul.f32 %v17865_v34, %v16247_v41  ;;  %v16435_v13 = vmul.f32 %v16247_v41, %v17867_v37  ;;  %v17869_v62 = vld [vmem:[#allocation101_spill] sm:$0xff]  ;;  %v17871_v57 = vld [vmem:[#allocation110_spill] sm:$0xff] }
 0x507   : > { %17862 = vst [vmem:[#allocation58_spill] sm:$0xff] %v16423_v38  ;;  %17864 = vst [vmem:[#allocation57_spill] sm:$0xff] %v16427_v51  ;;  %v16439_v14 = vmul.f32 %v17869_v62, %v16247_v41  ;;  %v16443_v26 = vmul.f32 %v16247_v41, %v17871_v57  ;;  %v17873_v38 = vld [vmem:[#allocation109_spill] sm:$0xff]  ;;  %v17875_v51 = vld [vmem:[#allocation118_spill] sm:$0xff] }
 0x508   : > { %17866 = vst [vmem:[#allocation66_spill] sm:$0xff] %v16431_v7  ;;  %17868 = vst [vmem:[#allocation64_spill] sm:$0xff] %v16435_v13  ;;  %v16447_v32 = vmul.f32 %v17873_v38, %v16247_v41  ;;  %v16452_v34 = vmul.f32 %v16247_v41, %v17875_v51  ;;  %v17877_v37 = vld [vmem:[#allocation117_spill] sm:$0xff]  ;;  %v17879_v7 = vld [vmem:[#allocation126_spill] sm:$0xff] }
 0x509   : > { %17870 = vst [vmem:[#allocation74_spill] sm:$0xff] %v16439_v14  ;;  %17872 = vst [vmem:[#allocation72_spill] sm:$0xff] %v16443_v26  ;;  %v16456_v13 = vmul.f32 %v17877_v37, %v16247_v41  ;;  %v16460_v62 = vmul.f32 %v16247_v41, %v17879_v7  ;;  %v17881_v57 = vld [vmem:[#allocation125_spill] sm:$0xff]  ;;  %v17883_v14 = vld [vmem:[#allocation130_spill] sm:$0xff] }
 0x50a   : > { %17874 = vst [vmem:[#allocation78_spill] sm:$0xff] %v16447_v32  ;;  %17876 = vst [vmem:[#allocation77_spill] sm:$0xff] %v16452_v34  ;;  %v16464_v26 = vmul.f32 %v17881_v57, %v16247_v41  ;;  %v16468_v38 = vmul.f32 %v16247_v41, %v17883_v14  ;;  %v17885_v32 = vld [vmem:[#allocation129_spill] sm:$0xff]  ;;  %v17887_v34 = vld [vmem:[#allocation134_spill] sm:$0xff] }
 0x50b   : > { %17878 = vst [vmem:[#allocation82_spill] sm:$0xff] %v16456_v13  ;;  %17880 = vst [vmem:[#allocation81_spill] sm:$0xff] %v16460_v62  ;;  %v16472_v51 = vmul.f32 %v17885_v32, %v16247_v41  ;;  %v16476_v37 = vmul.f32 %v16247_v41, %v17887_v34  ;;  %v17889_v13 = vld [vmem:[#allocation133_spill] sm:$0xff]  ;;  %v17891_v62 = vld [vmem:[#allocation138_spill] sm:$0xff] }
 0x50c   : > { %17882 = vst [vmem:[#allocation86_spill] sm:$0xff] %v16464_v26  ;;  %17884 = vst [vmem:[#allocation85_spill] sm:$0xff] %v16468_v38  ;;  %v16480_v7 = vmul.f32 %v17889_v13, %v16247_v41  ;;  %v16484_v57 = vmul.f32 %v16247_v41, %v17891_v62  ;;  %v17893_v26 = vld [vmem:[#allocation137_spill] sm:$0xff]  ;;  %v17895_v38 = vld [vmem:[#allocation142_spill] sm:$0xff] }
 0x50d   : > { %17886 = vst [vmem:[#allocation90_spill] sm:$0xff] %v16472_v51  ;;  %17888 = vst [vmem:[#allocation89_spill] sm:$0xff] %v16476_v37  ;;  %v16488_v14 = vmul.f32 %v17893_v26, %v16247_v41  ;;  %v16492_v32 = vmul.f32 %v16247_v41, %v17895_v38  ;;  %v17896_v51 = vld [vmem:[#allocation141_spill] sm:$0xff]  ;;  %v17898_v37 = vld [vmem:[#allocation146_spill] sm:$0xff] }
 0x50e   : > { %17890 = vst [vmem:[#allocation98_spill] sm:$0xff] %v16480_v7  ;;  %17892 = vst [vmem:[#allocation97_spill] sm:$0xff] %v16484_v57  ;;  %v16496_v34 = vmul.f32 %v17896_v51, %v16247_v41  ;;  %v16500_v13 = vmul.f32 %v16247_v41, %v17898_v37  ;;  %v17900_v7 = vld [vmem:[#allocation145_spill] sm:$0xff]  ;;  %v17902_v57 = vld [vmem:[#allocation150_spill] sm:$0xff]  ;;  %v17905_v51 = vunpack.c.l.bf16 %v15934_v63  ;;  %v17906_v37 = vunpack.c.l.bf16 %v15937_v53 }
 0x50f   : > { %17894 = vst [vmem:[#allocation106_spill] sm:$0xff] %v16488_v14  ;;  %v16504_v62 = vmul.f32 %v17900_v7, %v16247_v41  ;;  %v16508_v26 = vmul.f32 %v16247_v41, %v17902_v57  ;;  %v17904_v14 = vld [vmem:[#allocation149_spill] sm:$0xff]  ;;  %v17907_v7 = vunpack.c.l.bf16 %v15940_v42  ;;  %v17908_v57 = vunpack.c.l.bf16 %v15943_v28 }
 0x510   : > { %17897 = vst [vmem:[#allocation105_spill] sm:$0xff] %v16496_v34  ;;  %17899 = vst [vmem:[#allocation114_spill] sm:$0xff] %v16500_v13  ;;  %v16512_v38 = vmul.f32 %v17904_v14, %v16247_v41  ;;  %v8052_v34 = vadd.f32 %v17905_v51, %v16257_v10  ;;  %v8054_v13 = vadd.f32 %v17906_v37, %v16261_v25  ;;  %v17909_v41 = vunpack.c.l.bf16 %v15946_v9 }
 0x511   : > { %17901 = vst [vmem:[#allocation113_spill] sm:$0xff] %v16504_v62  ;;  %17903 = vst [vmem:[#allocation122_spill] sm:$0xff] %v16508_v26  ;;  %v8056_v62 = vadd.f32 %v17907_v7, %v16265_v50  ;;  %v8058_v26 = vadd.f32 %v17908_v57, %v16269_v17  ;;  %v17910_v63 = vunpack.c.l.bf16 %v15949_v15  ;;  %v17911_v51 = vunpack.c.l.bf16 %v15952_v5 }
 0x512   : > { %v8060_v14 = vadd.f32 %v17909_v41, %v16273_v60  ;;  %v17912_v37 = vunpack.c.l.bf16 %v15955_v52  ;;  %v17913_v7 = vunpack.c.l.bf16 %v15958_v6  ;;  %v17914_v57 = vunpack.c.l.bf16 %v15961_v54  ;;  %8180 = vst [vmem:[%s16550_s28] sm:$0xff] %v8052_v34  ;;  %8182 = vst [vmem:[%s16550_s28 + $0x10] sm:$0xff] %v8054_v13 }
 0x513   : > { %v8062_v10 = vadd.f32 %v17910_v63, %v16277_v12  ;;  %v8064_v25 = vadd.f32 %v17911_v51, %v16281_v11  ;;  %v17915_v41 = vunpack.c.l.bf16 %v15964_v4  ;;  %v17916_v12 = vunpack.c.l.bf16 %v15967_v40  ;;  %8184 = vst [vmem:[%s16550_s28 + $0x20] sm:$0xff] %v8056_v62  ;;  %8186 = vst [vmem:[%s16550_s28 + $0x30] sm:$0xff] %v8058_v26 }
 0x514   : > { %v8066_v50 = vadd.f32 %v17912_v37, %v16285_v58  ;;  %v8068_v17 = vadd.f32 %v17913_v7, %v16289_v3  ;;  %v8070_v60 = vadd.f32 %v17914_v57, %v16293_v18  ;;  %v17917_v58 = vunpack.c.l.bf16 %v15975_v2  ;;  %8188 = vst [vmem:[%s16550_s28 + $0x40] sm:$0xff] %v8060_v14  ;;  %v17931_v57 = vld [vmem:[#allocation26_spill] sm:$0xff] }
 0x515   : > { %v8072_v63 = vadd.f32 %v17915_v41, %v16297_v1  ;;  %v8074_v11 = vadd.f32 %v17916_v12, %v16301_v27  ;;  %v17918_v18 = vunpack.c.l.bf16 %v15978_v30  ;;  %v17919_v27 = vunpack.c.l.bf16 %v15981_v39  ;;  %8190 = vst [vmem:[%s16550_s28 + $0x50] sm:$0xff] %v8062_v10  ;;  %8192 = vst [vmem:[%s16550_s28 + $0x60] sm:$0xff] %v8064_v25  ;;  %v17935_v12 = vld [vmem:[#allocation155_spill] sm:$0xff] }
 0x516   : > { %v8076_v3 = vadd.f32 %v17917_v58, %v16305_v0  ;;  %v17920_v34 = vunpack.c.l.bf16 %v15984_v21  ;;  %8194 = vst [vmem:[%s16550_s28 + $0x70] sm:$0xff] %v8066_v50  ;;  %v17921_v0 = vunpack.c.l.bf16 %v15987_v47  ;;  %v17922_v62 = vunpack.c.l.bf16 %v15990_v20  ;;  %8196 = vst [vmem:[%s16550_s28 + $0x80] sm:$0xff] %v8068_v17 }
 0x517   : > { %v8078_v1 = vadd.f32 %v17918_v18, %v16309_v29  ;;  %v8080_v51 = vadd.f32 %v17919_v27, %v16313_v31  ;;  %v17923_v26 = vunpack.c.l.bf16 %v15993_v48  ;;  %v17924_v14 = vunpack.c.l.bf16 %v16000_v19  ;;  %8198 = vst [vmem:[%s16550_s28 + $0x90] sm:$0xff] %v8070_v60  ;;  %8200 = vst [vmem:[%s16550_s28 + $0xa0] sm:$0xff] %v8072_v63  ;;  %v17932_v60 = vld [vmem:[#allocation154_spill] sm:$0xff]  ;;  %v17934_v63 = vld [vmem:[#allocation25_spill] sm:$0xff] }
 0x518   : > { %v8082_v13 = vadd.f32 %v17920_v34, %v16317_v61  ;;  %v8084_v29 = vadd.f32 %v17921_v0, %v16321_v33  ;;  %v8086_v31 = vadd.f32 %v17922_v62, %v16325_v44  ;;  %8202 = vst [vmem:[%s16550_s28 + $0xb0] sm:$0xff] %v8074_v11  ;;  %v17925_v33 = vunpack.c.l.bf16 %v16003_v36  ;;  %8204 = vst [vmem:[%s16550_s28 + $0xc0] sm:$0xff] %v8076_v3  ;;  %v17938_v3 = vld [vmem:[#allocation156_spill] sm:$0xff]  ;;  %v17941_v27 = vld [vmem:[#allocation157_spill] sm:$0xff] }
 0x519   : > { %v8088_v61 = vadd.f32 %v17923_v26, %v16329_v56  ;;  %v8090_v10 = vadd.f32 %v17924_v14, %v16333_v46  ;;  %v17926_v25 = vunpack.c.l.bf16 %v16006_v22  ;;  %v17927_v37 = vunpack.c.l.bf16 %v16013_v23  ;;  %8206 = vst [vmem:[%s16550_s28 + $0xd0] sm:$0xff] %v8078_v1  ;;  %8208 = vst [vmem:[%s16550_s28 + $0xe0] sm:$0xff] %v8080_v51  ;;  %v17940_v1 = vld [vmem:[#allocation29_spill] sm:$0xff]  ;;  %v17944_v0 = vld [vmem:[#allocation158_spill] sm:$0xff] }
 0x51a   : > { %v8092_v44 = vadd.f32 %v17925_v33, %v16337_v45  ;;  %v17928_v50 = vunpack.c.l.bf16 %v16016_v35  ;;  %8210 = vst [vmem:[%s16550_s28 + $0xf0] sm:$0xff] %v8082_v13  ;;  %v17929_v45 = vunpack.c.l.bf16 %v16019_v8  ;;  %v17930_v17 = vunpack.c.l.bf16 %v16026_v16  ;;  %8212 = vst [vmem:[%s16550_s28 + $0x100] sm:$0xff] %v8084_v29  ;;  %v17943_v13 = vld [vmem:[#allocation34_spill] sm:$0xff]  ;;  %v17946_v29 = vld [vmem:[#allocation33_spill] sm:$0xff] }
 0x51b   : > { %v8094_v56 = vadd.f32 %v17926_v25, %v16341_v59  ;;  %v8096_v46 = vadd.f32 %v17927_v37, %v16345_v43  ;;  %v17933_v41 = vunpack.c.l.bf16 %v17932_v60  ;;  %v17936_v11 = vunpack.c.l.bf16 %v17935_v12  ;;  %8214 = vst [vmem:[%s16550_s28 + $0x110] sm:$0xff] %v8086_v31  ;;  %8216 = vst [vmem:[%s16550_s28 + $0x120] sm:$0xff] %v8088_v61  ;;  %v17947_v14 = vld [vmem:[#allocation159_spill] sm:$0xff]  ;;  %v17949_v61 = vld [vmem:[#allocation38_spill] sm:$0xff] }
 0x51c   : > { %v8098_v7 = vadd.f32 %v17928_v50, %v16349_v49  ;;  %v8100_v59 = vadd.f32 %v17929_v45, %v16353_v24  ;;  %v8102_v43 = vadd.f32 %v17930_v17, %v16357_v55  ;;  %8218 = vst [vmem:[%s16550_s28 + $0x130] sm:$0xff] %v8090_v10  ;;  %v17937_v24 = vld [vmem:[#allocation30_spill] sm:$0xff]  ;;  %v17939_v18 = vunpack.c.l.bf16 %v17938_v3  ;;  %8220 = vst [vmem:[%s16550_s28 + $0x140] sm:$0xff] %v8092_v44  ;;  %v17950_v10 = vld [vmem:[#allocation160_spill] sm:$0xff] }
 0x51d   : > { %v8104_v49 = vadd.f32 %v17933_v41, %v17931_v57  ;;  %v8106_v58 = vadd.f32 %v17936_v11, %v17934_v63  ;;  %v17942_v51 = vunpack.c.l.bf16 %v17941_v27  ;;  %v17945_v62 = vunpack.c.l.bf16 %v17944_v0  ;;  %8222 = vst [vmem:[%s16550_s28 + $0x150] sm:$0xff] %v8094_v56  ;;  %8224 = vst [vmem:[%s16550_s28 + $0x160] sm:$0xff] %v8096_v46  ;;  %v17952_v50 = vld [vmem:[#allocation37_spill] sm:$0xff]  ;;  %v17955_v41 = vld [vmem:[#allocation42_spill] sm:$0xff] }
 0x51e   : > { %v8108_v55 = vadd.f32 %v17939_v18, %v17937_v24  ;;  %v17948_v31 = vunpack.c.l.bf16 %v17947_v14  ;;  %8226 = vst [vmem:[%s16550_s28 + $0x170] sm:$0xff] %v8098_v7  ;;  %v17951_v25 = vunpack.c.l.bf16 %v17950_v10  ;;  %v17953_v45 = vld [vmem:[#allocation161_spill] sm:$0xff]  ;;  %v17956_v63 = vld [vmem:[#allocation162_spill] sm:$0xff]  ;;  %v17959_v18 = vld [vmem:[#allocation163_spill] sm:$0xff] }
 0x51f   : > { %v8110_v34 = vadd.f32 %v17942_v51, %v17940_v1  ;;  %v8112_v26 = vadd.f32 %v17945_v62, %v17943_v13  ;;  %v17954_v17 = vunpack.c.l.bf16 %v17953_v45  ;;  %v17957_v11 = vunpack.c.l.bf16 %v17956_v63  ;;  %v17958_v44 = vld [vmem:[#allocation41_spill] sm:$0xff]  ;;  %8228 = vst [vmem:[%s16550_s28 + $0x180] sm:$0xff] %v8100_v59  ;;  %8230 = vst [vmem:[%s16550_s28 + $0x190] sm:$0xff] %v8102_v43  ;;  %v17962_v7 = vld [vmem:[#allocation164_spill] sm:$0xff] }
 0x520   : > { %v8114_v33 = vadd.f32 %v17948_v31, %v17946_v29  ;;  %v8116_v37 = vadd.f32 %v17951_v25, %v17949_v61  ;;  %v17960_v56 = vunpack.c.l.bf16 %v17959_v18  ;;  %8232 = vst [vmem:[%s16550_s28 + $0x1a0] sm:$0xff] %v8104_v49  ;;  %8234 = vst [vmem:[%s16550_s28 + $0x1b0] sm:$0xff] %v8106_v58  ;;  %v17961_v46 = vld [vmem:[#allocation45_spill] sm:$0xff]  ;;  %v17963_v51 = vunpack.c.l.bf16 %v17962_v7  ;;  %v17964_v62 = vld [vmem:[#allocation50_spill] sm:$0xff] }
 0x521   : > { %v8118_v57 = vadd.f32 %v17954_v17, %v17952_v50  ;;  %v8120_v24 = vadd.f32 %v17957_v11, %v17955_v41  ;;  %v17965_v29 = vld [vmem:[#allocation165_spill] sm:$0xff]  ;;  %v17968_v50 = vld [vmem:[#allocation166_spill] sm:$0xff]  ;;  %v17971_v11 = vld [vmem:[#allocation167_spill] sm:$0xff]  ;;  %8236 = vst [vmem:[%s16550_s28 + $0x1c0] sm:$0xff] %v8108_v55 }
 0x522   : > { %v8122_v1 = vadd.f32 %v17960_v56, %v17958_v44  ;;  %v8124_v13 = vadd.f32 %v17963_v51, %v17961_v46  ;;  %v17966_v31 = vunpack.c.l.bf16 %v17965_v29  ;;  %v17967_v25 = vld [vmem:[#allocation49_spill] sm:$0xff]  ;;  %v17969_v17 = vunpack.c.l.bf16 %v17968_v50  ;;  %v17970_v59 = vld [vmem:[#allocation54_spill] sm:$0xff]  ;;  %8238 = vst [vmem:[%s16550_s28 + $0x1d0] sm:$0xff] %v8110_v34  ;;  %8240 = vst [vmem:[%s16550_s28 + $0x1e0] sm:$0xff] %v8112_v26 }
 0x523   : > { %v17972_v43 = vunpack.c.l.bf16 %v17971_v11  ;;  %8242 = vst [vmem:[%s16550_s28 + $0x1f0] sm:$0xff] %v8114_v33  ;;  %v17973_v49 = vld [vmem:[#allocation53_spill] sm:$0xff]  ;;  %v17974_v58 = vld [vmem:[#allocation168_spill] sm:$0xff]  ;;  %v17976_v51 = vld [vmem:[#allocation58_spill] sm:$0xff] }
 0x524   : > { %v8126_v61 = vadd.f32 %v17966_v31, %v17964_v62  ;;  %v8128_v41 = vadd.f32 %v17969_v17, %v17967_v25  ;;  %v17975_v56 = vunpack.c.l.bf16 %v17974_v58  ;;  %v17977_v62 = vld [vmem:[#allocation169_spill] sm:$0xff]  ;;  %v17980_v50 = vld [vmem:[#allocation170_spill] sm:$0xff]  ;;  %8244 = vst [vmem:[%s16550_s28 + $0x200] sm:$0xff] %v8116_v37  ;;  %8246 = vst [vmem:[%s16550_s28 + $0x210] sm:$0xff] %v8118_v57 }
 0x525   : > { %v8130_v44 = vadd.f32 %v17972_v43, %v17970_v59  ;;  %v17978_v31 = vunpack.c.l.bf16 %v17977_v62  ;;  %v17979_v17 = vld [vmem:[#allocation57_spill] sm:$0xff]  ;;  %v17981_v11 = vunpack.c.l.bf16 %v17980_v50  ;;  %v17982_v55 = vld [vmem:[#allocation66_spill] sm:$0xff]  ;;  %v17983_v43 = vld [vmem:[#allocation171_spill] sm:$0xff]  ;;  %8248 = vst [vmem:[%s16550_s28 + $0x220] sm:$0xff] %v8120_v24 }
 0x526   : > { %v8132_v46 = vadd.f32 %v17975_v56, %v17973_v49  ;;  %v17984_v34 = vunpack.c.l.bf16 %v17983_v43  ;;  %8250 = vst [vmem:[%s16550_s28 + $0x230] sm:$0xff] %v8122_v1  ;;  %v17985_v26 = vld [vmem:[#allocation64_spill] sm:$0xff]  ;;  %v17992_v62 = vld [vmem:[#allocation174_spill] sm:$0xff]  ;;  %8252 = vst [vmem:[%s16550_s28 + $0x240] sm:$0xff] %v8124_v13 }
 0x527   : > { %v8134_v25 = vadd.f32 %v17978_v31, %v17976_v51  ;;  %v8136_v59 = vadd.f32 %v17981_v11, %v17979_v17  ;;  %v17986_v33 = vld [vmem:[#allocation172_spill] sm:$0xff]  ;;  %v17988_v51 = vld [vmem:[#allocation74_spill] sm:$0xff]  ;;  %v17989_v31 = vld [vmem:[#allocation173_spill] sm:$0xff]  ;;  %v17993_v43 = vunpack.c.l.bf16 %v17992_v62  ;;  %8254 = vst [vmem:[%s16550_s28 + $0x250] sm:$0xff] %v8126_v61 }
 0x528   : > { %v8138_v29 = vadd.f32 %v17984_v34, %v17982_v55  ;;  %v17987_v49 = vunpack.c.l.bf16 %v17986_v33  ;;  %v17990_v50 = vunpack.c.l.bf16 %v17989_v31  ;;  %v17991_v17 = vld [vmem:[#allocation72_spill] sm:$0xff]  ;;  %v17994_v37 = vld [vmem:[#allocation78_spill] sm:$0xff]  ;;  %v17995_v34 = vld [vmem:[#allocation175_spill] sm:$0xff]  ;;  %8256 = vst [vmem:[%s16550_s28 + $0x260] sm:$0xff] %v8128_v41 }
 0x529   : > { %v8144_v55 = vadd.f32 %v17993_v43, %v17991_v17  ;;  %v17996_v57 = vunpack.c.l.bf16 %v17995_v34  ;;  %8258 = vst [vmem:[%s16550_s28 + $0x270] sm:$0xff] %v8130_v44  ;;  %v17997_v24 = vld [vmem:[#allocation77_spill] sm:$0xff]  ;;  %v17998_v1 = vld [vmem:[#allocation176_spill] sm:$0xff]  ;;  %v18004_v31 = vld [vmem:[#allocation178_spill] sm:$0xff] }
 0x52a   : > { %v8140_v56 = vadd.f32 %v17987_v49, %v17985_v26  ;;  %v8142_v11 = vadd.f32 %v17990_v50, %v17988_v51  ;;  %v17999_v26 = vunpack.c.l.bf16 %v17998_v1  ;;  %v18000_v49 = vld [vmem:[#allocation82_spill] sm:$0xff]  ;;  %v18001_v51 = vld [vmem:[#allocation177_spill] sm:$0xff]  ;;  %v18005_v34 = vunpack.c.l.bf16 %v18004_v31  ;;  %8260 = vst [vmem:[%s16550_s28 + $0x280] sm:$0xff] %v8132_v46  ;;  %8262 = vst [vmem:[%s16550_s28 + $0x290] sm:$0xff] %v8134_v25 }
 0x52b   : > { %v8146_v58 = vadd.f32 %v17996_v57, %v17994_v37  ;;  %v18002_v62 = vunpack.c.l.bf16 %v18001_v51  ;;  %v18003_v17 = vld [vmem:[#allocation81_spill] sm:$0xff]  ;;  %v18006_v13 = vld [vmem:[#allocation86_spill] sm:$0xff]  ;;  %v18007_v57 = vld [vmem:[#allocation179_spill] sm:$0xff]  ;;  %8264 = vst [vmem:[%s16550_s28 + $0x2a0] sm:$0xff] %v8136_v59 }
 0x52c   : > { %v8148_v50 = vadd.f32 %v17999_v26, %v17997_v24  ;;  %v8152_v37 = vadd.f32 %v18005_v34, %v18003_v17  ;;  %v18008_v61 = vunpack.c.l.bf16 %v18007_v57  ;;  %8266 = vst [vmem:[%s16550_s28 + $0x2b0] sm:$0xff] %v8138_v29  ;;  %v18009_v41 = vld [vmem:[#allocation85_spill] sm:$0xff]  ;;  %v18010_v44 = vld [vmem:[#allocation180_spill] sm:$0xff]  ;;  %v18012_v26 = vld [vmem:[#allocation90_spill] sm:$0xff] }
 0x52d   : > { %v8150_v43 = vadd.f32 %v18002_v62, %v18000_v49  ;;  %v18011_v24 = vunpack.c.l.bf16 %v18010_v44  ;;  %v18013_v49 = vld [vmem:[#allocation181_spill] sm:$0xff]  ;;  %v18016_v51 = vld [vmem:[#allocation182_spill] sm:$0xff]  ;;  %8268 = vst [vmem:[%s16550_s28 + $0x2c0] sm:$0xff] %v8140_v56  ;;  %8270 = vst [vmem:[%s16550_s28 + $0x2d0] sm:$0xff] %v8142_v11 }
 0x52e   : > { %v8154_v33 = vadd.f32 %v18008_v61, %v18006_v13  ;;  %v18014_v31 = vunpack.c.l.bf16 %v18013_v49  ;;  %v18015_v17 = vld [vmem:[#allocation89_spill] sm:$0xff]  ;;  %v18017_v57 = vunpack.c.l.bf16 %v18016_v51  ;;  %v18018_v46 = vld [vmem:[#allocation98_spill] sm:$0xff]  ;;  %v18019_v61 = vld [vmem:[#allocation183_spill] sm:$0xff]  ;;  %8272 = vst [vmem:[%s16550_s28 + $0x2e0] sm:$0xff] %v8144_v55 }
 0x52f   : > { %v8156_v62 = vadd.f32 %v18011_v24, %v18009_v41  ;;  %v18020_v25 = vunpack.c.l.bf16 %v18019_v61  ;;  %8274 = vst [vmem:[%s16550_s28 + $0x2f0] sm:$0xff] %v8146_v58  ;;  %v18021_v29 = vld [vmem:[#allocation97_spill] sm:$0xff]  ;;  %v18022_v59 = vld [vmem:[#allocation184_spill] sm:$0xff]  ;;  %v18024_v24 = vld [vmem:[#allocation106_spill] sm:$0xff] }
 0x530   : > { %v8158_v34 = vadd.f32 %v18014_v31, %v18012_v26  ;;  %v8160_v13 = vadd.f32 %v18017_v57, %v18015_v17  ;;  %v18023_v41 = vunpack.c.l.bf16 %v18022_v59  ;;  %v18025_v26 = vld [vmem:[#allocation185_spill] sm:$0xff]  ;;  %v18027_v17 = vld [vmem:[#allocation186_spill] sm:$0xff]  ;;  %8276 = vst [vmem:[%s16550_s28 + $0x300] sm:$0xff] %v8148_v50  ;;  %8278 = vst [vmem:[%s16550_s28 + $0x310] sm:$0xff] %v8150_v43 }
 0x531   : > { %v8162_v1 = vadd.f32 %v18020_v25, %v18018_v46  ;;  %v18026_v51 = vunpack.c.l.bf16 %v18025_v26  ;;  %v18028_v46 = vunpack.c.l.bf16 %v18027_v17  ;;  %v18029_v11 = vld [vmem:[#allocation105_spill] sm:$0xff]  ;;  %v18030_v25 = vld [vmem:[#allocation187_spill] sm:$0xff]  ;;  %8280 = vst [vmem:[%s16550_s28 + $0x320] sm:$0xff] %v8152_v37  ;;  %8282 = vst [vmem:[%s16550_s28 + $0x330] sm:$0xff] %v8154_v33 }
 0x532   : > { %v8164_v31 = vadd.f32 %v18023_v41, %v18021_v29  ;;  %v18031_v55 = vunpack.c.l.bf16 %v18030_v25  ;;  %v18032_v29 = vld [vmem:[#allocation114_spill] sm:$0xff]  ;;  %v18033_v41 = vld [vmem:[#allocation188_spill] sm:$0xff]  ;;  %8284 = vst [vmem:[%s16550_s28 + $0x340] sm:$0xff] %v8156_v62  ;;  %8286 = vst [vmem:[%s16550_s28 + $0x350] sm:$0xff] %v8158_v34 }
 0x533   : > { %v8166_v57 = vadd.f32 %v18026_v51, %v18024_v24  ;;  %v8168_v56 = vadd.f32 %v18028_v46, %v16492_v32  ;;  %v18034_v59 = vunpack.c.l.bf16 %v18033_v41  ;;  %v18035_v51 = vld [vmem:[#allocation113_spill] sm:$0xff]  ;;  %v18038_v32 = vld [vmem:[#allocation122_spill] sm:$0xff]  ;;  %8288 = vst [vmem:[%s16550_s28 + $0x360] sm:$0xff] %v8160_v13  ;;  %8290 = vst [vmem:[%s16550_s28 + $0x370] sm:$0xff] %v8162_v1 }
 0x534   : > { %v8170_v58 = vadd.f32 %v18031_v55, %v18029_v11  ;;  %v18036_v24 = vld [vmem:[#allocation189_spill] sm:$0xff]  ;;  %v18039_v46 = vld [vmem:[#allocation190_spill] sm:$0xff]  ;;  %v18041_v11 = vld [vmem:[#allocation191_spill] sm:$0xff]  ;;  %8292 = vst [vmem:[%s16550_s28 + $0x380] sm:$0xff] %v8164_v31 }
 0x535   : > { %v8172_v61 = vadd.f32 %v18034_v59, %v18032_v29  ;;  %v18037_v49 = vunpack.c.l.bf16 %v18036_v24  ;;  %v18040_v7 = vunpack.c.l.bf16 %v18039_v46  ;;  %v18042_v50 = vunpack.c.l.bf16 %v18041_v11  ;;  %8294 = vst [vmem:[%s16550_s28 + $0x390] sm:$0xff] %v8166_v57  ;;  %8296 = vst [vmem:[%s16550_s28 + $0x3a0] sm:$0xff] %v8168_v56  ;;  %v18044_v13 = vld [vmem:[#allocation28_spill] sm:$0xff]  ;;  %v18045_v57 = vld [vmem:[#allocation27_spill] sm:$0xff] }
 0x536   : > { %8298 = vst [vmem:[%s16550_s28 + $0x3b0] sm:$0xff] %v8170_v58  ;;  %v18048_v58 = vld [vmem:[#allocation36_spill] sm:$0xff]  ;;  %v18055_v62 = vld [vmem:[#allocation47_spill] sm:$0xff]  ;;  %v18060_v33 = vld [vmem:[#allocation62_spill] sm:$0xff] }
 0x537   : > { %v8174_v44 = vadd.f32 %v18037_v49, %v18035_v51  ;;  %v8176_v18 = vadd.f32 %v18040_v7, %v18038_v32  ;;  %v8178_v43 = vadd.f32 %v18042_v50, %v16512_v38  ;;  %v18043_v49 = vld [vmem:[#allocation46_spill] sm:$0xff]  ;;  %8300 = vst [vmem:[%s16550_s28 + $0x3c0] sm:$0xff] %v8172_v61  ;;  %v18046_v61 = vld [vmem:[#allocation32_spill] sm:$0xff]  ;;  %v18049_v51 = vld [vmem:[#allocation35_spill] sm:$0xff] }
 0x538   : > { %v16772_v59 = vadd.f32 1.0, %v18043_v49  ;;  %v18050_v50 = vld [vmem:[#allocation40_spill] sm:$0xff]  ;;  %v18051_v49 = vld [vmem:[#allocation39_spill] sm:$0xff]  ;;  %v18062_v46 = vld [vmem:[#allocation70_spill] sm:$0xff] }
 0x539   : > { %8302 = vst [vmem:[%s16550_s28 + $0x3d0] sm:$0xff] %v8174_v44  ;;  %8304 = vst [vmem:[%s16550_s28 + $0x3e0] sm:$0xff] %v8176_v18  ;;  %v18047_v44 = vld [vmem:[#allocation31_spill] sm:$0xff]  ;;  %v18054_v34 = vld [vmem:[#allocation48_spill] sm:$0xff] }
 0x53a   : > { %8306 = vst [vmem:[%s16550_s28 + $0x3f0] sm:$0xff] %v8178_v43  ;;  %v16784_v31 = vmul.f32 %v16772_v59, %v18044_v13  ;;  %v16788_v56 = vmul.f32 %v18045_v57, %v16772_v59  ;;  %v16792_v18 = vmul.f32 %v16772_v59, %v18046_v61  ;;  %v16796_v55 = vmul.f32 %v18047_v44, %v16772_v59  ;;  %v18052_v57 = vld [vmem:[#allocation44_spill] sm:$0xff]  ;;  %v18053_v44 = vld [vmem:[#allocation43_spill] sm:$0xff] }
 0x53b   : > { %v16800_v29 = vmul.f32 %v16772_v59, %v18048_v58  ;;  %v16804_v32 = vmul.f32 %v18049_v51, %v16772_v59  ;;  %v16808_v43 = vmul.f32 %v16772_v59, %v18050_v50  ;;  %v16812_v13 = vmul.f32 %v18051_v49, %v16772_v59  ;;  %v18056_v1 = vld [vmem:[#allocation52_spill] sm:$0xff]  ;;  %v18057_v38 = vld [vmem:[#allocation51_spill] sm:$0xff] }
 0x53c   : > { %v16816_v61 = vmul.f32 %v16772_v59, %v18052_v57  ;;  %v16820_v58 = vmul.f32 %v18053_v44, %v16772_v59  ;;  %v16824_v51 = vmul.f32 %v16772_v59, %v18054_v34  ;;  %v16828_v50 = vmul.f32 %v18055_v62, %v16772_v59  ;;  %v18058_v7 = vld [vmem:[#allocation56_spill] sm:$0xff]  ;;  %v18059_v37 = vld [vmem:[#allocation55_spill] sm:$0xff] }
 0x53d   : > { %v16832_v49 = vmul.f32 %v16772_v59, %v18056_v1  ;;  %v16836_v57 = vmul.f32 %v18057_v38, %v16772_v59  ;;  %v16840_v44 = vmul.f32 %v16772_v59, %v18058_v7  ;;  %v16844_v34 = vmul.f32 %v18059_v37, %v16772_v59  ;;  %v18061_v11 = vld [vmem:[#allocation60_spill] sm:$0xff]  ;;  %v18065_v25 = vld [vmem:[#allocation75_spill] sm:$0xff] }
 0x53e   : > { %v16848_v62 = vmul.f32 %v16772_v59, %v18060_v33  ;;  %v16852_v1 = vmul.f32 %v18061_v11, %v16772_v59  ;;  %v16856_v38 = vmul.f32 %v16772_v59, %v18062_v46  ;;  %v18063_v24 = vld [vmem:[#allocation68_spill] sm:$0xff]  ;;  %v16868_v33 = vmul.f32 %v18065_v25, %v16772_v59  ;;  %v18067_v26 = vld [vmem:[#allocation79_spill] sm:$0xff] }
 0x53f   : > { %v16860_v7 = vmul.f32 %v18063_v24, %v16772_v59  ;;  %v18064_v41 = vld [vmem:[#allocation76_spill] sm:$0xff]  ;;  %v16876_v46 = vmul.f32 %v18067_v26, %v16772_v59  ;;  %v18069_v45 = vld [vmem:[#allocation83_spill] sm:$0xff] }
 0x540   : > { %v16864_v37 = vmul.f32 %v16772_v59, %v18064_v41  ;;  %v18066_v17 = vld [vmem:[#allocation80_spill] sm:$0xff]  ;;  %v16884_v41 = vmul.f32 %v18069_v45, %v16772_v59  ;;  %v18071_v14 = vld [vmem:[#allocation87_spill] sm:$0xff] }
 0x541   : > { %v16872_v11 = vmul.f32 %v16772_v59, %v18066_v17  ;;  %v18068_v63 = vld [vmem:[#allocation84_spill] sm:$0xff]  ;;  %v16892_v17 = vmul.f32 %v18071_v14, %v16772_v59  ;;  %v18075_v27 = vld [vmem:[#allocation91_spill] sm:$0xff] }
 0x542   : > { %v16880_v24 = vmul.f32 %v16772_v59, %v18068_v63  ;;  %v18070_v10 = vld [vmem:[#allocation88_spill] sm:$0xff]  ;;  %v16900_v63 = vmul.f32 %v18075_v27, %v16772_v59  ;;  %v18079_v12 = vld [vmem:[#allocation99_spill] sm:$0xff] }
 0x543   : > { %v16888_v25 = vmul.f32 %v16772_v59, %v18070_v10  ;;  %18072 = vst [vmem:[#allocation121_spill] sm:$0xff] %v16892_v17  ;;  %v18073_v0 = vld [vmem:[#allocation92_spill] sm:$0xff]  ;;  %v16908_v10 = vmul.f32 %v18079_v12, %v16772_v59  ;;  %v18083_v17 = vld [vmem:[#allocation107_spill] sm:$0xff] }
 0x544   : > { %v16896_v26 = vmul.f32 %v16772_v59, %v18073_v0  ;;  %18076 = vst [vmem:[#allocation59_spill] sm:$0xff] %v16900_v63  ;;  %v18077_v3 = vld [vmem:[#allocation100_spill] sm:$0xff]  ;;  %v16916_v0 = vmul.f32 %v18083_v17, %v16772_v59  ;;  %v18087_v63 = vld [vmem:[#allocation115_spill] sm:$0xff] }
 0x545   : > { %v16904_v45 = vmul.f32 %v16772_v59, %v18077_v3  ;;  %18080 = vst [vmem:[#allocation67_spill] sm:$0xff] %v16908_v10  ;;  %v18081_v60 = vld [vmem:[#allocation108_spill] sm:$0xff]  ;;  %v16924_v3 = vmul.f32 %v18087_v63, %v16772_v59  ;;  %v18091_v10 = vld [vmem:[#allocation123_spill] sm:$0xff] }
 0x546   : > { %18074 = vst [vmem:[#allocation61_spill] sm:$0xff] %v16896_v26  ;;  %v16912_v14 = vmul.f32 %v16772_v59, %v18081_v60  ;;  %18084 = vst [vmem:[#allocation93_spill] sm:$0xff] %v16916_v0  ;;  %v18085_v26 = vld [vmem:[#allocation116_spill] sm:$0xff]  ;;  %v16932_v60 = vmul.f32 %v18091_v10, %v16772_v59  ;;  %v18095_v0 = vld [vmem:[#allocation63_spill] sm:$0xff] }
 0x547   : > { %18078 = vst [vmem:[#allocation69_spill] sm:$0xff] %v16904_v45  ;;  %v16920_v27 = vmul.f32 %v16772_v59, %v18085_v26  ;;  %18088 = vst [vmem:[#allocation101_spill] sm:$0xff] %v16924_v3  ;;  %v18089_v45 = vld [vmem:[#allocation124_spill] sm:$0xff]  ;;  %v16940_v26 = vmul.f32 %v18095_v0, %v16772_v59  ;;  %v18099_v3 = vld [vmem:[#allocation71_spill] sm:$0xff] }
 0x548   : > { %18082 = vst [vmem:[#allocation94_spill] sm:$0xff] %v16912_v14  ;;  %v16928_v12 = vmul.f32 %v16772_v59, %v18089_v45  ;;  %18092 = vst [vmem:[#allocation109_spill] sm:$0xff] %v16932_v60  ;;  %v18093_v14 = vld [vmem:[#allocation65_spill] sm:$0xff]  ;;  %v16948_v45 = vmul.f32 %v18099_v3, %v16772_v59  ;;  %v18103_v60 = vld [vmem:[#allocation95_spill] sm:$0xff] }
 0x549   : > { %18086 = vst [vmem:[#allocation102_spill] sm:$0xff] %v16920_v27  ;;  %v16936_v17 = vmul.f32 %v16772_v59, %v18093_v14  ;;  %18096 = vst [vmem:[#allocation117_spill] sm:$0xff] %v16940_v26  ;;  %v18097_v27 = vld [vmem:[#allocation73_spill] sm:$0xff]  ;;  %v16956_v14 = vmul.f32 %v18103_v60, %v16772_v59  ;;  %v18107_v26 = vld [vmem:[#allocation103_spill] sm:$0xff] }
 0x54a   : > { %18090 = vst [vmem:[#allocation110_spill] sm:$0xff] %v16928_v12  ;;  %v16944_v63 = vmul.f32 %v16772_v59, %v18097_v27  ;;  %18100 = vst [vmem:[#allocation125_spill] sm:$0xff] %v16948_v45  ;;  %v18101_v12 = vld [vmem:[#allocation96_spill] sm:$0xff]  ;;  %v16964_v27 = vmul.f32 %v18107_v26, %v16772_v59  ;;  %v18111_v45 = vld [vmem:[#allocation111_spill] sm:$0xff] }
 0x54b   : > { %18094 = vst [vmem:[#allocation118_spill] sm:$0xff] %v16936_v17  ;;  %v16952_v10 = vmul.f32 %v16772_v59, %v18101_v12  ;;  %18104 = vst [vmem:[#allocation129_spill] sm:$0xff] %v16956_v14  ;;  %v18105_v17 = vld [vmem:[#allocation104_spill] sm:$0xff]  ;;  %v16972_v12 = vmul.f32 %v18111_v45, %v16772_v59  ;;  %v18115_v14 = vld [vmem:[#allocation119_spill] sm:$0xff] }
 0x54c   : > { %18098 = vst [vmem:[#allocation126_spill] sm:$0xff] %v16944_v63  ;;  %v16960_v0 = vmul.f32 %v16772_v59, %v18105_v17  ;;  %18108 = vst [vmem:[#allocation133_spill] sm:$0xff] %v16964_v27  ;;  %v18109_v63 = vld [vmem:[#allocation112_spill] sm:$0xff]  ;;  %v16980_v17 = vmul.f32 %v18115_v14, %v16772_v59  ;;  %v18119_v27 = vld [vmem:[#allocation127_spill] sm:$0xff] }
 0x54d   : > { %18102 = vst [vmem:[#allocation130_spill] sm:$0xff] %v16952_v10  ;;  %v16968_v3 = vmul.f32 %v16772_v59, %v18109_v63  ;;  %18112 = vst [vmem:[#allocation137_spill] sm:$0xff] %v16972_v12  ;;  %v18113_v10 = vld [vmem:[#allocation120_spill] sm:$0xff]  ;;  %v16988_v63 = vmul.f32 %v18119_v27, %v16772_v59  ;;  %v18123_v12 = vld [vmem:[#allocation131_spill] sm:$0xff] }
 0x54e   : > { %18106 = vst [vmem:[#allocation134_spill] sm:$0xff] %v16960_v0  ;;  %v16976_v60 = vmul.f32 %v16772_v59, %v18113_v10  ;;  %18116 = vst [vmem:[#allocation141_spill] sm:$0xff] %v16980_v17  ;;  %v18117_v0 = vld [vmem:[#allocation128_spill] sm:$0xff]  ;;  %v16996_v10 = vmul.f32 %v18123_v12, %v16772_v59  ;;  %v18127_v17 = vld [vmem:[#allocation135_spill] sm:$0xff] }
 0x54f   : > { %18110 = vst [vmem:[#allocation138_spill] sm:$0xff] %v16968_v3  ;;  %v16984_v26 = vmul.f32 %v16772_v59, %v18117_v0  ;;  %18120 = vst [vmem:[#allocation145_spill] sm:$0xff] %v16988_v63  ;;  %v18121_v3 = vld [vmem:[#allocation132_spill] sm:$0xff]  ;;  %v17004_v0 = vmul.f32 %v18127_v17, %v16772_v59  ;;  %v18131_v63 = vld [vmem:[#allocation139_spill] sm:$0xff] }
 0x550   : > { %18114 = vst [vmem:[#allocation142_spill] sm:$0xff] %v16976_v60  ;;  %v16992_v45 = vmul.f32 %v16772_v59, %v18121_v3  ;;  %18124 = vst [vmem:[#allocation149_spill] sm:$0xff] %v16996_v10  ;;  %v18125_v60 = vld [vmem:[#allocation136_spill] sm:$0xff]  ;;  %v17012_v3 = vmul.f32 %v18131_v63, %v16772_v59  ;;  %v18135_v10 = vld [vmem:[#allocation143_spill] sm:$0xff] }
 0x551   : > { %18118 = vst [vmem:[#allocation146_spill] sm:$0xff] %v16984_v26  ;;  %v17000_v14 = vmul.f32 %v16772_v59, %v18125_v60  ;;  %18128 = vst [vmem:[#allocation25_spill] sm:$0xff] %v17004_v0  ;;  %v18129_v26 = vld [vmem:[#allocation140_spill] sm:$0xff]  ;;  %v17020_v60 = vmul.f32 %v18135_v10, %v16772_v59  ;;  %v18139_v0 = vld [vmem:[#allocation147_spill] sm:$0xff] }
 0x552   : > { %18122 = vst [vmem:[#allocation150_spill] sm:$0xff] %v16992_v45  ;;  %v17008_v27 = vmul.f32 %v16772_v59, %v18129_v26  ;;  %18132 = vst [vmem:[#allocation29_spill] sm:$0xff] %v17012_v3  ;;  %v18133_v45 = vld [vmem:[#allocation144_spill] sm:$0xff]  ;;  %v17028_v26 = vmul.f32 %v18139_v0, %v16772_v59  ;;  %v18144_v10 = vld [vmem:[#allocation153_spill] sm:$0xff] }
 0x553   : > { %18126 = vst [vmem:[#allocation26_spill] sm:$0xff] %v17000_v14  ;;  %v17016_v12 = vmul.f32 %v16772_v59, %v18133_v45  ;;  %18136 = vst [vmem:[#allocation33_spill] sm:$0xff] %v17020_v60  ;;  %v18137_v14 = vld [vmem:[#allocation148_spill] sm:$0xff]  ;;  %v18143_v45 = vld [vmem:[#allocation151_spill] sm:$0xff]  ;;  %v18145_v60 = vunpack.c.h.bf16 %v18144_v10  ;;  %v18150_v10 = vunpack.c.h.bf16 %v15949_v15  ;;  %v18154_v15 = vunpack.c.h.bf16 %v15961_v54 }
 0x554   : > { %18130 = vst [vmem:[#allocation30_spill] sm:$0xff] %v17008_v27  ;;  %v17024_v17 = vmul.f32 %v16772_v59, %v18137_v14  ;;  %18140 = vst [vmem:[#allocation37_spill] sm:$0xff] %v17028_v26  ;;  %v18141_v27 = vld [vmem:[#allocation152_spill] sm:$0xff]  ;;  %v18147_v26 = vunpack.c.h.bf16 %v15940_v42  ;;  %v18152_v42 = vunpack.c.h.bf16 %v15955_v52  ;;  %v18157_v52 = vunpack.c.h.bf16 %v15975_v2 }
 0x555   : > { %18134 = vst [vmem:[#allocation34_spill] sm:$0xff] %v17016_v12  ;;  %v17032_v63 = vmul.f32 %v16772_v59, %v18141_v27  ;;  %v17036_v12 = vmul.f32 %v18143_v45, %v16772_v59  ;;  %v8053_v14 = vadd.f32 %v18145_v60, %v16784_v31  ;;  %v18148_v27 = vunpack.c.h.bf16 %v15943_v28 }
 0x556   : > { %18138 = vst [vmem:[#allocation38_spill] sm:$0xff] %v17024_v17  ;;  %v18146_v17 = vunpack.c.h.bf16 %v15937_v53  ;;  %v8057_v3 = vadd.f32 %v18147_v26, %v16792_v18  ;;  %v18149_v59 = vunpack.c.h.bf16 %v15946_v9  ;;  %v8063_v31 = vadd.f32 %v18150_v10, %v16804_v32 }
 0x557   : > { %18142 = vst [vmem:[#allocation42_spill] sm:$0xff] %v17032_v63  ;;  %v8059_v63 = vadd.f32 %v18148_v27, %v16796_v55  ;;  %v18151_v53 = vunpack.c.h.bf16 %v15952_v5  ;;  %v8067_v28 = vadd.f32 %v18152_v42, %v16812_v13  ;;  %v18153_v18 = vunpack.c.h.bf16 %v15958_v6  ;;  %8181 = vst [vmem:[%s16550_s28 + $0x8] sm:$0xff] %v8053_v14  ;;  %v18183_v14 = vld [vmem:[#allocation158_spill] sm:$0xff] }
 0x558   : > { %v8055_v0 = vadd.f32 %v18146_v17, %v16788_v56  ;;  %v8061_v45 = vadd.f32 %v18149_v59, %v16800_v29  ;;  %v8071_v55 = vadd.f32 %v18154_v15, %v16820_v58  ;;  %v18155_v29 = vunpack.c.h.bf16 %v15964_v4  ;;  %8185 = vst [vmem:[%s16550_s28 + $0x28] sm:$0xff] %v8057_v3  ;;  %8191 = vst [vmem:[%s16550_s28 + $0x58] sm:$0xff] %v8063_v31  ;;  %v18180_v17 = vld [vmem:[#allocation157_spill] sm:$0xff]  ;;  %v18185_v59 = vld [vmem:[#allocation67_spill] sm:$0xff] }
 0x559   : > { %v8065_v56 = vadd.f32 %v18151_v53, %v16808_v43  ;;  %v8069_v9 = vadd.f32 %v18153_v18, %v16816_v61  ;;  %v18156_v32 = vunpack.c.h.bf16 %v15967_v40  ;;  %8187 = vst [vmem:[%s16550_s28 + $0x38] sm:$0xff] %v8059_v63  ;;  %v8077_v6 = vadd.f32 %v18157_v52, %v16832_v49  ;;  %8195 = vst [vmem:[%s16550_s28 + $0x78] sm:$0xff] %v8067_v28  ;;  %v18182_v63 = vld [vmem:[#allocation69_spill] sm:$0xff]  ;;  %v18188_v53 = vld [vmem:[#allocation94_spill] sm:$0xff] }
 0x55a   : > { %v8073_v5 = vadd.f32 %v18155_v29, %v16824_v51  ;;  %8183 = vst [vmem:[%s16550_s28 + $0x18] sm:$0xff] %v8055_v0  ;;  %v18158_v54 = vunpack.c.h.bf16 %v15978_v30  ;;  %v18159_v40 = vunpack.c.h.bf16 %v15981_v39  ;;  %v18160_v61 = vunpack.c.h.bf16 %v15984_v21  ;;  %8189 = vst [vmem:[%s16550_s28 + $0x48] sm:$0xff] %v8061_v45  ;;  %v18186_v45 = vld [vmem:[#allocation159_spill] sm:$0xff]  ;;  %v18191_v18 = vld [vmem:[#allocation93_spill] sm:$0xff] }
 0x55b   : > { %v8075_v43 = vadd.f32 %v18156_v32, %v16828_v50  ;;  %8193 = vst [vmem:[%s16550_s28 + $0x68] sm:$0xff] %v8065_v56  ;;  %v18161_v2 = vunpack.c.h.bf16 %v15987_v47  ;;  %v18162_v39 = vunpack.c.h.bf16 %v15990_v20  ;;  %v18163_v21 = vunpack.c.h.bf16 %v15993_v48  ;;  %8197 = vst [vmem:[%s16550_s28 + $0x88] sm:$0xff] %v8069_v9  ;;  %v18189_v56 = vld [vmem:[#allocation160_spill] sm:$0xff]  ;;  %v18192_v9 = vld [vmem:[#allocation161_spill] sm:$0xff] }
 0x55c   : > { %v8079_v4 = vadd.f32 %v18158_v54, %v16836_v57  ;;  %v8081_v13 = vadd.f32 %v18159_v40, %v16840_v44  ;;  %v8083_v58 = vadd.f32 %v18160_v61, %v16844_v34  ;;  %v18164_v49 = vunpack.c.h.bf16 %v16000_v19  ;;  %8199 = vst [vmem:[%s16550_s28 + $0x98] sm:$0xff] %v8071_v55  ;;  %8201 = vst [vmem:[%s16550_s28 + $0xa8] sm:$0xff] %v8073_v5  ;;  %v18194_v29 = vld [vmem:[#allocation102_spill] sm:$0xff]  ;;  %v18197_v52 = vld [vmem:[#allocation101_spill] sm:$0xff] }
 0x55d   : > { %v8085_v30 = vadd.f32 %v18161_v2, %v16848_v62  ;;  %v8087_v51 = vadd.f32 %v18162_v39, %v16852_v1  ;;  %v8089_v50 = vadd.f32 %v18163_v21, %v16856_v38  ;;  %8203 = vst [vmem:[%s16550_s28 + $0xb8] sm:$0xff] %v8075_v43  ;;  %v18165_v47 = vunpack.c.h.bf16 %v16003_v36  ;;  %8205 = vst [vmem:[%s16550_s28 + $0xc8] sm:$0xff] %v8077_v6  ;;  %v18195_v5 = vld [vmem:[#allocation162_spill] sm:$0xff]  ;;  %v18198_v6 = vld [vmem:[#allocation163_spill] sm:$0xff] }
 0x55e   : > { %v8091_v57 = vadd.f32 %v18164_v49, %v16860_v7  ;;  %v18166_v48 = vunpack.c.h.bf16 %v16006_v22  ;;  %v18167_v19 = vunpack.c.h.bf16 %v16013_v23  ;;  %v18168_v62 = vunpack.c.h.bf16 %v16016_v35  ;;  %8207 = vst [vmem:[%s16550_s28 + $0xd8] sm:$0xff] %v8079_v4  ;;  %8209 = vst [vmem:[%s16550_s28 + $0xe8] sm:$0xff] %v8081_v13  ;;  %v18171_v7 = vld [vmem:[#allocation154_spill] sm:$0xff]  ;;  %v18201_v13 = vld [vmem:[#allocation164_spill] sm:$0xff] }
 0x55f   : > { %v8093_v20 = vadd.f32 %v18165_v47, %v16864_v37  ;;  %8211 = vst [vmem:[%s16550_s28 + $0xf8] sm:$0xff] %v8083_v58  ;;  %v18169_v36 = vunpack.c.h.bf16 %v16019_v8  ;;  %v18170_v23 = vunpack.c.h.bf16 %v16026_v16  ;;  %v18172_v35 = vunpack.c.h.bf16 %v18171_v7  ;;  %8213 = vst [vmem:[%s16550_s28 + $0x108] sm:$0xff] %v8085_v30  ;;  %v18176_v8 = vld [vmem:[#allocation61_spill] sm:$0xff]  ;;  %v18200_v40 = vld [vmem:[#allocation110_spill] sm:$0xff] }
 0x560   : > { %v8095_v44 = vadd.f32 %v18166_v48, %v16868_v33  ;;  %v8097_v34 = vadd.f32 %v18167_v19, %v16872_v11  ;;  %v8099_v1 = vadd.f32 %v18168_v62, %v16876_v46  ;;  %v18173_v33 = vld [vmem:[#allocation121_spill] sm:$0xff]  ;;  %v18174_v11 = vld [vmem:[#allocation155_spill] sm:$0xff]  ;;  %8215 = vst [vmem:[%s16550_s28 + $0x118] sm:$0xff] %v8087_v51  ;;  %8217 = vst [vmem:[%s16550_s28 + $0x128] sm:$0xff] %v8089_v50  ;;  %v18181_v26 = vunpack.c.h.bf16 %v18180_v17 }
 0x561   : > { %v8101_v22 = vadd.f32 %v18169_v36, %v16880_v24  ;;  %v8103_v38 = vadd.f32 %v18170_v23, %v16884_v41  ;;  %v8105_v37 = vadd.f32 %v18172_v35, %v16888_v25  ;;  %v18175_v46 = vunpack.c.h.bf16 %v18174_v11  ;;  %8219 = vst [vmem:[%s16550_s28 + $0x138] sm:$0xff] %v8091_v57  ;;  %v18177_v24 = vld [vmem:[#allocation156_spill] sm:$0xff]  ;;  %v18179_v41 = vld [vmem:[#allocation59_spill] sm:$0xff]  ;;  %8221 = vst [vmem:[%s16550_s28 + $0x148] sm:$0xff] %v8093_v20 }
 0x562   : > { %v18178_v60 = vunpack.c.h.bf16 %v18177_v24  ;;  %v8111_v25 = vadd.f32 %v18181_v26, %v18179_v41  ;;  %v18184_v0 = vunpack.c.h.bf16 %v18183_v14  ;;  %v18187_v10 = vunpack.c.h.bf16 %v18186_v45  ;;  %8223 = vst [vmem:[%s16550_s28 + $0x158] sm:$0xff] %v8095_v44  ;;  %8225 = vst [vmem:[%s16550_s28 + $0x168] sm:$0xff] %v8097_v34  ;;  %v18203_v2 = vld [vmem:[#allocation109_spill] sm:$0xff]  ;;  %v18206_v21 = vld [vmem:[#allocation118_spill] sm:$0xff] }
 0x563   : > { %v8107_v3 = vadd.f32 %v18175_v46, %v18173_v33  ;;  %8227 = vst [vmem:[%s16550_s28 + $0x178] sm:$0xff] %v8099_v1  ;;  %v18190_v42 = vunpack.c.h.bf16 %v18189_v56  ;;  %v18193_v15 = vunpack.c.h.bf16 %v18192_v9  ;;  %v18196_v32 = vunpack.c.h.bf16 %v18195_v5  ;;  %8229 = vst [vmem:[%s16550_s28 + $0x188] sm:$0xff] %v8101_v22  ;;  %v18204_v30 = vld [vmem:[#allocation165_spill] sm:$0xff]  ;;  %v18207_v50 = vld [vmem:[#allocation166_spill] sm:$0xff] }
 0x564   : > { %v8109_v16 = vadd.f32 %v18178_v60, %v18176_v8  ;;  %v8113_v27 = vadd.f32 %v18184_v0, %v18182_v63  ;;  %v8115_v31 = vadd.f32 %v18187_v10, %v18185_v59  ;;  %v18199_v54 = vunpack.c.h.bf16 %v18198_v6  ;;  %8231 = vst [vmem:[%s16550_s28 + $0x198] sm:$0xff] %v8103_v38  ;;  %8233 = vst [vmem:[%s16550_s28 + $0x1a8] sm:$0xff] %v8105_v37  ;;  %v18209_v47 = vld [vmem:[#allocation117_spill] sm:$0xff]  ;;  %v18210_v20 = vld [vmem:[#allocation167_spill] sm:$0xff] }
 0x565   : > { %v8117_v28 = vadd.f32 %v18190_v42, %v18188_v53  ;;  %v8119_v55 = vadd.f32 %v18193_v15, %v18191_v18  ;;  %v8121_v43 = vadd.f32 %v18196_v32, %v18194_v29  ;;  %8235 = vst [vmem:[%s16550_s28 + $0x1b8] sm:$0xff] %v8107_v3  ;;  %v18202_v61 = vunpack.c.h.bf16 %v18201_v13  ;;  %8239 = vst [vmem:[%s16550_s28 + $0x1d8] sm:$0xff] %v8111_v25  ;;  %v18212_v19 = vld [vmem:[#allocation126_spill] sm:$0xff]  ;;  %v18213_v34 = vld [vmem:[#allocation168_spill] sm:$0xff] }
 0x566   : > { %v8123_v4 = vadd.f32 %v18199_v54, %v18197_v52  ;;  %v18205_v39 = vunpack.c.h.bf16 %v18204_v30  ;;  %v18208_v49 = vunpack.c.h.bf16 %v18207_v50  ;;  %v18211_v48 = vunpack.c.h.bf16 %v18210_v20  ;;  %8237 = vst [vmem:[%s16550_s28 + $0x1c8] sm:$0xff] %v8109_v16  ;;  %8241 = vst [vmem:[%s16550_s28 + $0x1e8] sm:$0xff] %v8113_v27  ;;  %v18215_v36 = vld [vmem:[#allocation125_spill] sm:$0xff]  ;;  %v18218_v7 = vld [vmem:[#allocation130_spill] sm:$0xff] }
 0x567   : > { %v8125_v58 = vadd.f32 %v18202_v61, %v18200_v40  ;;  %8243 = vst [vmem:[%s16550_s28 + $0x1f8] sm:$0xff] %v8115_v31  ;;  %v18214_v62 = vunpack.c.h.bf16 %v18213_v34  ;;  %v18216_v22 = vld [vmem:[#allocation169_spill] sm:$0xff]  ;;  %v18219_v35 = vld [vmem:[#allocation170_spill] sm:$0xff]  ;;  %v18222_v46 = vld [vmem:[#allocation171_spill] sm:$0xff] }
 0x568   : > { %v8127_v51 = vadd.f32 %v18205_v39, %v18203_v2  ;;  %v8129_v57 = vadd.f32 %v18208_v49, %v18206_v21  ;;  %v8131_v44 = vadd.f32 %v18211_v48, %v18209_v47  ;;  %v18217_v23 = vunpack.c.h.bf16 %v18216_v22  ;;  %v18221_v11 = vld [vmem:[#allocation129_spill] sm:$0xff]  ;;  %8245 = vst [vmem:[%s16550_s28 + $0x208] sm:$0xff] %v8117_v28  ;;  %8247 = vst [vmem:[%s16550_s28 + $0x218] sm:$0xff] %v8119_v55  ;;  %v18224_v24 = vld [vmem:[#allocation134_spill] sm:$0xff] }
 0x569   : > { %v8133_v1 = vadd.f32 %v18214_v62, %v18212_v19  ;;  %v18220_v37 = vunpack.c.h.bf16 %v18219_v35  ;;  %v18223_v3 = vunpack.c.h.bf16 %v18222_v46  ;;  %8249 = vst [vmem:[%s16550_s28 + $0x228] sm:$0xff] %v8121_v43  ;;  %8251 = vst [vmem:[%s16550_s28 + $0x238] sm:$0xff] %v8123_v4  ;;  %v18225_v60 = vld [vmem:[#allocation172_spill] sm:$0xff]  ;;  %v18227_v17 = vld [vmem:[#allocation133_spill] sm:$0xff] }
 0x56a   : > { %v8135_v38 = vadd.f32 %v18217_v23, %v18215_v36  ;;  %v18226_v16 = vunpack.c.h.bf16 %v18225_v60  ;;  %v18228_v26 = vld [vmem:[#allocation173_spill] sm:$0xff]  ;;  %v18230_v14 = vld [vmem:[#allocation138_spill] sm:$0xff]  ;;  %v18234_v10 = vld [vmem:[#allocation175_spill] sm:$0xff]  ;;  %8253 = vst [vmem:[%s16550_s28 + $0x248] sm:$0xff] %v8125_v58 }
 0x56b   : > { %v8137_v33 = vadd.f32 %v18220_v37, %v18218_v7  ;;  %v8139_v8 = vadd.f32 %v18223_v3, %v18221_v11  ;;  %v18229_v25 = vunpack.c.h.bf16 %v18228_v26  ;;  %v18231_v0 = vld [vmem:[#allocation174_spill] sm:$0xff]  ;;  %v18233_v45 = vld [vmem:[#allocation137_spill] sm:$0xff]  ;;  %v18235_v31 = vunpack.c.h.bf16 %v18234_v10  ;;  %8255 = vst [vmem:[%s16550_s28 + $0x258] sm:$0xff] %v8127_v51  ;;  %8257 = vst [vmem:[%s16550_s28 + $0x268] sm:$0xff] %v8129_v57 }
 0x56c   : > { %v8141_v41 = vadd.f32 %v18226_v16, %v18224_v24  ;;  %v18232_v27 = vunpack.c.h.bf16 %v18231_v0  ;;  %8259 = vst [vmem:[%s16550_s28 + $0x278] sm:$0xff] %v8131_v44  ;;  %v18236_v56 = vld [vmem:[#allocation142_spill] sm:$0xff]  ;;  %v18237_v42 = vld [vmem:[#allocation176_spill] sm:$0xff]  ;;  %v18239_v9 = vld [vmem:[#allocation141_spill] sm:$0xff] }
 0x56d   : > { %v8143_v63 = vadd.f32 %v18229_v25, %v18227_v17  ;;  %v8147_v53 = vadd.f32 %v18235_v31, %v18233_v45  ;;  %v18238_v28 = vunpack.c.h.bf16 %v18237_v42  ;;  %v18240_v15 = vld [vmem:[#allocation177_spill] sm:$0xff]  ;;  %v18242_v5 = vld [vmem:[#allocation146_spill] sm:$0xff]  ;;  %v18246_v54 = vld [vmem:[#allocation179_spill] sm:$0xff]  ;;  %8261 = vst [vmem:[%s16550_s28 + $0x288] sm:$0xff] %v8133_v1 }
 0x56e   : > { %v8145_v59 = vadd.f32 %v18232_v27, %v18230_v14  ;;  %v18241_v55 = vunpack.c.h.bf16 %v18240_v15  ;;  %v18243_v32 = vld [vmem:[#allocation178_spill] sm:$0xff]  ;;  %v18245_v6 = vld [vmem:[#allocation145_spill] sm:$0xff]  ;;  %v18247_v4 = vunpack.c.h.bf16 %v18246_v54  ;;  %8263 = vst [vmem:[%s16550_s28 + $0x298] sm:$0xff] %v8135_v38  ;;  %8265 = vst [vmem:[%s16550_s28 + $0x2a8] sm:$0xff] %v8137_v33 }
 0x56f   : > { %v8149_v18 = vadd.f32 %v18238_v28, %v18236_v56  ;;  %v18244_v43 = vunpack.c.h.bf16 %v18243_v32  ;;  %8267 = vst [vmem:[%s16550_s28 + $0x2b8] sm:$0xff] %v8139_v8  ;;  %v18248_v13 = vld [vmem:[#allocation150_spill] sm:$0xff]  ;;  %v18249_v61 = vld [vmem:[#allocation180_spill] sm:$0xff]  ;;  %v18251_v30 = vld [vmem:[#allocation149_spill] sm:$0xff] }
 0x570   : > { %v8151_v29 = vadd.f32 %v18241_v55, %v18239_v9  ;;  %v8155_v40 = vadd.f32 %v18247_v4, %v18245_v6  ;;  %v18250_v58 = vunpack.c.h.bf16 %v18249_v61  ;;  %v18252_v39 = vld [vmem:[#allocation181_spill] sm:$0xff]  ;;  %v18254_v50 = vld [vmem:[#allocation26_spill] sm:$0xff]  ;;  %v18258_v48 = vld [vmem:[#allocation183_spill] sm:$0xff]  ;;  %8269 = vst [vmem:[%s16550_s28 + $0x2c8] sm:$0xff] %v8141_v41 }
 0x571   : > { %v8153_v52 = vadd.f32 %v18244_v43, %v18242_v5  ;;  %v18253_v51 = vunpack.c.h.bf16 %v18252_v39  ;;  %v18255_v49 = vld [vmem:[#allocation182_spill] sm:$0xff]  ;;  %v18257_v20 = vld [vmem:[#allocation25_spill] sm:$0xff]  ;;  %v18259_v44 = vunpack.c.h.bf16 %v18258_v48  ;;  %8271 = vst [vmem:[%s16550_s28 + $0x2d8] sm:$0xff] %v8143_v63  ;;  %8273 = vst [vmem:[%s16550_s28 + $0x2e8] sm:$0xff] %v8145_v59 }
 0x572   : > { %v8157_v2 = vadd.f32 %v18250_v58, %v18248_v13  ;;  %v18256_v57 = vunpack.c.h.bf16 %v18255_v49  ;;  %8275 = vst [vmem:[%s16550_s28 + $0x2f8] sm:$0xff] %v8147_v53  ;;  %v18260_v34 = vld [vmem:[#allocation30_spill] sm:$0xff]  ;;  %v18261_v62 = vld [vmem:[#allocation184_spill] sm:$0xff]  ;;  %v18263_v22 = vld [vmem:[#allocation29_spill] sm:$0xff] }
 0x573   : > { %v8159_v21 = vadd.f32 %v18253_v51, %v18251_v30  ;;  %v8163_v19 = vadd.f32 %v18259_v44, %v18257_v20  ;;  %v18262_v1 = vunpack.c.h.bf16 %v18261_v62  ;;  %v18264_v23 = vld [vmem:[#allocation185_spill] sm:$0xff]  ;;  %v18266_v35 = vld [vmem:[#allocation34_spill] sm:$0xff]  ;;  %v18270_v3 = vld [vmem:[#allocation187_spill] sm:$0xff]  ;;  %8277 = vst [vmem:[%s16550_s28 + $0x308] sm:$0xff] %v8149_v18 }
 0x574   : > { %v8161_v47 = vadd.f32 %v18256_v57, %v18254_v50  ;;  %v18265_v38 = vunpack.c.h.bf16 %v18264_v23  ;;  %v18267_v37 = vld [vmem:[#allocation186_spill] sm:$0xff]  ;;  %v18269_v46 = vld [vmem:[#allocation33_spill] sm:$0xff]  ;;  %v18271_v8 = vunpack.c.h.bf16 %v18270_v3  ;;  %8279 = vst [vmem:[%s16550_s28 + $0x318] sm:$0xff] %v8151_v29  ;;  %8281 = vst [vmem:[%s16550_s28 + $0x328] sm:$0xff] %v8153_v52 }
 0x575   : > { %v8165_v36 = vadd.f32 %v18262_v1, %v18260_v34  ;;  %v18268_v33 = vunpack.c.h.bf16 %v18267_v37  ;;  %8283 = vst [vmem:[%s16550_s28 + $0x338] sm:$0xff] %v8155_v40  ;;  %v18272_v60 = vld [vmem:[#allocation38_spill] sm:$0xff]  ;;  %v18273_v16 = vld [vmem:[#allocation188_spill] sm:$0xff]  ;;  %v18275_v26 = vld [vmem:[#allocation37_spill] sm:$0xff] }
 0x576   : > { %v8167_v7 = vadd.f32 %v18265_v38, %v18263_v22  ;;  %v8171_v24 = vadd.f32 %v18271_v8, %v18269_v46  ;;  %v18274_v41 = vunpack.c.h.bf16 %v18273_v16  ;;  %v18276_v25 = vld [vmem:[#allocation189_spill] sm:$0xff]  ;;  %v18278_v0 = vld [vmem:[#allocation42_spill] sm:$0xff]  ;;  %v18281_v10 = vld [vmem:[#allocation191_spill] sm:$0xff]  ;;  %8285 = vst [vmem:[%s16550_s28 + $0x348] sm:$0xff] %v8157_v2 }
 0x577   : > { %v8169_v11 = vadd.f32 %v18268_v33, %v18266_v35  ;;  %v18277_v63 = vunpack.c.h.bf16 %v18276_v25  ;;  %v18279_v27 = vld [vmem:[#allocation190_spill] sm:$0xff]  ;;  %v18282_v31 = vunpack.c.h.bf16 %v18281_v10  ;;  %8287 = vst [vmem:[%s16550_s28 + $0x358] sm:$0xff] %v8159_v21  ;;  %8289 = vst [vmem:[%s16550_s28 + $0x368] sm:$0xff] %v8161_v47 }
 0x578   : > { %v8173_v17 = vadd.f32 %v18274_v41, %v18272_v60  ;;  %v18280_v59 = vunpack.c.h.bf16 %v18279_v27  ;;  %8291 = vst [vmem:[%s16550_s28 + $0x378] sm:$0xff] %v8163_v19  ;;  %8293 = vst [vmem:[%s16550_s28 + $0x388] sm:$0xff] %v8165_v36 }
 0x579   : > { %v8175_v14 = vadd.f32 %v18277_v63, %v18275_v26  ;;  %v8179_v53 = vadd.f32 %v18282_v31, %v17036_v12  ;;  %8295 = vst [vmem:[%s16550_s28 + $0x398] sm:$0xff] %v8167_v7  ;;  %8297 = vst [vmem:[%s16550_s28 + $0x3a8] sm:$0xff] %v8169_v11 }
 0x57a   : > { %v8177_v45 = vadd.f32 %v18280_v59, %v18278_v0  ;;  %8299 = vst [vmem:[%s16550_s28 + $0x3b8] sm:$0xff] %v8171_v24  ;;  %8301 = vst [vmem:[%s16550_s28 + $0x3c8] sm:$0xff] %v8173_v17 }
 0x57b   : > { %8303 = vst [vmem:[%s16550_s28 + $0x3d8] sm:$0xff] %v8175_v14  ;;  %8307 = vst [vmem:[%s16550_s28 + $0x3f8] sm:$0xff] %v8179_v53 }
 0x57c   : > { %8305 = vst [vmem:[%s16550_s28 + $0x3e8] sm:$0xff] %v8177_v45 }
 0x57d   : > { %s9055_s18 = sshll.u32 %s13926_s13, 8  ;;  %s8338_s26 = sshll.u32 %s16550_s28, 4  ;;  %s8339_s26 = int_to_ptr.vmem [resolvable:$true] %s8338_s26 }
 0x57e   : > { %s8321_s15 = scalar_lea.hbm %s17341_s9, %s9055_s18  ;;  %s13848_s11 = smov 256  }
 0x57f   : > { %p18283_p2 = scmp.ne.s32.totalorder %s17571_s21, 0  ;;  %s13849_s25 = smov 512  }
 0x580   : > { %s13850_s17 = smov 2   ;;  %s13851_s24 = smov 128  }
 0x581   : > { %12142 = sst [smem:[#allocation15]] (%p18283_p2), %s13848_s11  ;;  %s13852_s13 = smov 8  }
 0x582   : > { %12143 = sst [smem:[#allocation15 + $0x1]] (%p18283_p2), %s13849_s25  ;;  %s13853_s0 = smov [#allocation14]  }
 0x583   : > { %12144 = sst [smem:[#allocation15 + $0x2]] (%p18283_p2), %s13850_s17  ;;  %s13854_s19 = smov 0  }
 0x584   : > { %12145 = sst [smem:[#allocation15 + $0x3]] (%p18283_p2), %s13851_s24 }
 0x585   : > { %12146 = sst [smem:[#allocation15 + $0x4]] (%p18283_p2), %s13851_s24 }
 0x586   : > { %12147 = sst [smem:[#allocation15 + $0x5]] (%p18283_p2), %s13852_s13 }
 0x587   : > { %12148 = dma.general (%p18283_p2), %s8339_s26, 16384, %s8321_s15, %s8309_s29, %s13853_s0, [#allocation15], %s13854_s19, 0  }
 0x588 PF: > { %s8366_s23 = sand.u32 1, %s13816_s30   ;;  %p18284_p3 = scmp.ne.s32.totalorder %s17572_s22, 0 }
 0x589   : > { %s8367_s7 = scalar_lea.sflag [#allocation5], %s8366_s23 }
 0x58a   : > { %p12155_p7 = pnand %p8471_p0, %p18284_p3 }
 0x58c   : > { %12303 = dma.done.wait (!%p12155_p7), %s8367_s7, 16384  }
 0x58d   : > { %12305 = vsyncadd (!%p12155_p7), %s8367_s7, 4294950912  ;;  %s18285_s12 = sld [smem:[#allocation23_spill]]  ;;  %s18286_s14 = sld [smem:[#allocation22_spill]] }
 0x58e   : > { %s18287_s11 = sld [smem:[#allocation24_spill]]  ;;  %s18288_s30 = smov %s13820_s10 }
 0x593   : > { %p25_p8 = scmp.ge.s32.totalorder %s18285_s12, 4   ;;  %s18289_s10 = smov %s18286_s14 }
 0x595   :  { %27 = sbr.rel (!%p25_p8) target bundleno = 10 (0xa), region = 150 }
 0x59c   :  { %8372 = vsyncpa [#allocation4], 1 }
 0x59d   :  { %8374 = vsyncpa [#allocation4 + $0x1], 1 }
 0x59e   :  { %8375 = vsyncpa [#allocation7], 1 }
 0x59f   :  { %8377 = vsyncpa [#allocation7 + $0x1], 1 }
 0x5a0   :  { %8378 = vsyncpa [#allocation5], 1 }
 0x5a1   :  { %8380 = vsyncpa [#allocation5 + $0x1], 1 }

</bundles_post_ra>
